<compile_context>
chip_gen: v5e
topology: v5e:2x2
jax: 0.10.0
libtpu: 0.0.40
codegen_flags: <defaults>
</compile_context>

<pallas_src>
import functools
import math

import jax
import jax.numpy as jnp
from jax.experimental import pallas as pl
from jax.experimental.pallas import tpu as pltpu


# ----------------------------- model constants --------------------------------------
N_HASH_LEVELS = 12
N_FEAT_PER_LEVEL = 2
N_HASH_FEATURES = N_HASH_LEVELS * N_FEAT_PER_LEVEL      # 24
T_MULTIRES = 6
TIME_EMBED_DIM = 1 + 2 * T_MULTIRES                     # 13
D_IN = N_HASH_FEATURES + TIME_EMBED_DIM                 # 37
HEAD_NEURONS = 64

IN_PAD = 128       # 37 input features -> 128 lanes (zero weight rows; padded in-kernel)
HEAD_PAD = 256     # fused head hidden width 3*64 -> 256 lanes (zero-padded)
OUT_W = 16         # packed output width: 3+4+3 useful lanes + 6 pad (8x less HBM vs 128)

D_TRANS, D_ROT, D_SCALE = 3, 4, 3
TRANS_START = 0
ROT_START = TRANS_START + D_TRANS                       # 3
SCALE_START = ROT_START + D_ROT                         # 7


def _round_up(a, b):
    return (a + b - 1) // b * b


# ----------------------------- Pallas kernel ----------------------------------------
def _deform_kernel(log_scale_range,
                   x_ref, w0x_ref, b0_ref, w1_ref, b1_ref, w2_ref, b2_ref,
                   w3h_ref, b3_ref, w4_ref, b4_ref,
                   wh1_ref, bh1_ref, wh2_ref, bh2_ref, o_ref):
    f32, bf16 = jnp.float32, jnp.bfloat16

    x37 = x_ref[...]                                        # [tm, 37] f32
    tm = x37.shape[0]
    # 37 -> 128 lane pad in-register (stays within one lane tile; cheap VPU filler),
    # then cast to bf16 for the MXU.
    x = jnp.concatenate(
        [x37, jnp.zeros((tm, IN_PAD - x37.shape[1]), f32)], axis=-1).astype(bf16)

    # Fused K=128 matmul: columns [0:H] are layer 0 (w0), columns [H:2H] are the
    # x-branch of the skip layer (w3x).  x is loaded / pushed through the MXU once.
    xw = jnp.dot(x, w0x_ref[...], preferred_element_type=f32)          # [tm, 2H] f32
    H = xw.shape[-1] // 2
    x_skip = xw[:, H:]                                                 # reused at layer 3
    h = jnp.maximum(xw[:, :H] + b0_ref[...], 0.0)

    # hidden layers 1-2 (bf16 weights, f32 accumulate, f32 bias/ReLU)
    h = jnp.maximum(jnp.dot(h.astype(bf16), w1_ref[...],
                            preferred_element_type=f32) + b1_ref[...], 0.0)
    h = jnp.maximum(jnp.dot(h.astype(bf16), w2_ref[...],
                            preferred_element_type=f32) + b2_ref[...], 0.0)
    # skip layer: relu(cat([h, x]) @ W3 + b3) == relu(h @ W3h + x @ W3x + b3)
    h = jnp.maximum(jnp.dot(h.astype(bf16), w3h_ref[...],
                            preferred_element_type=f32) + x_skip + b3_ref[...], 0.0)
    # final main-MLP layer (std=1e-5 re-init) kept in f32 for accuracy
    hidden = jnp.dot(h, w4_ref[...], preferred_element_type=f32) + b4_ref[...]  # [tm, H]

    # fused heads (translate / rotation / scaling), lane-packed
    hh = jnp.maximum(jnp.dot(hidden.astype(bf16), wh1_ref[...],
                             preferred_element_type=f32) + bh1_ref[...], 0.0)   # [tm, 256]
    # head output layer kept f32 (tiny [HEAD_PAD, 16] matmul)
    y = jnp.dot(hh, wh2_ref[...], preferred_element_type=f32) + bh2_ref[...]    # [tm, 16]

    # d_scaling lanes: tanh(.) * log(scale_range); rotation's +[1,0,0,0] is already
    # folded into the packed bias.  Only 16 lanes wide, so the epilogue is negligible.
    col = jax.lax.broadcasted_iota(jnp.int32, y.shape, dimension=1)
    scale_lane = (col >= SCALE_START) & (col < SCALE_START + D_SCALE)
    y = jnp.where(scale_lane, jnp.tanh(y) * log_scale_range, y)

    o_ref[...] = y.astype(o_ref.dtype)


def deform_mlp_forward(embed, params, *, log_scale_range, tile_m=1024, min_row_tiles=8):
    """embed: [N, 37] float32 (masked hash features ++ scaled time embedding)."""
    N, d_in = embed.shape
    H = params["w1"].shape[0]

    # Row tile: as large as possible for MXU utilization, but capped so the grid keeps
    # >= min_row_tiles steps (both v7x TensorCores busy + DMA/compute overlap).
    # Multiple of 16 because in-kernel activations are cast to bf16 (sublane packing).
    tm = min(int(tile_m), _round_up(-(-N // int(min_row_tiles)), 16))
    tm = max(16, _round_up(tm, 16))
    grid = (pl.cdiv(N, tm),)     # ragged tail: Pallas masks the partial last block

    def row_map(i):
        return (i, 0)

    def bcast_map(i):
        return (0, 0)

    order = ["w0x", "b0", "w1", "b1", "w2", "b2", "w3h", "b3", "w4", "b4",
             "wh1", "bh1", "wh2", "bh2"]
    weights = [params[k] for k in order]

    # advisory cost estimate so XLA can overlap neighbouring ops with the kernel
    n_rows = grid[0] * tm
    mm_dims = [(IN_PAD, 2 * H), (H, H), (H, H), (H, H), (H, H),
               (H, HEAD_PAD), (HEAD_PAD, OUT_W)]
    flops = 2 * n_rows * sum(k * m for k, m in mm_dims)
    bytes_accessed = (int(embed.size) * embed.dtype.itemsize
                      + N * OUT_W * 4
                      + sum(int(w.size) * w.dtype.itemsize for w in weights))
    cost = pl.CostEstimate(flops=int(flops), transcendentals=int(n_rows * OUT_W),
                           bytes_accessed=int(bytes_accessed))

    kernel = functools.partial(_deform_kernel, float(log_scale_range))

    def build(single_buffer_weights):
        if single_buffer_weights:
            # constant (0,0) index maps -> second pipeline buffer is dead VMEM
            w_specs = [pl.BlockSpec(w.shape, bcast_map, pipeline_mode=pl.Buffered(1))
                       for w in weights]
        else:
            w_specs = [pl.BlockSpec(w.shape, bcast_map) for w in weights]
        return pl.pallas_call(
            kernel,
            out_shape=jax.ShapeDtypeStruct((N, OUT_W), jnp.float32),
            grid_spec=pltpu.PrefetchScalarGridSpec(
                num_scalar_prefetch=0,
                grid=grid,
                in_specs=[pl.BlockSpec((tm, d_in), row_map)] + w_specs,
                out_specs=pl.BlockSpec((tm, OUT_W), row_map),
            ),
            compiler_params=pltpu.CompilerParams(
                dimension_semantics=("parallel",),
                vmem_limit_bytes=32 * 1024 * 1024,
            ),
            cost_estimate=cost,
        )

    try:
        out = build(True)(embed, *weights)
    except Exception:
        # pipeline_mode / pl.Buffered not supported on this jax version -> default
        # double-buffered weight specs (costs ~0.9 MiB extra VMEM, still correct).
        out = build(False)(embed, *weights)
    return out                                            # [N, OUT_W] f32


# ----------------------------- wrapper (non-kernel glue) ----------------------------
def contract_to_unisphere(x, bbox=(-2.0, 2.0)):
    # unbounded=False branch of the module: affine map of bbox -> [0, 1]
    return (x - bbox[0]) / (bbox[1] - bbox[0])


def hashgrid_mask(global_step, n_output_dims=N_HASH_FEATURES, start_level=6,
                  n_levels=N_HASH_LEVELS, n_features_per_level=N_FEAT_PER_LEVEL,
                  update_steps=1000):
    # ProgressiveBandHashGridCosine.update_step / mask
    n_masking_step = (n_levels - start_level) * update_steps
    start_idx = start_level * n_features_per_level
    band_len = n_output_dims - start_idx
    ratio = global_step / n_masking_step
    band = (1.0 - jnp.cos(jnp.pi * jnp.clip(ratio * band_len - jnp.arange(band_len),
                                            0.0, 1.0))) / 2.0
    return jnp.concatenate([jnp.ones((start_idx,), jnp.float32),
                            band.astype(jnp.float32)])


def time_embed(t, multires=T_MULTIRES):
    # Embedder(include_input=True, input_dims=1, log_sampling=True, [sin, cos])
    outs = [t]
    for i in range(multires):
        freq = float(2.0 ** i)
        outs.append(jnp.sin(t * freq))
        outs.append(jnp.cos(t * freq))
    return jnp.concatenate(outs, axis=-1)                 # [N, 1 + 2*multires]


def hash_deform_forward(x_hash_features, t, params, *, global_step=0,
                        log_scale_range=math.log(2.0), tile_m=1024):
    mask = hashgrid_mask(global_step)
    x_embed = x_hash_features * mask
    t_emb = time_embed(t)
    t_emb = t_emb / t_emb.shape[-1] * x_hash_features.shape[-1]
    embed = jnp.concatenate([x_embed, t_emb], axis=-1)    # [N, 37] (no 128-lane HBM pad)
    y = deform_mlp_forward(embed, params, log_scale_range=log_scale_range, tile_m=tile_m)
    return {
        "d_xyz": y[:, TRANS_START:TRANS_START + D_TRANS],
        "d_rotation": y[:, ROT_START:ROT_START + D_ROT],
        "d_scaling": y[:, SCALE_START:SCALE_START + D_SCALE],
        "d_opacity": None,   # pred_opacity=False
        "d_color": None,     # pred_color=False
    }


# ----------------------------- parameter init / packing -----------------------------
def kaiming_uniform(key, fan_in, fan_out):
    # kaiming_uniform_(mode='fan_in', nonlinearity='relu'): bound = sqrt(2)*sqrt(3/fan_in)
    bound = math.sqrt(2.0) * math.sqrt(3.0 / fan_in)
    return jax.random.uniform(key, (fan_in, fan_out), jnp.float32,
                              minval=-bound, maxval=bound)


def init_raw_params(key, dim_in, hidden_dim):
    """Raw (unpacked) weights matching the torch module (num_layers=2, hash_time=False)."""
    H, n = hidden_dim, HEAD_NEURONS
    keys = jax.random.split(key, 11)
    z = lambda c: jnp.zeros((1, c), jnp.float32)
    raw = {
        # main MLP: n_hidden_layers=4, skip=[2]  (skip concat before the 4th linear)
        "w0": kaiming_uniform(keys[0], dim_in, H), "b0": z(H),
        "w1": kaiming_uniform(keys[1], H, H), "b1": z(H),
        "w2": kaiming_uniform(keys[2], H, H), "b2": z(H),
        "w3": kaiming_uniform(keys[3], H + dim_in, H), "b3": z(H),
        # last main-MLP layer re-initialized with normal(0, 1e-5) (hash_time=False path)
        "w4": 1e-5 * jax.random.normal(keys[4], (H, H), jnp.float32), "b4": z(H),
        # heads: MLP(H, out, 64, 1) == Linear(H,64) + ReLU + Linear(64,out)
        "wt1": kaiming_uniform(keys[5], H, n), "bt1": z(n),
        "wt2": kaiming_uniform(keys[6], n, D_TRANS), "bt2": z(D_TRANS),
        "wr1": kaiming_uniform(keys[7], H, n), "br1": z(n),
        "wr2": kaiming_uniform(keys[8], n, D_ROT), "br2": z(D_ROT),
        "ws1": kaiming_uniform(keys[9], H, n), "bs1": z(n),
        "ws2": kaiming_uniform(keys[10], n, D_SCALE), "bs2": z(D_SCALE),
    }
    return raw


def pack_params(raw, dim_in, hidden_dim):
    """Pad / split / fuse / quantize weights once so the kernel only sees lane-aligned
    matmuls.  Hidden-layer weights are stored bf16 (MXU native); the tiny last main-MLP
    layer (std=1e-5) and the head output layer stay f32.  Biases stay f32."""
    H, n, f32, bf16 = hidden_dim, HEAD_NEURONS, jnp.float32, jnp.bfloat16

    # fused first matmul: cols [0:H] = layer-0 weight, cols [H:2H] = x-branch of the
    # skip layer (x @ W3x); zero rows pad the 37 input features up to 128 lanes.
    w0x = jnp.zeros((IN_PAD, 2 * H), f32)
    w0x = w0x.at[:dim_in, :H].set(raw["w0"]).at[:dim_in, H:].set(raw["w3"][H:])
    w3h = raw["w3"][:H]

    wh1 = jnp.zeros((H, HEAD_PAD), f32)
    wh1 = (wh1.at[:, 0 * n:1 * n].set(raw["wt1"])
               .at[:, 1 * n:2 * n].set(raw["wr1"])
               .at[:, 2 * n:3 * n].set(raw["ws1"]))
    bh1 = jnp.zeros((1, HEAD_PAD), f32)
    bh1 = (bh1.at[:, 0 * n:1 * n].set(raw["bt1"])
               .at[:, 1 * n:2 * n].set(raw["br1"])
               .at[:, 2 * n:3 * n].set(raw["bs1"]))

    wh2 = jnp.zeros((HEAD_PAD, OUT_W), f32)
    wh2 = (wh2.at[0 * n:1 * n, TRANS_START:TRANS_START + D_TRANS].set(raw["wt2"])
               .at[1 * n:2 * n, ROT_START:ROT_START + D_ROT].set(raw["wr2"])
               .at[2 * n:3 * n, SCALE_START:SCALE_START + D_SCALE].set(raw["ws2"]))
    bh2 = jnp.zeros((1, OUT_W), f32)
    bh2 = bh2.at[:, TRANS_START:TRANS_START + D_TRANS].set(raw["bt2"])
    # rotation identity offset [1,0,0,0] is added after the linear -> fold into bias
    bh2 = bh2.at[:, ROT_START:ROT_START + D_ROT].set(
        raw["br2"] + jnp.array([[1.0, 0.0, 0.0, 0.0]], f32))
    bh2 = bh2.at[:, SCALE_START:SCALE_START + D_SCALE].set(raw["bs2"])

    return {
        "w0x": w0x.astype(bf16), "b0": raw["b0"],
        "w1": raw["w1"].astype(bf16), "b1": raw["b1"],
        "w2": raw["w2"].astype(bf16), "b2": raw["b2"],
        "w3h": w3h.astype(bf16), "b3": raw["b3"],
        "w4": raw["w4"], "b4": raw["b4"],                 # f32 (std=1e-5 re-init)
        "wh1": wh1.astype(bf16), "bh1": bh1,
        "wh2": wh2, "bh2": bh2,                           # f32 head output layer
    }


# ----------------------------- pure-JAX reference ------------------------------------
def reference_forward(x_hash_features, t, raw, *, global_step=0,
                      log_scale_range=math.log(2.0)):
    relu = lambda v: jnp.maximum(v, 0.0)
    mask = hashgrid_mask(global_step)
    x_embed = x_hash_features * mask
    t_emb = time_embed(t)
    t_emb = t_emb / t_emb.shape[-1] * x_hash_features.shape[-1]
    embed = jnp.concatenate([x_embed, t_emb], axis=-1)

    h = relu(embed @ raw["w0"] + raw["b0"])
    h = relu(h @ raw["w1"] + raw["b1"])
    h = relu(h @ raw["w2"] + raw["b2"])
    h = relu(jnp.concatenate([h, embed], axis=-1) @ raw["w3"] + raw["b3"])
    hidden = h @ raw["w4"] + raw["b4"]

    head = lambda w1, b1, w2, b2: relu(hidden @ w1 + b1) @ w2 + b2
    translate = head(raw["wt1"], raw["bt1"], raw["wt2"], raw["bt2"])
    rotation = head(raw["wr1"], raw["br1"], raw["wr2"], raw["br2"]) \
        + jnp.array([1.0, 0.0, 0.0, 0.0], jnp.float32)
    scaling = jnp.tanh(head(raw["ws1"], raw["bs1"], raw["ws2"], raw["bs2"])) * log_scale_range
    return {"d_xyz": translate, "d_rotation": rotation, "d_scaling": scaling}


# ----------------------------- demo -------------------------------------------------
if __name__ == "__main__":
    # HashDeformNetwork defaults: hash_time=False, num_layers=2, hidden_dim=256,
    # t_multires=6, bbox=(-2, 2), scale_range=2.0
    hidden_dim = 256
    dim_in = D_IN                                        # 24 + 13 = 37
    log_scale_range = math.log(2.0)
    N = 200                                              # small, deliberately ragged

    key = jax.random.PRNGKey(0)
    kx, kt, kf, kp = jax.random.split(key, 4)

    x = 1.5 * jax.random.normal(kx, (N, 3), jnp.float32)   # world-space points
    t = jax.random.uniform(kt, (N, 1), jnp.float32)        # per-point time
    x_c = contract_to_unisphere(x, (-2.0, 2.0))            # -> [0,1]^3 (hash-grid input)
    # TODO(synk): the tinycudann multiresolution hash-grid encoding (hash-table gather +
    # trilinear interpolation) has no clean Pallas equivalent; deterministic stand-in
    # features with the encoder's output shape are used in place of hashgrid(x_c).
    del x_c
    x_hash_features = 0.1 * jax.random.normal(kf, (N, N_HASH_FEATURES), jnp.float32)

    raw = init_raw_params(kp, dim_in, hidden_dim)
    params = pack_params(raw, dim_in, hidden_dim)

    out = hash_deform_forward(x_hash_features, t, params, global_step=0,
                              log_scale_range=log_scale_range, tile_m=1024)
    jax.block_until_ready(out["d_xyz"])
    jax.block_until_ready(out["d_rotation"])
    jax.block_until_ready(out["d_scaling"])

    ref = reference_forward(x_hash_features, t, raw, global_step=0,
                            log_scale_range=log_scale_range)

    assert out["d_xyz"].shape == (N, 3)
    assert out["d_rotation"].shape == (N, 4)
    assert out["d_scaling"].shape == (N, 3)
    assert out["d_opacity"] is None and out["d_color"] is None
    # bf16 hidden-layer matmuls (f32 accumulate) -> compare against the f32 reference
    # at a few-percent-of-magnitude tolerance; this still catches any wiring error.
    for k in ("d_xyz", "d_rotation", "d_scaling"):
        err = float(jnp.max(jnp.abs(out[k] - ref[k])))
        scale = float(jnp.max(jnp.abs(ref[k])))
        assert err <= 5e-2 * scale + 1e-6, (k, err, scale)

    print("KERNEL_OK")
</pallas_src>

<mosaic_0001>
module attributes {stable_mosaic.version = 11 : i64} {
  func.func @_deform_kernel(%arg0: i32, %arg1: memref<32x37xf32, #tpu.memory_space<vmem>>, %arg2: memref<128x512xbf16, #tpu.memory_space<vmem>>, %arg3: memref<1x256xf32, #tpu.memory_space<vmem>>, %arg4: memref<256x256xbf16, #tpu.memory_space<vmem>>, %arg5: memref<1x256xf32, #tpu.memory_space<vmem>>, %arg6: memref<256x256xbf16, #tpu.memory_space<vmem>>, %arg7: memref<1x256xf32, #tpu.memory_space<vmem>>, %arg8: memref<256x256xbf16, #tpu.memory_space<vmem>>, %arg9: memref<1x256xf32, #tpu.memory_space<vmem>>, %arg10: memref<256x256xf32, #tpu.memory_space<vmem>>, %arg11: memref<1x256xf32, #tpu.memory_space<vmem>>, %arg12: memref<256x256xbf16, #tpu.memory_space<vmem>>, %arg13: memref<1x256xf32, #tpu.memory_space<vmem>>, %arg14: memref<256x16xf32, #tpu.memory_space<vmem>>, %arg15: memref<1x16xf32, #tpu.memory_space<vmem>>, %arg16: memref<32x16xf32, #tpu.memory_space<vmem>>) attributes {dimension_semantics = [#tpu.dimension_semantics<parallel>], iteration_bounds = array<i64: 7>, scalar_prefetch = 0 : i64, scratch_operands = 0 : i64, tpu.core_type = #tpu.core_type<tc>, window_params = [{transform_indices = @transform_0, window_bounds = array<i64: 32, 37>}, {pipeline_mode = #tpu.pipeline_mode<synchronous>, transform_indices = @transform_1, window_bounds = array<i64: 128, 512>}, {pipeline_mode = #tpu.pipeline_mode<synchronous>, transform_indices = @transform_2, window_bounds = array<i64: 1, 256>}, {pipeline_mode = #tpu.pipeline_mode<synchronous>, transform_indices = @transform_3, window_bounds = array<i64: 256, 256>}, {pipeline_mode = #tpu.pipeline_mode<synchronous>, transform_indices = @transform_4, window_bounds = array<i64: 1, 256>}, {pipeline_mode = #tpu.pipeline_mode<synchronous>, transform_indices = @transform_5, window_bounds = array<i64: 256, 256>}, {pipeline_mode = #tpu.pipeline_mode<synchronous>, transform_indices = @transform_6, window_bounds = array<i64: 1, 256>}, {pipeline_mode = #tpu.pipeline_mode<synchronous>, transform_indices = @transform_7, window_bounds = array<i64: 256, 256>}, {pipeline_mode = #tpu.pipeline_mode<synchronous>, transform_indices = @transform_8, window_bounds = array<i64: 1, 256>}, {pipeline_mode = #tpu.pipeline_mode<synchronous>, transform_indices = @transform_9, window_bounds = array<i64: 256, 256>}, {pipeline_mode = #tpu.pipeline_mode<synchronous>, transform_indices = @transform_10, window_bounds = array<i64: 1, 256>}, {pipeline_mode = #tpu.pipeline_mode<synchronous>, transform_indices = @transform_11, window_bounds = array<i64: 256, 256>}, {pipeline_mode = #tpu.pipeline_mode<synchronous>, transform_indices = @transform_12, window_bounds = array<i64: 1, 256>}, {pipeline_mode = #tpu.pipeline_mode<synchronous>, transform_indices = @transform_13, window_bounds = array<i64: 256, 16>}, {pipeline_mode = #tpu.pipeline_mode<synchronous>, transform_indices = @transform_14, window_bounds = array<i64: 1, 16>}, {transform_indices = @transform_15, window_bounds = array<i64: 32, 16>}]} {
    %c0 = arith.constant 0 : index
    %c0_0 = arith.constant 0 : index
    %0 = vector.load %arg1[%c0, %c0_0] : memref<32x37xf32, #tpu.memory_space<vmem>>, vector<32x37xf32>
    %cst = arith.constant 0.000000e+00 : f32
    %1 = vector.broadcast %cst : f32 to vector<32x91xf32>
    %2 = tpu.concatenate %0, %1 in 1 : vector<32x37xf32>, vector<32x91xf32> -> vector<32x128xf32>
    %3 = arith.truncf %2 : vector<32x128xf32> to vector<32x128xbf16>
    %c0_1 = arith.constant 0 : index
    %c0_2 = arith.constant 0 : index
    %4 = vector.load %arg2[%c0_1, %c0_2] : memref<128x512xbf16, #tpu.memory_space<vmem>>, vector<128x512xbf16>
    %cst_3 = arith.constant dense<0.000000e+00> : vector<32x512xf32>
    %5 = tpu.matmul %3, %4, %cst_3 {dimension_numbers = #tpu.dot_dimension_numbers<[1], [0], [0], [1], [0, 0, 1, 1], [], []>} : vector<32x128xbf16>, vector<128x512xbf16>, vector<32x512xf32> -> vector<32x512xf32>
    %6 = vector.extract_strided_slice %5 {offsets = [0, 256], sizes = [32, 256], strides = [1, 1]} : vector<32x512xf32> to vector<32x256xf32>
    %7 = vector.extract_strided_slice %5 {offsets = [0, 0], sizes = [32, 256], strides = [1, 1]} : vector<32x512xf32> to vector<32x256xf32>
    %c0_4 = arith.constant 0 : index
    %c0_5 = arith.constant 0 : index
    %8 = vector.load %arg3[%c0_4, %c0_5] : memref<1x256xf32, #tpu.memory_space<vmem>>, vector<1x256xf32>
    %9 = vector.broadcast %8 : vector<1x256xf32> to vector<32x256xf32>
    %10 = arith.addf %7, %9 : vector<32x256xf32>
    %cst_6 = arith.constant 0.000000e+00 : f32
    %11 = vector.broadcast %cst_6 : f32 to vector<32x256xf32>
    %12 = arith.maximumf %10, %11 : vector<32x256xf32>
    %13 = arith.truncf %12 : vector<32x256xf32> to vector<32x256xbf16>
    %c0_7 = arith.constant 0 : index
    %c0_8 = arith.constant 0 : index
    %14 = vector.load %arg4[%c0_7, %c0_8] : memref<256x256xbf16, #tpu.memory_space<vmem>>, vector<256x256xbf16>
    %cst_9 = arith.constant dense<0.000000e+00> : vector<32x256xf32>
    %15 = tpu.matmul %13, %14, %cst_9 {dimension_numbers = #tpu.dot_dimension_numbers<[1], [0], [0], [1], [0, 0, 1, 1], [], []>} : vector<32x256xbf16>, vector<256x256xbf16>, vector<32x256xf32> -> vector<32x256xf32>
    %c0_10 = arith.constant 0 : index
    %c0_11 = arith.constant 0 : index
    %16 = vector.load %arg5[%c0_10, %c0_11] : memref<1x256xf32, #tpu.memory_space<vmem>>, vector<1x256xf32>
    %17 = vector.broadcast %16 : vector<1x256xf32> to vector<32x256xf32>
    %18 = arith.addf %15, %17 : vector<32x256xf32>
    %cst_12 = arith.constant 0.000000e+00 : f32
    %19 = vector.broadcast %cst_12 : f32 to vector<32x256xf32>
    %20 = arith.maximumf %18, %19 : vector<32x256xf32>
    %21 = arith.truncf %20 : vector<32x256xf32> to vector<32x256xbf16>
    %c0_13 = arith.constant 0 : index
    %c0_14 = arith.constant 0 : index
    %22 = vector.load %arg6[%c0_13, %c0_14] : memref<256x256xbf16, #tpu.memory_space<vmem>>, vector<256x256xbf16>
    %cst_15 = arith.constant dense<0.000000e+00> : vector<32x256xf32>
    %23 = tpu.matmul %21, %22, %cst_15 {dimension_numbers = #tpu.dot_dimension_numbers<[1], [0], [0], [1], [0, 0, 1, 1], [], []>} : vector<32x256xbf16>, vector<256x256xbf16>, vector<32x256xf32> -> vector<32x256xf32>
    %c0_16 = arith.constant 0 : index
    %c0_17 = arith.constant 0 : index
    %24 = vector.load %arg7[%c0_16, %c0_17] : memref<1x256xf32, #tpu.memory_space<vmem>>, vector<1x256xf32>
    %25 = vector.broadcast %24 : vector<1x256xf32> to vector<32x256xf32>
    %26 = arith.addf %23, %25 : vector<32x256xf32>
    %cst_18 = arith.constant 0.000000e+00 : f32
    %27 = vector.broadcast %cst_18 : f32 to vector<32x256xf32>
    %28 = arith.maximumf %26, %27 : vector<32x256xf32>
    %29 = arith.truncf %28 : vector<32x256xf32> to vector<32x256xbf16>
    %c0_19 = arith.constant 0 : index
    %c0_20 = arith.constant 0 : index
    %30 = vector.load %arg8[%c0_19, %c0_20] : memref<256x256xbf16, #tpu.memory_space<vmem>>, vector<256x256xbf16>
    %cst_21 = arith.constant dense<0.000000e+00> : vector<32x256xf32>
    %31 = tpu.matmul %29, %30, %cst_21 {dimension_numbers = #tpu.dot_dimension_numbers<[1], [0], [0], [1], [0, 0, 1, 1], [], []>} : vector<32x256xbf16>, vector<256x256xbf16>, vector<32x256xf32> -> vector<32x256xf32>
    %32 = arith.addf %31, %6 : vector<32x256xf32>
    %c0_22 = arith.constant 0 : index
    %c0_23 = arith.constant 0 : index
    %33 = vector.load %arg9[%c0_22, %c0_23] : memref<1x256xf32, #tpu.memory_space<vmem>>, vector<1x256xf32>
    %34 = vector.broadcast %33 : vector<1x256xf32> to vector<32x256xf32>
    %35 = arith.addf %32, %34 : vector<32x256xf32>
    %cst_24 = arith.constant 0.000000e+00 : f32
    %36 = vector.broadcast %cst_24 : f32 to vector<32x256xf32>
    %37 = arith.maximumf %35, %36 : vector<32x256xf32>
    %c0_25 = arith.constant 0 : index
    %c0_26 = arith.constant 0 : index
    %38 = vector.load %arg10[%c0_25, %c0_26] : memref<256x256xf32, #tpu.memory_space<vmem>>, vector<256x256xf32>
    %cst_27 = arith.constant dense<0.000000e+00> : vector<32x256xf32>
    %39 = tpu.matmul %37, %38, %cst_27 {dimension_numbers = #tpu.dot_dimension_numbers<[1], [0], [0], [1], [0, 0, 1, 1], [], []>} : vector<32x256xf32>, vector<256x256xf32>, vector<32x256xf32> -> vector<32x256xf32>
    %c0_28 = arith.constant 0 : index
    %c0_29 = arith.constant 0 : index
    %40 = vector.load %arg11[%c0_28, %c0_29] : memref<1x256xf32, #tpu.memory_space<vmem>>, vector<1x256xf32>
    %41 = vector.broadcast %40 : vector<1x256xf32> to vector<32x256xf32>
    %42 = arith.addf %39, %41 : vector<32x256xf32>
    %43 = arith.truncf %42 : vector<32x256xf32> to vector<32x256xbf16>
    %c0_30 = arith.constant 0 : index
    %c0_31 = arith.constant 0 : index
    %44 = vector.load %arg12[%c0_30, %c0_31] : memref<256x256xbf16, #tpu.memory_space<vmem>>, vector<256x256xbf16>
    %cst_32 = arith.constant dense<0.000000e+00> : vector<32x256xf32>
    %45 = tpu.matmul %43, %44, %cst_32 {dimension_numbers = #tpu.dot_dimension_numbers<[1], [0], [0], [1], [0, 0, 1, 1], [], []>} : vector<32x256xbf16>, vector<256x256xbf16>, vector<32x256xf32> -> vector<32x256xf32>
    %c0_33 = arith.constant 0 : index
    %c0_34 = arith.constant 0 : index
    %46 = vector.load %arg13[%c0_33, %c0_34] : memref<1x256xf32, #tpu.memory_space<vmem>>, vector<1x256xf32>
    %47 = vector.broadcast %46 : vector<1x256xf32> to vector<32x256xf32>
    %48 = arith.addf %45, %47 : vector<32x256xf32>
    %cst_35 = arith.constant 0.000000e+00 : f32
    %49 = vector.broadcast %cst_35 : f32 to vector<32x256xf32>
    %50 = arith.maximumf %48, %49 : vector<32x256xf32>
    %c0_36 = arith.constant 0 : index
    %c0_37 = arith.constant 0 : index
    %51 = vector.load %arg14[%c0_36, %c0_37] : memref<256x16xf32, #tpu.memory_space<vmem>>, vector<256x16xf32>
    %cst_38 = arith.constant dense<0.000000e+00> : vector<32x16xf32>
    %52 = tpu.matmul %50, %51, %cst_38 {dimension_numbers = #tpu.dot_dimension_numbers<[1], [0], [0], [1], [0, 0, 1, 1], [], []>} : vector<32x256xf32>, vector<256x16xf32>, vector<32x16xf32> -> vector<32x16xf32>
    %c0_39 = arith.constant 0 : index
    %c0_40 = arith.constant 0 : index
    %53 = vector.load %arg15[%c0_39, %c0_40] : memref<1x16xf32, #tpu.memory_space<vmem>>, vector<1x16xf32>
    %54 = vector.broadcast %53 : vector<1x16xf32> to vector<32x16xf32>
    %55 = arith.addf %52, %54 : vector<32x16xf32>
    %56 = tpu.iota {dimensions = array<i32: 1>} : vector<32x16xi32>
    %c7_i32 = arith.constant 7 : i32
    %57 = vector.broadcast %c7_i32 : i32 to vector<32x16xi32>
    %58 = arith.cmpi sge, %56, %57 : vector<32x16xi32>
    %c10_i32 = arith.constant 10 : i32
    %59 = vector.broadcast %c10_i32 : i32 to vector<32x16xi32>
    %60 = arith.cmpi slt, %56, %59 : vector<32x16xi32>
    %61 = arith.andi %58, %60 : vector<32x16xi1>
    %62 = math.tanh %55 : vector<32x16xf32>
    %cst_41 = arith.constant 0.693147182 : f32
    %63 = vector.broadcast %cst_41 : f32 to vector<32x16xf32>
    %64 = arith.mulf %62, %63 : vector<32x16xf32>
    %65 = arith.select %61, %64, %55 : vector<32x16xi1>, vector<32x16xf32>
    %c0_42 = arith.constant 0 : index
    %c0_43 = arith.constant 0 : index
    %66 = vector.load %arg16[%c0_42, %c0_43] : memref<32x16xf32, #tpu.memory_space<vmem>>, vector<32x16xf32>
    tpu.vector_store %arg16[%c0_42, %c0_43], %65 {strides = array<i32>} : memref<32x16xf32, #tpu.memory_space<vmem>>, vector<32x16xf32>,
    return
  }
  func.func @transform_0(%arg0: i32) -> (i32, i32) {
    %c0_i32 = arith.constant 0 : i32
    %c0_i32_0 = arith.constant 0 : i32
    return %arg0, %c0_i32 : i32, i32
  }
  func.func @transform_1(%arg0: i32) -> (i32, i32) {
    %c0_i32 = arith.constant 0 : i32
    %c0_i32_0 = arith.constant 0 : i32
    %c0_i32_1 = arith.constant 0 : i32
    return %c0_i32, %c0_i32_0 : i32, i32
  }
  func.func @transform_2(%arg0: i32) -> (i32, i32) {
    %c0_i32 = arith.constant 0 : i32
    %c0_i32_0 = arith.constant 0 : i32
    %c0_i32_1 = arith.constant 0 : i32
    return %c0_i32, %c0_i32_0 : i32, i32
  }
  func.func @transform_3(%arg0: i32) -> (i32, i32) {
    %c0_i32 = arith.constant 0 : i32
    %c0_i32_0 = arith.constant 0 : i32
    %c0_i32_1 = arith.constant 0 : i32
    return %c0_i32, %c0_i32_0 : i32, i32
  }
  func.func @transform_4(%arg0: i32) -> (i32, i32) {
    %c0_i32 = arith.constant 0 : i32
    %c0_i32_0 = arith.constant 0 : i32
    %c0_i32_1 = arith.constant 0 : i32
    return %c0_i32, %c0_i32_0 : i32, i32
  }
  func.func @transform_5(%arg0: i32) -> (i32, i32) {
    %c0_i32 = arith.constant 0 : i32
    %c0_i32_0 = arith.constant 0 : i32
    %c0_i32_1 = arith.constant 0 : i32
    return %c0_i32, %c0_i32_0 : i32, i32
  }
  func.func @transform_6(%arg0: i32) -> (i32, i32) {
    %c0_i32 = arith.constant 0 : i32
    %c0_i32_0 = arith.constant 0 : i32
    %c0_i32_1 = arith.constant 0 : i32
    return %c0_i32, %c0_i32_0 : i32, i32
  }
  func.func @transform_7(%arg0: i32) -> (i32, i32) {
    %c0_i32 = arith.constant 0 : i32
    %c0_i32_0 = arith.constant 0 : i32
    %c0_i32_1 = arith.constant 0 : i32
    return %c0_i32, %c0_i32_0 : i32, i32
  }
  func.func @transform_8(%arg0: i32) -> (i32, i32) {
    %c0_i32 = arith.constant 0 : i32
    %c0_i32_0 = arith.constant 0 : i32
    %c0_i32_1 = arith.constant 0 : i32
    return %c0_i32, %c0_i32_0 : i32, i32
  }
  func.func @transform_9(%arg0: i32) -> (i32, i32) {
    %c0_i32 = arith.constant 0 : i32
    %c0_i32_0 = arith.constant 0 : i32
    %c0_i32_1 = arith.constant 0 : i32
    return %c0_i32, %c0_i32_0 : i32, i32
  }
  func.func @transform_10(%arg0: i32) -> (i32, i32) {
    %c0_i32 = arith.constant 0 : i32
    %c0_i32_0 = arith.constant 0 : i32
    %c0_i32_1 = arith.constant 0 : i32
    return %c0_i32, %c0_i32_0 : i32, i32
  }
  func.func @transform_11(%arg0: i32) -> (i32, i32) {
    %c0_i32 = arith.constant 0 : i32
    %c0_i32_0 = arith.constant 0 : i32
    %c0_i32_1 = arith.constant 0 : i32
    return %c0_i32, %c0_i32_0 : i32, i32
  }
  func.func @transform_12(%arg0: i32) -> (i32, i32) {
    %c0_i32 = arith.constant 0 : i32
    %c0_i32_0 = arith.constant 0 : i32
    %c0_i32_1 = arith.constant 0 : i32
    return %c0_i32, %c0_i32_0 : i32, i32
  }
  func.func @transform_13(%arg0: i32) -> (i32, i32) {
    %c0_i32 = arith.constant 0 : i32
    %c0_i32_0 = arith.constant 0 : i32
    %c0_i32_1 = arith.constant 0 : i32
    return %c0_i32, %c0_i32_0 : i32, i32
  }
  func.func @transform_14(%arg0: i32) -> (i32, i32) {
    %c0_i32 = arith.constant 0 : i32
    %c0_i32_0 = arith.constant 0 : i32
    %c0_i32_1 = arith.constant 0 : i32
    return %c0_i32, %c0_i32_0 : i32, i32
  }
  func.func @transform_15(%arg0: i32) -> (i32, i32) {
    %c0_i32 = arith.constant 0 : i32
    %c0_i32_0 = arith.constant 0 : i32
    return %arg0, %c0_i32 : i32, i32
  }
}

module attributes {stable_mosaic.version = 11 : i64} {
  func.func @_deform_kernel(%arg0: i32, %arg1: memref<32x37xf32, #tpu.memory_space<vmem>>, %arg2: memref<128x512xbf16, #tpu.memory_space<vmem>>, %arg3: memref<1x256xf32, #tpu.memory_space<vmem>>, %arg4: memref<256x256xbf16, #tpu.memory_space<vmem>>, %arg5: memref<1x256xf32, #tpu.memory_space<vmem>>, %arg6: memref<256x256xbf16, #tpu.memory_space<vmem>>, %arg7: memref<1x256xf32, #tpu.memory_space<vmem>>, %arg8: memref<256x256xbf16, #tpu.memory_space<vmem>>, %arg9: memref<1x256xf32, #tpu.memory_space<vmem>>, %arg10: memref<256x256xf32, #tpu.memory_space<vmem>>, %arg11: memref<1x256xf32, #tpu.memory_space<vmem>>, %arg12: memref<256x256xbf16, #tpu.memory_space<vmem>>, %arg13: memref<1x256xf32, #tpu.memory_space<vmem>>, %arg14: memref<256x16xf32, #tpu.memory_space<vmem>>, %arg15: memref<1x16xf32, #tpu.memory_space<vmem>>, %arg16: memref<32x16xf32, #tpu.memory_space<vmem>>) attributes {dimension_semantics = [#tpu.dimension_semantics<parallel>], iteration_bounds = array<i64: 7>, scalar_prefetch = 0 : i64, scratch_operands = 0 : i64, tpu.core_type = #tpu.core_type<tc>, window_params = [{transform_indices = @transform_0, window_bounds = array<i64: 32, 37>}, {pipeline_mode = #tpu.pipeline_mode<synchronous>, transform_indices = @transform_1, window_bounds = array<i64: 128, 512>}, {pipeline_mode = #tpu.pipeline_mode<synchronous>, transform_indices = @transform_2, window_bounds = array<i64: 1, 256>}, {pipeline_mode = #tpu.pipeline_mode<synchronous>, transform_indices = @transform_3, window_bounds = array<i64: 256, 256>}, {pipeline_mode = #tpu.pipeline_mode<synchronous>, transform_indices = @transform_4, window_bounds = array<i64: 1, 256>}, {pipeline_mode = #tpu.pipeline_mode<synchronous>, transform_indices = @transform_5, window_bounds = array<i64: 256, 256>}, {pipeline_mode = #tpu.pipeline_mode<synchronous>, transform_indices = @transform_6, window_bounds = array<i64: 1, 256>}, {pipeline_mode = #tpu.pipeline_mode<synchronous>, transform_indices = @transform_7, window_bounds = array<i64: 256, 256>}, {pipeline_mode = #tpu.pipeline_mode<synchronous>, transform_indices = @transform_8, window_bounds = array<i64: 1, 256>}, {pipeline_mode = #tpu.pipeline_mode<synchronous>, transform_indices = @transform_9, window_bounds = array<i64: 256, 256>}, {pipeline_mode = #tpu.pipeline_mode<synchronous>, transform_indices = @transform_10, window_bounds = array<i64: 1, 256>}, {pipeline_mode = #tpu.pipeline_mode<synchronous>, transform_indices = @transform_11, window_bounds = array<i64: 256, 256>}, {pipeline_mode = #tpu.pipeline_mode<synchronous>, transform_indices = @transform_12, window_bounds = array<i64: 1, 256>}, {pipeline_mode = #tpu.pipeline_mode<synchronous>, transform_indices = @transform_13, window_bounds = array<i64: 256, 16>}, {pipeline_mode = #tpu.pipeline_mode<synchronous>, transform_indices = @transform_14, window_bounds = array<i64: 1, 16>}, {transform_indices = @transform_15, window_bounds = array<i64: 32, 16>}]} {
    %c0 = arith.constant 0 : index
    %c0_0 = arith.constant 0 : index
    %0 = vector.load %arg1[%c0, %c0_0] : memref<32x37xf32, #tpu.memory_space<vmem>>, vector<32x37xf32>
    %cst = arith.constant 0.000000e+00 : f32
    %1 = vector.broadcast %cst : f32 to vector<32x91xf32>
    %2 = tpu.concatenate %0, %1 in 1 : vector<32x37xf32>, vector<32x91xf32> -> vector<32x128xf32>
    %3 = arith.truncf %2 : vector<32x128xf32> to vector<32x128xbf16>
    %c0_1 = arith.constant 0 : index
    %c0_2 = arith.constant 0 : index
    %4 = vector.load %arg2[%c0_1, %c0_2] : memref<128x512xbf16, #tpu.memory_space<vmem>>, vector<128x512xbf16>
    %cst_3 = arith.constant dense<0.000000e+00> : vector<32x512xf32>
    %5 = tpu.matmul %3, %4, %cst_3 {dimension_numbers = #tpu.dot_dimension_numbers<[1], [0], [0], [1], [0, 0, 1, 1], [], []>} : vector<32x128xbf16>, vector<128x512xbf16>, vector<32x512xf32> -> vector<32x512xf32>
    %6 = vector.extract_strided_slice %5 {offsets = [0, 256], sizes = [32, 256], strides = [1, 1]} : vector<32x512xf32> to vector<32x256xf32>
    %7 = vector.extract_strided_slice %5 {offsets = [0, 0], sizes = [32, 256], strides = [1, 1]} : vector<32x512xf32> to vector<32x256xf32>
    %c0_4 = arith.constant 0 : index
    %c0_5 = arith.constant 0 : index
    %8 = vector.load %arg3[%c0_4, %c0_5] : memref<1x256xf32, #tpu.memory_space<vmem>>, vector<1x256xf32>
    %9 = vector.broadcast %8 : vector<1x256xf32> to vector<32x256xf32>
    %10 = arith.addf %7, %9 : vector<32x256xf32>
    %cst_6 = arith.constant 0.000000e+00 : f32
    %11 = vector.broadcast %cst_6 : f32 to vector<32x256xf32>
    %12 = arith.maximumf %10, %11 : vector<32x256xf32>
    %13 = arith.truncf %12 : vector<32x256xf32> to vector<32x256xbf16>
    %c0_7 = arith.constant 0 : index
    %c0_8 = arith.constant 0 : index
    %14 = vector.load %arg4[%c0_7, %c0_8] : memref<256x256xbf16, #tpu.memory_space<vmem>>, vector<256x256xbf16>
    %cst_9 = arith.constant dense<0.000000e+00> : vector<32x256xf32>
    %15 = tpu.matmul %13, %14, %cst_9 {dimension_numbers = #tpu.dot_dimension_numbers<[1], [0], [0], [1], [0, 0, 1, 1], [], []>} : vector<32x256xbf16>, vector<256x256xbf16>, vector<32x256xf32> -> vector<32x256xf32>
    %c0_10 = arith.constant 0 : index
    %c0_11 = arith.constant 0 : index
    %16 = vector.load %arg5[%c0_10, %c0_11] : memref<1x256xf32, #tpu.memory_space<vmem>>, vector<1x256xf32>
    %17 = vector.broadcast %16 : vector<1x256xf32> to vector<32x256xf32>
    %18 = arith.addf %15, %17 : vector<32x256xf32>
    %cst_12 = arith.constant 0.000000e+00 : f32
    %19 = vector.broadcast %cst_12 : f32 to vector<32x256xf32>
    %20 = arith.maximumf %18, %19 : vector<32x256xf32>
    %21 = arith.truncf %20 : vector<32x256xf32> to vector<32x256xbf16>
    %c0_13 = arith.constant 0 : index
    %c0_14 = arith.constant 0 : index
    %22 = vector.load %arg6[%c0_13, %c0_14] : memref<256x256xbf16, #tpu.memory_space<vmem>>, vector<256x256xbf16>
    %cst_15 = arith.constant dense<0.000000e+00> : vector<32x256xf32>
    %23 = tpu.matmul %21, %22, %cst_15 {dimension_numbers = #tpu.dot_dimension_numbers<[1], [0], [0], [1], [0, 0, 1, 1], [], []>} : vector<32x256xbf16>, vector<256x256xbf16>, vector<32x256xf32> -> vector<32x256xf32>
    %c0_16 = arith.constant 0 : index
    %c0_17 = arith.constant 0 : index
    %24 = vector.load %arg7[%c0_16, %c0_17] : memref<1x256xf32, #tpu.memory_space<vmem>>, vector<1x256xf32>
    %25 = vector.broadcast %24 : vector<1x256xf32> to vector<32x256xf32>
    %26 = arith.addf %23, %25 : vector<32x256xf32>
    %cst_18 = arith.constant 0.000000e+00 : f32
    %27 = vector.broadcast %cst_18 : f32 to vector<32x256xf32>
    %28 = arith.maximumf %26, %27 : vector<32x256xf32>
    %29 = arith.truncf %28 : vector<32x256xf32> to vector<32x256xbf16>
    %c0_19 = arith.constant 0 : index
    %c0_20 = arith.constant 0 : index
    %30 = vector.load %arg8[%c0_19, %c0_20] : memref<256x256xbf16, #tpu.memory_space<vmem>>, vector<256x256xbf16>
    %cst_21 = arith.constant dense<0.000000e+00> : vector<32x256xf32>
    %31 = tpu.matmul %29, %30, %cst_21 {dimension_numbers = #tpu.dot_dimension_numbers<[1], [0], [0], [1], [0, 0, 1, 1], [], []>} : vector<32x256xbf16>, vector<256x256xbf16>, vector<32x256xf32> -> vector<32x256xf32>
    %32 = arith.addf %31, %6 : vector<32x256xf32>
    %c0_22 = arith.constant 0 : index
    %c0_23 = arith.constant 0 : index
    %33 = vector.load %arg9[%c0_22, %c0_23] : memref<1x256xf32, #tpu.memory_space<vmem>>, vector<1x256xf32>
    %34 = vector.broadcast %33 : vector<1x256xf32> to vector<32x256xf32>
    %35 = arith.addf %32, %34 : vector<32x256xf32>
    %cst_24 = arith.constant 0.000000e+00 : f32
    %36 = vector.broadcast %cst_24 : f32 to vector<32x256xf32>
    %37 = arith.maximumf %35, %36 : vector<32x256xf32>
    %c0_25 = arith.constant 0 : index
    %c0_26 = arith.constant 0 : index
    %38 = vector.load %arg10[%c0_25, %c0_26] : memref<256x256xf32, #tpu.memory_space<vmem>>, vector<256x256xf32>
    %cst_27 = arith.constant dense<0.000000e+00> : vector<32x256xf32>
    %39 = tpu.matmul %37, %38, %cst_27 {dimension_numbers = #tpu.dot_dimension_numbers<[1], [0], [0], [1], [0, 0, 1, 1], [], []>} : vector<32x256xf32>, vector<256x256xf32>, vector<32x256xf32> -> vector<32x256xf32>
    %c0_28 = arith.constant 0 : index
    %c0_29 = arith.constant 0 : index
    %40 = vector.load %arg11[%c0_28, %c0_29] : memref<1x256xf32, #tpu.memory_space<vmem>>, vector<1x256xf32>
    %41 = vector.broadcast %40 : vector<1x256xf32> to vector<32x256xf32>
    %42 = arith.addf %39, %41 : vector<32x256xf32>
    %43 = arith.truncf %42 : vector<32x256xf32> to vector<32x256xbf16>
    %c0_30 = arith.constant 0 : index
    %c0_31 = arith.constant 0 : index
    %44 = vector.load %arg12[%c0_30, %c0_31] : memref<256x256xbf16, #tpu.memory_space<vmem>>, vector<256x256xbf16>
    %cst_32 = arith.constant dense<0.000000e+00> : vector<32x256xf32>
    %45 = tpu.matmul %43, %44, %cst_32 {dimension_numbers = #tpu.dot_dimension_numbers<[1], [0], [0], [1], [0, 0, 1, 1], [], []>} : vector<32x256xbf16>, vector<256x256xbf16>, vector<32x256xf32> -> vector<32x256xf32>
    %c0_33 = arith.constant 0 : index
    %c0_34 = arith.constant 0 : index
    %46 = vector.load %arg13[%c0_33, %c0_34] : memref<1x256xf32, #tpu.memory_space<vmem>>, vector<1x256xf32>
    %47 = vector.broadcast %46 : vector<1x256xf32> to vector<32x256xf32>
    %48 = arith.addf %45, %47 : vector<32x256xf32>
    %cst_35 = arith.constant 0.000000e+00 : f32
    %49 = vector.broadcast %cst_35 : f32 to vector<32x256xf32>
    %50 = arith.maximumf %48, %49 : vector<32x256xf32>
    %c0_36 = arith.constant 0 : index
    %c0_37 = arith.constant 0 : index
    %51 = vector.load %arg14[%c0_36, %c0_37] : memref<256x16xf32, #tpu.memory_space<vmem>>, vector<256x16xf32>
    %cst_38 = arith.constant dense<0.000000e+00> : vector<32x16xf32>
    %52 = tpu.matmul %50, %51, %cst_38 {dimension_numbers = #tpu.dot_dimension_numbers<[1], [0], [0], [1], [0, 0, 1, 1], [], []>} : vector<32x256xf32>, vector<256x16xf32>, vector<32x16xf32> -> vector<32x16xf32>
    %c0_39 = arith.constant 0 : index
    %c0_40 = arith.constant 0 : index
    %53 = vector.load %arg15[%c0_39, %c0_40] : memref<1x16xf32, #tpu.memory_space<vmem>>, vector<1x16xf32>
    %54 = vector.broadcast %53 : vector<1x16xf32> to vector<32x16xf32>
    %55 = arith.addf %52, %54 : vector<32x16xf32>
    %56 = tpu.iota {dimensions = array<i32: 1>} : vector<32x16xi32>
    %c7_i32 = arith.constant 7 : i32
    %57 = vector.broadcast %c7_i32 : i32 to vector<32x16xi32>
    %58 = arith.cmpi sge, %56, %57 : vector<32x16xi32>
    %c10_i32 = arith.constant 10 : i32
    %59 = vector.broadcast %c10_i32 : i32 to vector<32x16xi32>
    %60 = arith.cmpi slt, %56, %59 : vector<32x16xi32>
    %61 = arith.andi %58, %60 : vector<32x16xi1>
    %62 = math.tanh %55 : vector<32x16xf32>
    %cst_41 = arith.constant 0.693147182 : f32
    %63 = vector.broadcast %cst_41 : f32 to vector<32x16xf32>
    %64 = arith.mulf %62, %63 : vector<32x16xf32>
    %65 = arith.select %61, %64, %55 : vector<32x16xi1>, vector<32x16xf32>
    %c0_42 = arith.constant 0 : index
    %c0_43 = arith.constant 0 : index
    %66 = vector.load %arg16[%c0_42, %c0_43] : memref<32x16xf32, #tpu.memory_space<vmem>>, vector<32x16xf32>
    tpu.vector_store %arg16[%c0_42, %c0_43], %65 {strides = array<i32>} : memref<32x16xf32, #tpu.memory_space<vmem>>, vector<32x16xf32>,
    return
  }
  func.func @transform_0(%arg0: i32) -> (i32, i32) {
    %c0_i32 = arith.constant 0 : i32
    %c0_i32_0 = arith.constant 0 : i32
    return %arg0, %c0_i32 : i32, i32
  }
  func.func @transform_1(%arg0: i32) -> (i32, i32) {
    %c0_i32 = arith.constant 0 : i32
    %c0_i32_0 = arith.constant 0 : i32
    %c0_i32_1 = arith.constant 0 : i32
    return %c0_i32, %c0_i32_0 : i32, i32
  }
  func.func @transform_2(%arg0: i32) -> (i32, i32) {
    %c0_i32 = arith.constant 0 : i32
    %c0_i32_0 = arith.constant 0 : i32
    %c0_i32_1 = arith.constant 0 : i32
    return %c0_i32, %c0_i32_0 : i32, i32
  }
  func.func @transform_3(%arg0: i32) -> (i32, i32) {
    %c0_i32 = arith.constant 0 : i32
    %c0_i32_0 = arith.constant 0 : i32
    %c0_i32_1 = arith.constant 0 : i32
    return %c0_i32, %c0_i32_0 : i32, i32
  }
  func.func @transform_4(%arg0: i32) -> (i32, i32) {
    %c0_i32 = arith.constant 0 : i32
    %c0_i32_0 = arith.constant 0 : i32
    %c0_i32_1 = arith.constant 0 : i32
    return %c0_i32, %c0_i32_0 : i32, i32
  }
  func.func @transform_5(%arg0: i32) -> (i32, i32) {
    %c0_i32 = arith.constant 0 : i32
    %c0_i32_0 = arith.constant 0 : i32
    %c0_i32_1 = arith.constant 0 : i32
    return %c0_i32, %c0_i32_0 : i32, i32
  }
  func.func @transform_6(%arg0: i32) -> (i32, i32) {
    %c0_i32 = arith.constant 0 : i32
    %c0_i32_0 = arith.constant 0 : i32
    %c0_i32_1 = arith.constant 0 : i32
    return %c0_i32, %c0_i32_0 : i32, i32
  }
  func.func @transform_7(%arg0: i32) -> (i32, i32) {
    %c0_i32 = arith.constant 0 : i32
    %c0_i32_0 = arith.constant 0 : i32
    %c0_i32_1 = arith.constant 0 : i32
    return %c0_i32, %c0_i32_0 : i32, i32
  }
  func.func @transform_8(%arg0: i32) -> (i32, i32) {
    %c0_i32 = arith.constant 0 : i32
    %c0_i32_0 = arith.constant 0 : i32
    %c0_i32_1 = arith.constant 0 : i32
    return %c0_i32, %c0_i32_0 : i32, i32
  }
  func.func @transform_9(%arg0: i32) -> (i32, i32) {
    %c0_i32 = arith.constant 0 : i32
    %c0_i32_0 = arith.constant 0 : i32
    %c0_i32_1 = arith.constant 0 : i32
    return %c0_i32, %c0_i32_0 : i32, i32
  }
  func.func @transform_10(%arg0: i32) -> (i32, i32) {
    %c0_i32 = arith.constant 0 : i32
    %c0_i32_0 = arith.constant 0 : i32
    %c0_i32_1 = arith.constant 0 : i32
    return %c0_i32, %c0_i32_0 : i32, i32
  }
  func.func @transform_11(%arg0: i32) -> (i32, i32) {
    %c0_i32 = arith.constant 0 : i32
    %c0_i32_0 = arith.constant 0 : i32
    %c0_i32_1 = arith.constant 0 : i32
    return %c0_i32, %c0_i32_0 : i32, i32
  }
  func.func @transform_12(%arg0: i32) -> (i32, i32) {
    %c0_i32 = arith.constant 0 : i32
    %c0_i32_0 = arith.constant 0 : i32
    %c0_i32_1 = arith.constant 0 : i32
    return %c0_i32, %c0_i32_0 : i32, i32
  }
  func.func @transform_13(%arg0: i32) -> (i32, i32) {
    %c0_i32 = arith.constant 0 : i32
    %c0_i32_0 = arith.constant 0 : i32
    %c0_i32_1 = arith.constant 0 : i32
    return %c0_i32, %c0_i32_0 : i32, i32
  }
  func.func @transform_14(%arg0: i32) -> (i32, i32) {
    %c0_i32 = arith.constant 0 : i32
    %c0_i32_0 = arith.constant 0 : i32
    %c0_i32_1 = arith.constant 0 : i32
    return %c0_i32, %c0_i32_0 : i32, i32
  }
  func.func @transform_15(%arg0: i32) -> (i32, i32) {
    %c0_i32 = arith.constant 0 : i32
    %c0_i32_0 = arith.constant 0 : i32
    return %arg0, %c0_i32 : i32, i32
  }
}

</mosaic_0001>

<bundles_post_ra>
// kernel: tpu_custom_call.1
= control target key start
LH: loop header
LB: loop body
LE: loop exit
PB: predicated region body
PF: predicated region fallthrough
CT: control target
= control target key end

     0   :  { %s4606_s0 = inlined_call_operand.vmem [shape: f32[200,37], index: 0, kind: input, shape index: {}]   ;;  %s4607_s1 = inlined_call_operand.hbm [shape: bf16[128,512], index: 1, kind: input, shape index: {}]   ;;  %s4608_s2 = inlined_call_operand.vmem [shape: f32[1,256], index: 2, kind: input, shape index: {}]   ;;  %s4609_s3 = inlined_call_operand.hbm [shape: bf16[256,256], index: 3, kind: input, shape index: {}]   ;;  %s4610_s4 = inlined_call_operand.vmem [shape: f32[1,256], index: 4, kind: input, shape index: {}]   ;;  %s4611_s5 = inlined_call_operand.hbm [shape: bf16[256,256], index: 5, kind: input, shape index: {}]   ;;  %s4612_s6 = inlined_call_operand.vmem [shape: f32[1,256], index: 6, kind: input, shape index: {}]   ;;  %s4613_s7 = inlined_call_operand.hbm [shape: bf16[256,256], index: 7, kind: input, shape index: {}]   ;;  %s4614_s8 = inlined_call_operand.vmem [shape: f32[1,256], index: 8, kind: input, shape index: {}]   ;;  %s4615_s9 = inlined_call_operand.vmem [shape: f32[256,256], index: 9, kind: input, shape index: {}]   ;;  %s4616_s10 = inlined_call_operand.vmem [shape: f32[1,256], index: 10, kind: input, shape index: {}]   ;;  %s4617_s11 = inlined_call_operand.hbm [shape: bf16[256,256], index: 11, kind: input, shape index: {}]   ;;  %s4618_s12 = inlined_call_operand.vmem [shape: f32[1,256], index: 12, kind: input, shape index: {}]   ;;  %s4619_s13 = inlined_call_operand.vmem [shape: f32[256,16], index: 13, kind: input, shape index: {}]   ;;  %s4620_s14 = inlined_call_operand.vmem [shape: f32[1,16], index: 14, kind: input, shape index: {}]   ;;  %s4621_s15 = inlined_call_operand.vmem [shape: f32[200,16], index: 15, kind: output, shape index: {}]  }
   0x1   :  { %4627 = sst [smem:[#allocation19_spill]] %s4607_s1 }
   0x2   :  { %4628 = sst [smem:[#allocation20_spill]] %s4609_s3 }
   0x3   :  { %4629 = sst [smem:[#allocation21_spill]] %s4613_s7 }
   0x4   :  { %4630 = sst [smem:[#allocation22_spill]] %s4620_s14 }
   0x5   :  { %4631 = sst [smem:[#allocation23_spill]] %s4621_s15 }
   0x6   :  { %20 = vsyncpa [#allocation3], 0 }
   0x7   :  { %21 = vsyncpa [#allocation5], 0 }
   0x8   :  { %22 = vsyncpa [#allocation8], 0  ;;  %s4016_s18 = smov 0   ;;  %s4018_s19 = smov 0  }
   0x9   :  { %s4020_s20 = smov 0  }
   0xa LB: > { %4632 = sst [smem:[#allocation14_spill]] %s3885_s18  ;;  %s4029_s21 = sadd.s32 4294967295, %s3893_s20   ;;  %s3893_s20 = sphi %s4020_s20, %s4654_s20   ;;  %s3889_s19 = sphi %s4018_s19, %s4656_s19   ;;  %s3885_s18 = sphi %s4016_s18, %s4655_s18  }
   0xb   : > { %4633 = sst [smem:[#allocation15_spill]] %s3889_s19  ;;  %s4031_s22 = sadd.s32 1, %s3893_s20  }
   0xc   : > { %4634 = sst [smem:[#allocation16_spill]] %s4031_s22  ;;  %s352_s23 = ssub.s32 %s3893_s20, %s4031_s22 }
   0xd   : > { %s355_s24 = sadd.s32 1, %s3889_s19  ;;  %p353_p0 = scmp.eq.s32.totalorder %s352_s23, 0 }
   0xe   : > { %p365_p1 = scmp.ne.s32.totalorder %s3889_s19, %s3885_s18  ;;  %p366_p2 = scmp.eq.s32.totalorder %s4029_s21, 6 }
   0xf   : > { %p2633_p3 = scmp.ge.s32.totalorder %s3893_s20, 1  ;;  %p379_p5 = scmp.lt.s32.totalorder %s3893_s20, 8 }
  0x10   : > { %s4039_s25 = scalar_select %p353_p0, %s3889_s19, %s355_s24  }
  0x11   : > { %p4041_p4 = por %p366_p2, %p365_p1  ;;  %p3561_p6 = scmp.eq.s32.totalorder %s4029_s21, 0 }
  0x12   : > { %4635 = sst [smem:[#allocation17_spill]] %s4039_s25  ;;  %p4046_p7 = pnand %p2633_p3, %p379_p5 }
  0x13   : > { %s4636_s26 = scalar_select %p4041_p4, 1, 0 }
  0x14   : > { %s4639_s3 = sld [smem:[#allocation20_spill]]  ;;  %p3545_p8 = pneg %p4046_p7 }
  0x15   : > { %4637 = sst [smem:[#allocation18_spill]] %s4636_s26  ;;  %s3927_s16 = smov [#allocation4]  }
  0x16   : > { %s409_s17 = sshll.u32 %s3927_s16, 4  ;;  %p4057_p9 = pnand %p3561_p6, %p3545_p8  ;;  %s410_s17 = int_to_ptr.vmem [resolvable:$true] %s409_s17 }
  0x17   : > { %s4641_s7 = sld [smem:[#allocation21_spill]]  ;;  %s3928_s28 = smov 128  }
  0x18   : > { %s3929_s29 = smov 8   ;;  %s4642_s1 = sld [smem:[#allocation19_spill]] }
  0x19   : > { %s3931_s20 = smov [#allocation2]   ;;  %s424_s14 = sshll.u32 %s4611_s5, 4  ;;  %s425_s14 = int_to_ptr.hbm [resolvable:$true] %s424_s14 }
  0x1a   : > { %s407_s30 = sshll.u32 %s4639_s3, 4  ;;  %s3930_s3 = smov [#allocation7]   ;;  %s408_s30 = int_to_ptr.hbm [resolvable:$true] %s407_s30 }
  0x1b   : > { %3551 = dma.hbm_to_vmem [thread:$0]  (!%p4057_p9), %s408_s30, 4096, %s410_s17, [#allocation5], %s3928_s28, %s3928_s28, %s3929_s29  }
  0x1c   : > { %s443_s16 = sshll.u32 %s3930_s3, 4  ;;  %s392_s24 = sshll.u32 %s3931_s20, 4  ;;  %s444_s16 = int_to_ptr.vmem [resolvable:$true] %s443_s16  ;;  %s393_s24 = int_to_ptr.vmem [resolvable:$true] %s392_s24 }
  0x1d   : > { %s441_s25 = sshll.u32 %s4641_s7, 4  ;;  %s3932_s30 = smov 256   ;;  %s442_s25 = int_to_ptr.hbm [resolvable:$true] %s441_s25 }
  0x1e   : > { %s390_s15 = sshll.u32 %s4642_s1, 4  ;;  %s3933_s17 = smov 16   ;;  %s391_s15 = int_to_ptr.hbm [resolvable:$true] %s390_s15 }
  0x1f   : > { %3557 = dma.hbm_to_vmem [thread:$0]  (!%p4057_p9), %s442_s25, 4096, %s444_s16, [#allocation8], %s3928_s28, %s3928_s28, %s3929_s29  }
  0x20   : > { %3548 = dma.hbm_to_vmem [thread:$0]  (!%p4057_p9), %s391_s15, 4096, %s393_s24, [#allocation3], %s3932_s30, %s3932_s30, %s3933_s17  }
  0x21   : > { %s3934_s3 = smov [#allocation6]   ;;  %s464_s18 = sshll.u32 %s4617_s11, 4  ;;  %s465_s18 = int_to_ptr.hbm [resolvable:$true] %s464_s18 }
  0x22   : > { %s426_s19 = sshll.u32 %s3934_s3, 4  ;;  %s3935_s25 = smov [#allocation9]   ;;  %s427_s19 = int_to_ptr.vmem [resolvable:$true] %s426_s19 }
  0x23   : > { %3554 = dma.hbm_to_vmem [thread:$0]  (!%p4057_p9), %s425_s14, 4096, %s427_s19, [#allocation5], %s3928_s28, %s3928_s28, %s3929_s29  }
  0x24   : > { %s466_s16 = sshll.u32 %s3935_s25, 4  ;;  %508 = sbr.rel (%p4046_p7) target bundleno = 1140 (0x474), region = 80  ;;  %s467_s16 = int_to_ptr.vmem [resolvable:$true] %s466_s16 }
  0x25   : > { %3560 = dma.hbm_to_vmem [thread:$0]  (!%p4057_p9), %s465_s18, 4096, %s467_s16, [#allocation8], %s3928_s28, %s3928_s28, %s3929_s29  }
  0x29   : > { %3872 = dma.done.wait (%p3561_p6), [#allocation3], 4096  }
  0x2a   : > { %3874 = vsyncadd (%p3561_p6), [#allocation3], 4294963200 }
  0x2b   : > { %3876 = dma.done.wait (%p3561_p6), [#allocation5], 8192  }
  0x2c   : > { %3878 = vsyncadd (%p3561_p6), [#allocation5], 4294959104 }
  0x2d   : > { %3880 = dma.done.wait (%p3561_p6), [#allocation8], 8192  }
  0x2e   : > { %3882 = vsyncadd (%p3561_p6), [#allocation8], 4294959104  ;;  %v2763_v0 = vld [vmem:[#allocation2 + $0xe0] sm:$0xf]  ;;  %v3360_v1 = vld [vmem:[#allocation2 + $0xec] sm:$0xf0] }
  0x2f   : > { %v3358_v2 = vld [vmem:[#allocation2 + $0xe4] sm:$0xf]  ;;  %v2764_v3 = vor.u32 %v3360_v1, %v2763_v0  ;;  %v2765_v4 = vld [vmem:[#allocation2 + $0xf0] sm:$0xf0]  ;;  %v2747_v5 = vld [vmem:[#allocation2 + $0xc0] sm:$0xf] }
  0x30   : > { %v3356_v6 = vld [vmem:[#allocation2 + $0xcc] sm:$0xf0]  ;;  %v2768_v7 = vor.u32 %v3358_v2, %v2765_v4  ;;  %v3354_v8 = vld [vmem:[#allocation2 + $0xc4] sm:$0xf]  ;;  %v2749_v9 = vld [vmem:[#allocation2 + $0xd0] sm:$0xf0] }
  0x31   : > { %802 = vmatpush.bf16.msra.mxu0 %v2764_v3  ;;  %v2748_v10 = vor.u32 %v3356_v6, %v2747_v5  ;;  %v2752_v11 = vor.u32 %v3354_v8, %v2749_v9  ;;  %v2731_v12 = vld [vmem:[#allocation2 + $0xa0] sm:$0xf]  ;;  %v3352_v13 = vld [vmem:[#allocation2 + $0xac] sm:$0xf0]  ;;  %v3350_v14 = vld [vmem:[#allocation2 + $0xa4] sm:$0xf] }
  0x32   : > { %821 = vmatpush.bf16.msra.mxu1 %v2768_v7  ;;  %v2733_v15 = vld [vmem:[#allocation2 + $0xb0] sm:$0xf0]  ;;  %v2732_v16 = vor.u32 %v3352_v13, %v2731_v12  ;;  %s4098_s1 = sshll.u32 %s4029_s21, 2  ;;  %v2715_v18 = vld [vmem:[#allocation2 + $0x80] sm:$0xf]  ;;  %vm603_vm0 = vcmask 302080  }
  0x33   : > { %v2736_v17 = vor.u32 %v3350_v14, %v2733_v15  ;;  %v3348_v19 = vld [vmem:[#allocation2 + $0x8c] sm:$0xf0]  ;;  %v3346_v20 = vld [vmem:[#allocation2 + $0x84] sm:$0xf]  ;;  %v2717_v21 = vld [vmem:[#allocation2 + $0x90] sm:$0xf0] }
  0x34   : > { %p585_p10 = scmp.lt.s32.totalorder %s4098_s1, 24  ;;  %v2716_v22 = vor.u32 %v3348_v19, %v2715_v18  ;;  %v2720_v23 = vor.u32 %v3346_v20, %v2717_v21  ;;  %v2699_v24 = vld [vmem:[#allocation2 + $0x60] sm:$0xf]  ;;  %v3344_v25 = vld [vmem:[#allocation2 + $0x6c] sm:$0xf0]  ;;  %vm4112_vm1 = vmpackc.low %vm603_vm0, %vm603_vm0  ;;  %s4645_s30 = sld [smem:[#allocation14_spill]] }
  0x35   : > { %803 = vmatpush.bf16.msra.mxu0 %v2748_v10  ;;  %v3342_v26 = vld [vmem:[#allocation2 + $0x64] sm:$0xf]  ;;  %v2701_v27 = vld [vmem:[#allocation2 + $0x70] sm:$0xf0]  ;;  %v2700_v28 = vor.u32 %v3344_v25, %v2699_v24  ;;  %v2683_v30 = vld [vmem:[#allocation2 + $0x40] sm:$0xf] }
  0x36   : > { %822 = vmatpush.bf16.msra.mxu1 %v2752_v11  ;;  %s4102_s7 = scalar_select %p585_p10, %s4098_s1, 24  ;;  %v2704_v29 = vor.u32 %v3342_v26, %v2701_v27  ;;  %v3340_v31 = vld [vmem:[#allocation2 + $0x4c] sm:$0xf0]  ;;  %v3338_v32 = vld [vmem:[#allocation2 + $0x44] sm:$0xf]  ;;  %vm2349_vm5 = vcmask 130048  }
  0x37   : > { %v2685_v33 = vld [vmem:[#allocation2 + $0x50] sm:$0xf0]  ;;  %v2667_v34 = vld [vmem:[#allocation2 + $0x20] sm:$0xf]  ;;  %v3336_v35 = vld [vmem:[#allocation2 + $0x2c] sm:$0xf0]  ;;  %v2684_v36 = vor.u32 %v3340_v31, %v2683_v30 }
  0x38   : > { %s2648_s14 = sshll.u32 %s4102_s7, 3  ;;  %v3334_v37 = vld [vmem:[#allocation2 + $0x24] sm:$0xf]  ;;  %v2771_v38 = vld [vmem:[#allocation2 + $0xe8] sm:$0xf]  ;;  %v2688_v41 = vor.u32 %v3338_v32, %v2685_v33  ;;  %v2668_v51 = vor.u32 %v3336_v35, %v2667_v34  ;;  %s4646_s19 = sld [smem:[#allocation22_spill]] }
  0x39   : > { %804 = vmatpush.bf16.msra.mxu0 %v2732_v16  ;;  %v3361_v39 = vld [vmem:[#allocation2 + $0xf4] sm:$0xf0]  ;;  %v3359_v40 = vld [vmem:[#allocation2 + $0xec] sm:$0xf]  ;;  %v2773_v43 = vld [vmem:[#allocation2 + $0xf8] sm:$0xf0]  ;;  %s4108_s26 = scalar_lea.vmem %s4606_s0, %s2648_s14 }
  0x3a   : > { %823 = vmatpush.bf16.msra.mxu1 %v2736_v17  ;;  %v2772_v42 = vor.u32 %v3361_v39, %v2771_v38  ;;  %v2755_v44 = vld [vmem:[#allocation2 + $0xc8] sm:$0xf]  ;;  %v3357_v45 = vld [vmem:[#allocation2 + $0xd4] sm:$0xf0]  ;;  %v2669_v46 = vld [vmem:[#allocation2 + $0x30] sm:$0xf0]  ;;  %v2776_v47 = vor.u32 %v3359_v40, %v2773_v43 }
  0x3b   : > { %v3355_v48 = vld [vmem:[#allocation2 + $0xcc] sm:$0xf]  ;;  %v2757_v49 = vld [vmem:[#allocation2 + $0xd8] sm:$0xf0]  ;;  %v2756_v50 = vor.u32 %v3357_v45, %v2755_v44  ;;  %v2651_v52 = vld [vmem:[#allocation2] sm:$0xf]  ;;  %v2672_v56 = vor.u32 %v3334_v37, %v2669_v46 }
  0x3c   : > { %840 = vmatpush.bf16.msra.mxu2 %v2772_v42  ;;  %859 = vmatpush.bf16.msra.mxu3 %v2776_v47  ;;  %v2760_v53 = vor.u32 %v3355_v48, %v2757_v49  ;;  %v2739_v54 = vld [vmem:[#allocation2 + $0xa8] sm:$0xf]  ;;  %v3353_v55 = vld [vmem:[#allocation2 + $0xb4] sm:$0xf0]  ;;  %v3332_v57 = vld [vmem:[#allocation2 + $0xc] sm:$0xf0] }
  0x3d   : > { %805 = vmatpush.bf16.msra.mxu0 %v2716_v22  ;;  %v3351_v58 = vld [vmem:[#allocation2 + $0xac] sm:$0xf]  ;;  %v2741_v59 = vld [vmem:[#allocation2 + $0xb8] sm:$0xf0]  ;;  %v3330_v60 = vld [vmem:[#allocation2 + $0x4] sm:$0xf]  ;;  %v2740_v63 = vor.u32 %v3353_v55, %v2739_v54  ;;  %v2652_v0 = vor.u32 %v3332_v57, %v2651_v52 }
  0x3e   : > { %824 = vmatpush.bf16.msra.mxu1 %v2720_v23  ;;  %v2653_v61 = vld [vmem:[#allocation2 + $0x10] sm:$0xf0]  ;;  %v599_v62 = vld [vmem:[%s4108_s26] sm:$0xff]  ;;  %v600_v1 = vld [vmem:[%s4108_s26 + $0x8] sm:$0xff]  ;;  %v2744_v2 = vor.u32 %v3351_v58, %v2741_v59  ;;  %s577_s22 = sand.u32 1, %s4645_s30   ;;  %s2362_s14 = ssub.s32 (%p4041_p4), 25, %s4098_s1 }
  0x3f   : > { %v2723_v3 = vld [vmem:[#allocation2 + $0x88] sm:$0xf]  ;;  %v3349_v4 = vld [vmem:[#allocation2 + $0x94] sm:$0xf0]  ;;  %v2656_v5 = vor.u32 %v3330_v60, %v2653_v61  ;;  %v3347_v6 = vld [vmem:[#allocation2 + $0x8c] sm:$0xf]  ;;  %v4116_v9 = vpack.c.bf16 %v600_v1, %v599_v62 }
  0x40   : > { %841 = vmatpush.bf16.msra.mxu2 %v2756_v50  ;;  %860 = vmatpush.bf16.msra.mxu3 %v2760_v53  ;;  %v2725_v7 = vld [vmem:[#allocation2 + $0x98] sm:$0xf0]  ;;  %v2724_v10 = vor.u32 %v3349_v4, %v2723_v3  ;;  %v2707_v11 = vld [vmem:[#allocation2 + $0x68] sm:$0xf]  ;;  %v2859_v12 = vld [vmem:[#allocation4 + $0x70] sm:$0xf] }
  0x41   : > { %806 = vmatpush.bf16.msra.mxu0 %v2700_v28  ;;  %v3377_v13 = vld [vmem:[#allocation4 + $0x74] sm:$0xf0]  ;;  %v2728_v14 = vor.u32 %v3347_v6, %v2725_v7  ;;  %v2923_v17 = vld [vmem:[#allocation4 + $0xf0] sm:$0xf]  ;;  %v3343_v19 = vld [vmem:[#allocation2 + $0x6c] sm:$0xf] }
  0x42   : > { %825 = vmatpush.bf16.msra.mxu1 %v2704_v29  ;;  %v3345_v15 = vld [vmem:[#allocation2 + $0x74] sm:$0xf0]  ;;  %v2860_v16 = vor.u32 %v3377_v13, %v2859_v12  ;;  %v2709_v20 = vld [vmem:[#allocation2 + $0x78] sm:$0xf0]  ;;  %v2851_v22 = vld [vmem:[#allocation4 + $0x60] sm:$0xf] }
  0x43   : > { %v3393_v18 = vld [vmem:[#allocation4 + $0xf4] sm:$0xf0]  ;;  %v3375_v23 = vld [vmem:[#allocation4 + $0x64] sm:$0xf0]  ;;  %v2915_v24 = vld [vmem:[#allocation4 + $0xe0] sm:$0xf]  ;;  %v2708_v25 = vor.u32 %v3345_v15, %v2707_v11  ;;  %v2712_v28 = vor.u32 %v3343_v19, %v2709_v20 }
  0x44   : > { %842 = vmatpush.bf16.msra.mxu2 %v2740_v63  ;;  %861 = vmatpush.bf16.msra.mxu3 %v2744_v2  ;;  %v2924_v21 = vor.u32 %v3393_v18, %v2923_v17  ;;  %v2852_v26 = vor.u32 %v3375_v23, %v2851_v22  ;;  %v3391_v27 = vld [vmem:[#allocation4 + $0xe4] sm:$0xf0]  ;;  %v3341_v30 = vld [vmem:[#allocation2 + $0x54] sm:$0xf0]  ;;  %v3339_v31 = vld [vmem:[#allocation2 + $0x4c] sm:$0xf] }
  0x45   : > { %807 = vmatpush.bf16.msra.mxu0 %v2684_v36  ;;  %v2691_v29 = vld [vmem:[#allocation2 + $0x48] sm:$0xf]  ;;  %v2693_v32 = vld [vmem:[#allocation2 + $0x58] sm:$0xf0]  ;;  %v2916_v33 = vor.u32 %v3391_v27, %v2915_v24  ;;  %v2843_v34 = vld [vmem:[#allocation4 + $0x50] sm:$0xf] }
  0x46   : > { %826 = vmatpush.bf16.msra.mxu1 %v2688_v41  ;;  %v2692_v35 = vor.u32 %v3341_v30, %v2691_v29  ;;  %v3373_v36 = vld [vmem:[#allocation4 + $0x54] sm:$0xf0]  ;;  %v2907_v37 = vld [vmem:[#allocation4 + $0xd0] sm:$0xf]  ;;  %v2696_v39 = vor.u32 %v3339_v31, %v2693_v32  ;;  %v2675_v40 = vld [vmem:[#allocation2 + $0x28] sm:$0xf] }
  0x47   : > { %v3389_v38 = vld [vmem:[#allocation4 + $0xd4] sm:$0xf0]  ;;  %v3335_v42 = vld [vmem:[#allocation2 + $0x2c] sm:$0xf]  ;;  %v2844_v43 = vor.u32 %v3373_v36, %v2843_v34  ;;  %v2677_v44 = vld [vmem:[#allocation2 + $0x38] sm:$0xf0] }
  0x48   : > { %843 = vmatpush.bf16.msra.mxu2 %v2724_v10  ;;  %862 = vmatpush.bf16.msra.mxu3 %v2728_v14  ;;  %v3337_v41 = vld [vmem:[#allocation2 + $0x34] sm:$0xf0]  ;;  %v2908_v45 = vor.u32 %v3389_v38, %v2907_v37  ;;  %v2835_v46 = vld [vmem:[#allocation4 + $0x40] sm:$0xf]  ;;  %v3371_v47 = vld [vmem:[#allocation4 + $0x44] sm:$0xf0]  ;;  %v2680_v54 = vor.u32 %v3335_v42, %v2677_v44 }
  0x49   : > { %808 = vmatpush.bf16.msra.mxu0 %v2668_v51  ;;  %v2836_v48 = vor.u32 %v3371_v47, %v2835_v46  ;;  %v2899_v49 = vld [vmem:[#allocation4 + $0xc0] sm:$0xf]  ;;  %v3387_v50 = vld [vmem:[#allocation4 + $0xc4] sm:$0xf0]  ;;  %v601_v51 = vld [vmem:[%s4108_s26 + $0x10] sm:$0xff]  ;;  %v2676_v52 = vor.u32 %v3337_v41, %v2675_v40  ;;  %s2646_s25 = sshll.u32 %s577_s22, 5 }
  0x4a   : > { %827 = vmatpush.bf16.msra.mxu1 %v2672_v56  ;;  %v602_v53 = vld [vmem:[%s4108_s26 + $0x18] sm:$0xff]  ;;  %v2659_v55 = vld [vmem:[#allocation2 + $0x8] sm:$0xf]  ;;  %v3331_v57 = vld [vmem:[#allocation2 + $0xc] sm:$0xf]  ;;  %v2900_v60 = vor.u32 %v3387_v50, %v2899_v49  ;;  %s4534_s16 = scalar_lea.vmem [#allocation10], %s2646_s25  }
  0x4b   : > { %v3333_v56 = vld [vmem:[#allocation2 + $0x14] sm:$0xf0]  ;;  %v2661_v58 = vld [vmem:[#allocation2 + $0x18] sm:$0xf0]  ;;  %v3376_v59 = vld [vmem:[#allocation4 + $0x74] sm:$0xf] }
  0x4c   : > { %844 = vmatpush.bf16.msra.mxu2 %v2708_v25  ;;  %863 = vmatpush.bf16.msra.mxu3 %v2712_v28  ;;  %v2861_v61 = vld [vmem:[#allocation4 + $0x78] sm:$0xf0]  ;;  %v3392_v62 = vld [vmem:[#allocation4 + $0xf4] sm:$0xf]  ;;  %v2660_v1 = vor.u32 %v3333_v56, %v2659_v55  ;;  %v2664_v2 = vor.u32 %v3331_v57, %v2661_v58  ;;  %v2853_v6 = vld [vmem:[#allocation4 + $0x68] sm:$0xf0] }
  0x4d   : > { %809 = vmatpush.bf16.msra.mxu0 %v2652_v0  ;;  %v2925_v63 = vld [vmem:[#allocation4 + $0xf8] sm:$0xf0]  ;;  %v2781_v0 = vpack.c.bf16 %v602_v53, %v601_v51  ;;  %v2864_v3 = vor.u32 %v3376_v59, %v2861_v61  ;;  %v3390_v7 = vld [vmem:[#allocation4 + $0xe4] sm:$0xf]  ;;  %v2917_v10 = vld [vmem:[#allocation4 + $0xe8] sm:$0xf0] }
  0x4e   : > { %828 = vmatpush.bf16.msra.mxu1 %v2656_v5  ;;  %v2928_v4 = vor.u32 %v3392_v62, %v2925_v63  ;;  %v3374_v5 = vld [vmem:[#allocation4 + $0x64] sm:$0xf]  ;;  %v2920_v12 = vor.u32 %v3390_v7, %v2917_v10  ;;  %v3372_v13 = vld [vmem:[#allocation4 + $0x54] sm:$0xf]  ;;  %v2845_v14 = vld [vmem:[#allocation4 + $0x58] sm:$0xf0] }
  0x4f   : > { %v2856_v11 = vor.u32 %v3374_v5, %v2853_v6  ;;  %v3388_v15 = vld [vmem:[#allocation4 + $0xd4] sm:$0xf]  ;;  %v2848_v17 = vor.u32 %v3372_v13, %v2845_v14  ;;  %v3370_v19 = vld [vmem:[#allocation4 + $0x44] sm:$0xf]  ;;  %v2837_v20 = vld [vmem:[#allocation4 + $0x48] sm:$0xf0] }
  0x50   : > { %2779 = vmatmul.msk.bf16.vlgmr.msra.gmra.mxu0 %vm4112_vm1, %v4116_v9  ;;  %845 = vmatpush.bf16.msra.mxu2 %v2692_v35  ;;  %v2901_v22 = vld [vmem:[#allocation4 + $0xc8] sm:$0xf0]  ;;  %v2840_v23 = vor.u32 %v3370_v19, %v2837_v20  ;;  %v3368_v25 = vld [vmem:[#allocation4 + $0x34] sm:$0xf]  ;;  %v3369_v28 = vld [vmem:[#allocation4 + $0x34] sm:$0xf0] }
  0x51   : > { %1102 = vmatpush.bf16.msrb.mxu0 %v2860_v16  ;;  %2785 = vmatmul.msk.bf16.vlgmr.msra.gmra.mxu1 %vm4112_vm1, %v4116_v9  ;;  %v2909_v16 = vld [vmem:[#allocation4 + $0xd8] sm:$0xf0]  ;;  %v2891_v29 = vld [vmem:[#allocation4 + $0xb0] sm:$0xf]  ;;  %v3385_v31 = vld [vmem:[#allocation4 + $0xb4] sm:$0xf0] }
  0x52   : > { %1121 = vmatpush.bf16.msrb.mxu1 %v2924_v21  ;;  %864 = vmatpush.bf16.msra.mxu3 %v2696_v39  ;;  %v2912_v18 = vor.u32 %v3388_v15, %v2909_v16  ;;  %v3386_v21 = vld [vmem:[#allocation4 + $0xc4] sm:$0xf]  ;;  %v3384_v32 = vld [vmem:[#allocation4 + $0xb4] sm:$0xf]  ;;  %v2893_v34 = vld [vmem:[#allocation4 + $0xb8] sm:$0xf0] }
  0x53   : > { %v2904_v24 = vor.u32 %v3386_v21, %v2901_v22  ;;  %v2896_v35 = vor.u32 %v3384_v32, %v2893_v34  ;;  %v3366_v36 = vld [vmem:[#allocation4 + $0x24] sm:$0xf]  ;;  %v2821_v37 = vld [vmem:[#allocation4 + $0x28] sm:$0xf0]  ;;  %v2819_v39 = vld [vmem:[#allocation4 + $0x20] sm:$0xf] }
  0x54   : > { %846 = vmatpush.bf16.msra.mxu2 %v2676_v52  ;;  %v2824_v38 = vor.u32 %v3366_v36, %v2821_v37  ;;  %v3367_v40 = vld [vmem:[#allocation4 + $0x24] sm:$0xf0]  ;;  %v2883_v41 = vld [vmem:[#allocation4 + $0xa0] sm:$0xf]  ;;  %v2885_v44 = vld [vmem:[#allocation4 + $0xa8] sm:$0xf0] }
  0x55   : > { %1103 = vmatpush.bf16.msrb.mxu0 %v2852_v26  ;;  %v2829_v26 = vld [vmem:[#allocation4 + $0x38] sm:$0xf0]  ;;  %v2820_v8 = vor.u32 %v3367_v40, %v2819_v39  ;;  %v3383_v42 = vld [vmem:[#allocation4 + $0xa4] sm:$0xf0]  ;;  %v3364_v47 = vld [vmem:[#allocation4 + $0x14] sm:$0xf] }
  0x56   : > { %1122 = vmatpush.bf16.msrb.mxu1 %v2916_v33  ;;  %865 = vmatpush.bf16.msra.mxu3 %v2680_v54  ;;  %v2832_v27 = vor.u32 %v3368_v25, %v2829_v26  ;;  %v2892_v33 = vor.u32 %v3385_v31, %v2891_v29  ;;  %v2811_v50 = vld [vmem:[#allocation4 + $0x10] sm:$0xf]  ;;  %v3365_v51 = vld [vmem:[#allocation4 + $0x14] sm:$0xf0]  ;;  %v3380_v55 = vld [vmem:[#allocation4 + $0x94] sm:$0xf] }
  0x57   : > { %v2875_v52 = vld [vmem:[#allocation4 + $0x90] sm:$0xf]  ;;  %v2812_v53 = vor.u32 %v3365_v51, %v2811_v50  ;;  %v3381_v54 = vld [vmem:[#allocation4 + $0x94] sm:$0xf0]  ;;  %v2877_v56 = vld [vmem:[#allocation4 + $0x98] sm:$0xf0] }
  0x58   : > { %847 = vmatpush.bf16.msra.mxu2 %v2660_v1  ;;  %v2876_v57 = vor.u32 %v3381_v54, %v2875_v52  ;;  %v2880_v58 = vor.u32 %v3380_v55, %v2877_v56  ;;  %v3362_v59 = vld [vmem:[#allocation4 + $0x4] sm:$0xf]  ;;  %v2803_v61 = vld [vmem:[#allocation4] sm:$0xf]  ;;  %v3363_v63 = vld [vmem:[#allocation4 + $0x4] sm:$0xf0] }
  0x59   : > { %1104 = vmatpush.bf16.msrb.mxu0 %v2844_v43  ;;  %v3382_v43 = vld [vmem:[#allocation4 + $0xa4] sm:$0xf]  ;;  %v3379_v1 = vld [vmem:[#allocation4 + $0x84] sm:$0xf0]  ;;  %v2869_v5 = vld [vmem:[#allocation4 + $0x88] sm:$0xf0] }
  0x5a   : > { %1123 = vmatpush.bf16.msrb.mxu1 %v2908_v45  ;;  %866 = vmatpush.bf16.msra.mxu3 %v2664_v2  ;;  %v2884_v45 = vor.u32 %v3383_v42, %v2883_v41  ;;  %v2888_v46 = vor.u32 %v3382_v43, %v2885_v44  ;;  %v2804_v2 = vor.u32 %v3363_v63, %v2803_v61  ;;  %v878_v10 = vld [vmem:[%s4608_s2] sm:$0x3]  ;;  %v2987_v20 = vld [vmem:[#allocation6 + $0x70] sm:$0xf]  ;;  %v3409_v21 = vld [vmem:[#allocation6 + $0x74] sm:$0xf0] }
  0x5b   : > { %2791 = vmatmul.msk.bf16.vlgmr.msra.gmra.mxu2 %vm4112_vm1, %v4116_v9  ;;  %v4145_v13 = vperm.slane %v878_v10, 1  ;;  %v3408_v22 = vld [vmem:[#allocation6 + $0x74] sm:$0xf]  ;;  %v2988_v25 = vor.u32 %v3409_v21, %v2987_v20  ;;  %v2989_v26 = vld [vmem:[#allocation6 + $0x78] sm:$0xf0]  ;;  %s3490_s15 = sshll.u32 (%p4041_p4), %s4029_s21, 5 }
  0x5c   : > { %1140 = vmatpush.bf16.msrb.mxu2 %v2864_v3  ;;  %v3407_v34 = vld [vmem:[#allocation6 + $0x64] sm:$0xf0]  ;;  %v2981_v37 = vld [vmem:[#allocation6 + $0x68] sm:$0xf0]  ;;  %v3053_v39 = vld [vmem:[#allocation6 + $0xf8] sm:$0xf0] }
  0x5d   : > { %1105 = vmatpush.bf16.msrb.mxu0 %v2836_v48  ;;  %2797 = vmatmul.msk.bf16.vlgmr.msra.gmra.mxu3 %vm4112_vm1, %v4116_v9  ;;  %v2827_v9 = vld [vmem:[#allocation4 + $0x30] sm:$0xf]  ;;  %v2813_v48 = vld [vmem:[#allocation4 + $0x18] sm:$0xf0]  ;;  %v3425_v42 = vld [vmem:[#allocation6 + $0xf4] sm:$0xf0] }
  0x5e   : > { %1124 = vmatpush.bf16.msrb.mxu1 %v2900_v60  ;;  %1159 = vmatpush.bf16.msrb.mxu3 %v2928_v4  ;;  %v2828_v30 = vor.u32 %v3369_v28, %v2827_v9  ;;  %v2816_v49 = vor.u32 %v3364_v47, %v2813_v48  ;;  %v2805_v60 = vld [vmem:[#allocation4 + $0x8] sm:$0xf0]  ;;  %v3378_v4 = vld [vmem:[#allocation4 + $0x84] sm:$0xf]  ;;  %v2992_v28 = vor.u32 %v3408_v22, %v2989_v26  ;;  %v2971_v44 = vld [vmem:[#allocation6 + $0x50] sm:$0xf] }
  0x5f   : > { %v2808_v62 = vor.u32 %v3362_v59, %v2805_v60  ;;  %v2872_v6 = vor.u32 %v3378_v4, %v2869_v5  ;;  %v3404_v47 = vld [vmem:[#allocation6 + $0x54] sm:$0xf]  ;;  %v2973_v48 = vld [vmem:[#allocation6 + $0x58] sm:$0xf0]  ;;  %v3045_v51 = vld [vmem:[#allocation6 + $0xe8] sm:$0xf0] }
  0x60   : > { %2782 = vmatmul.msk.bf16.gmra.mxu0 %vm4112_vm1, %v2781_v0  ;;  %1141 = vmatpush.bf16.msrb.mxu2 %v2856_v11  ;;  %v2976_v50 = vor.u32 %v3404_v47, %v2973_v48  ;;  %v3043_v52 = vld [vmem:[#allocation6 + $0xe0] sm:$0xf]  ;;  %v3402_v59 = vld [vmem:[#allocation6 + $0x44] sm:$0xf]  ;;  %v2965_v63 = vld [vmem:[#allocation6 + $0x48] sm:$0xf0] }
  0x61   : > { %2788 = vmatmul.msk.bf16.gmra.mxu1 %vm4112_vm1, %v2781_v0  ;;  %1106 = vmatpush.bf16.msrb.mxu0 %v2828_v30  ;;  %v2968_v4 = vor.u32 %v3402_v59, %v2965_v63  ;;  %v3401_v20 = vld [vmem:[#allocation6 + $0x34] sm:$0xf0]  ;;  %v3400_v21 = vld [vmem:[#allocation6 + $0x34] sm:$0xf]  ;;  %v3418_v26 = vld [vmem:[#allocation6 + $0xc4] sm:$0xf] }
  0x62   : > { %1160 = vmatpush.bf16.msrb.mxu3 %v2920_v12  ;;  %1125 = vmatpush.bf16.msrb.mxu1 %v2892_v33  ;;  %v4143_v12 = vperm.slane %v878_v10, 0  ;;  %v2979_v33 = vld [vmem:[#allocation6 + $0x60] sm:$0xf]  ;;  %v3005_v63 = vld [vmem:[#allocation6 + $0x98] sm:$0xf0]  ;;  %p2363_p11 = scmp.lt.s32.totalorder (%p4041_p4), %s2362_s14, 4 }
  0x63   : > { %v2980_v36 = vor.u32 %v3407_v34, %v2979_v33  ;;  %v3398_v33 = vld [vmem:[#allocation6 + $0x24] sm:$0xf]  ;;  %s4650_s27 = sld [smem:[#allocation23_spill]] (%p4041_p4) }
  0x64   : > { %1142 = vmatpush.bf16.msrb.mxu2 %v2848_v17 }
  0x65   : > { %1107 = vmatpush.bf16.msrb.mxu0 %v2820_v8  ;;  %v3051_v8 = vld [vmem:[#allocation6 + $0xf0] sm:$0xf] }
  0x66   : > { %1161 = vmatpush.bf16.msrb.mxu3 %v2912_v18  ;;  %1126 = vmatpush.bf16.msrb.mxu1 %v2884_v45  ;;  %v3052_v43 = vor.u32 %v3425_v42, %v3051_v8  ;;  %v3405_v45 = vld [vmem:[#allocation6 + $0x54] sm:$0xf0]  ;;  %v2939_v42 = vld [vmem:[#allocation6 + $0x10] sm:$0xf] }
  0x68   : > { %1143 = vmatpush.bf16.msrb.mxu2 %v2840_v23 }
  0x69   : > { %1108 = vmatpush.bf16.msrb.mxu0 %v2812_v53  ;;  %v3423_v53 = vld [vmem:[#allocation6 + $0xe4] sm:$0xf0]  ;;  %s4557_s23 = scalar_lea.vmem (%p4041_p4), %s4650_s27, %s3490_s15  }
  0x6a   : > { %1162 = vmatpush.bf16.msrb.mxu3 %v2904_v24  ;;  %1127 = vmatpush.bf16.msrb.mxu1 %v2876_v57  ;;  %v3044_v56 = vor.u32 %v3423_v53, %v3043_v52  ;;  %v2963_v57 = vld [vmem:[#allocation6 + $0x40] sm:$0xf] }
  0x6b   : > { %2794 = vmatmul.msk.bf16.gmra.mxu2 %vm4112_vm1, %v2781_v0 }
  0x6c   : > { %1144 = vmatpush.bf16.msrb.mxu2 %v2832_v27 }
  0x6d   : > { %2800 = vmatmul.msk.bf16.gmra.mxu3 %vm4112_vm1, %v2781_v0  ;;  %v2867_v0 = vld [vmem:[#allocation4 + $0x80] sm:$0xf]  ;;  %1109 = vmatpush.bf16.msrb.mxu0 %v2804_v2 }
  0x6e   : > { %1163 = vmatpush.bf16.msrb.mxu3 %v2896_v35  ;;  %v2868_v3 = vor.u32 %v3379_v1, %v2867_v0  ;;  %v3406_v35 = vld [vmem:[#allocation6 + $0x64] sm:$0xf]  ;;  %v3420_v0 = vld [vmem:[#allocation6 + $0xd4] sm:$0xf]  ;;  %v3037_v1 = vld [vmem:[#allocation6 + $0xd8] sm:$0xf0] }
  0x6f   : > { %v2984_v40 = vor.u32 %v3406_v35, %v2981_v37  ;;  %v3040_v5 = vor.u32 %v3420_v0, %v3037_v1  ;;  %v2949_v35 = vld [vmem:[#allocation6 + $0x28] sm:$0xf0]  ;;  %v3416_v37 = vld [vmem:[#allocation6 + $0xb4] sm:$0xf]  ;;  %v3003_v0 = vld [vmem:[#allocation6 + $0x90] sm:$0xf] }
  0x70   : > { %1145 = vmatpush.bf16.msrb.mxu2 %v2824_v38  ;;  %1128 = vmatpush.bf16.msrb.mxu1 %v2868_v3  ;;  %v3424_v38 = vld [vmem:[#allocation6 + $0xf4] sm:$0xf] }
  0x71   : > { %1388 = vmatpush.bf16.msra.mxu0 %v2988_v25  ;;  %v3056_v41 = vor.u32 %v3424_v38, %v3053_v39  ;;  %v3021_v38 = vld [vmem:[#allocation6 + $0xb8] sm:$0xf0]  ;;  %v3019_v39 = vld [vmem:[#allocation6 + $0xb0] sm:$0xf] }
  0x72   : > { %1164 = vmatpush.bf16.msrb.mxu3 %v2888_v46  ;;  %v2972_v46 = vor.u32 %v3405_v45, %v2971_v44  ;;  %v3396_v44 = vld [vmem:[#allocation6 + $0x14] sm:$0xf] }
  0x74   : > { %1146 = vmatpush.bf16.msrb.mxu2 %v2816_v49  ;;  %v3422_v49 = vld [vmem:[#allocation6 + $0xe4] sm:$0xf]  ;;  %1407 = vmatpush.bf16.msra.mxu1 %v3052_v43  ;;  %v3397_v43 = vld [vmem:[#allocation6 + $0x14] sm:$0xf0] }
  0x75   : > { %1389 = vmatpush.bf16.msra.mxu0 %v2980_v36  ;;  %v3048_v55 = vor.u32 %v3422_v49, %v3045_v51  ;;  %v2952_v36 = vor.u32 %v3398_v33, %v2949_v35  ;;  %v2940_v45 = vor.u32 %v3397_v43, %v2939_v42  ;;  %v3414_v49 = vld [vmem:[#allocation6 + $0xa4] sm:$0xf]  ;;  %v3011_v51 = vld [vmem:[#allocation6 + $0xa0] sm:$0xf]  ;;  %v3179_v42 = vld [vmem:[#allocation7 + $0xf0] sm:$0xf] }
  0x76   : > { %1165 = vmatpush.bf16.msrb.mxu3 %v2880_v58  ;;  %v3403_v58 = vld [vmem:[#allocation6 + $0x44] sm:$0xf0]  ;;  %v3457_v43 = vld [vmem:[#allocation7 + $0xf4] sm:$0xf0] }
  0x78   : > { %1147 = vmatpush.bf16.msrb.mxu2 %v2808_v62  ;;  %v2964_v62 = vor.u32 %v3403_v58, %v2963_v57  ;;  %1408 = vmatpush.bf16.msra.mxu1 %v3044_v56  ;;  %v2931_v56 = vld [vmem:[#allocation6] sm:$0xf]  ;;  %v3395_v57 = vld [vmem:[#allocation6 + $0x4] sm:$0xf0]  ;;  %v3394_v58 = vld [vmem:[#allocation6 + $0x4] sm:$0xf] }
  0x79   : > { %1390 = vmatpush.bf16.msra.mxu0 %v2972_v46  ;;  %v2941_v46 = vld [vmem:[#allocation6 + $0x18] sm:$0xf0]  ;;  %v2932_v59 = vor.u32 %v3395_v57, %v2931_v56  ;;  %v3173_v57 = vld [vmem:[#allocation7 + $0xe8] sm:$0xf0] }
  0x7a   : > { %1166 = vmatpush.bf16.msrb.mxu3 %v2872_v6  ;;  %v2944_v48 = vor.u32 %v3396_v44, %v2941_v46 }
  0x7c   : > { %1426 = vmatpush.bf16.msra.mxu2 %v2992_v28 }
  0x7d   : > { %1391 = vmatpush.bf16.msra.mxu0 %v2964_v62  ;;  %v3412_v62 = vld [vmem:[#allocation6 + $0x94] sm:$0xf] }
  0x7e   : > { %1445 = vmatpush.bf16.msra.mxu3 %v3056_v41  ;;  %v3417_v41 = vld [vmem:[#allocation6 + $0xb4] sm:$0xf0]  ;;  %v3008_v1 = vor.u32 %v3412_v62, %v3005_v63 }
  0x7f   : > { %v3020_v8 = vor.u32 %v3417_v41, %v3019_v39  ;;  %v3456_v39 = vld [vmem:[#allocation7 + $0xf4] sm:$0xf] }
  0x80   : > { %1427 = vmatpush.bf16.msra.mxu2 %v2984_v40  ;;  %v3024_v40 = vor.u32 %v3416_v37, %v3021_v38  ;;  %v3438_v37 = vld [vmem:[#allocation7 + $0x64] sm:$0xf]  ;;  %v3109_v38 = vld [vmem:[#allocation7 + $0x68] sm:$0xf0] }
  0x82   : > { %1446 = vmatpush.bf16.msra.mxu3 %v3048_v55 }
  0x84   : > { %1428 = vmatpush.bf16.msra.mxu2 %v2976_v50  ;;  %v3013_v50 = vld [vmem:[#allocation6 + $0xa8] sm:$0xf0] }
  0x85   : > { %v3016_v53 = vor.u32 %v3414_v49, %v3013_v50  ;;  %v3099_v49 = vld [vmem:[#allocation7 + $0x50] sm:$0xf]  ;;  %v3437_v50 = vld [vmem:[#allocation7 + $0x54] sm:$0xf0] }
  0x86   : > { %1447 = vmatpush.bf16.msra.mxu3 %v3040_v5  ;;  %v2997_v5 = vld [vmem:[#allocation6 + $0x88] sm:$0xf0] }
  0x88   : > { %1429 = vmatpush.bf16.msra.mxu2 %v2968_v4  ;;  %v3410_v4 = vld [vmem:[#allocation6 + $0x84] sm:$0xf] }
  0xcd   : > { %v811_v7 = vpop.f32.mrf.mxu0 }
  0xce   : > { %v830_v11 = vpop.f32.mrf.mxu1  ;;  %v884_v14 = vadd.f32 %v4143_v12, %v811_v7 }
  0xcf   : > { %v885_v15 = vadd.f32 %v4145_v13, %v830_v11 }
  0xd0   : > { %v892_v23 = vmax.f32 %v884_v14, 0.0 }
  0xd1   : > { %v893_v27 = vmax.f32 %v885_v15, 0.0 }
  0xd5   : > { %v813_v16 = vpop.f32.mrf.mxu0 }
  0xd6   : > { %v886_v17 = vadd.f32 %v4143_v12, %v813_v16  ;;  %v832_v18 = vpop.f32.mrf.mxu1 }
  0xd7   : > { %v887_v19 = vadd.f32 %v4145_v13, %v832_v18 }
  0xd8   : > { %v894_v24 = vmax.f32 %v886_v17, 0.0  ;;  %v3421_v17 = vld [vmem:[#allocation6 + $0xd4] sm:$0xf0] }
  0xd9   : > { %v895_v9 = vmax.f32 %v887_v19, 0.0 }
  0xda   : > { %v900_v29 = vpack.c.bf16 %v894_v24, %v892_v23  ;;  %v2957_v24 = vld [vmem:[#allocation6 + $0x38] sm:$0xf0] }
  0xdb   : > { %v901_v30 = vpack.c.bf16 %v895_v9, %v893_v27  ;;  %v2960_v25 = vor.u32 %v3400_v21, %v2957_v24  ;;  %v3029_v27 = vld [vmem:[#allocation6 + $0xc8] sm:$0xf0]  ;;  %v3027_v9 = vld [vmem:[#allocation6 + $0xc0] sm:$0xf] }
  0xdc   : > { %1110 = vmatmul.bf16.vlgmr.msrb.gmra.mxu0 %v900_v29  ;;  %1148 = vmatmul.bf16.vlgmr.msrb.gmra.mxu2 %v900_v29  ;;  %v3032_v28 = vor.u32 %v3418_v26, %v3029_v27  ;;  %v3419_v29 = vld [vmem:[#allocation6 + $0xc4] sm:$0xf0]  ;;  %v3115_v26 = vld [vmem:[#allocation7 + $0x70] sm:$0xf]  ;;  %v3441_v27 = vld [vmem:[#allocation7 + $0x74] sm:$0xf0] }
  0xdd   : > { %1129 = vmatmul.bf16.vlgmr.msrb.gmra.mxu1 %v901_v30  ;;  %1167 = vmatmul.bf16.vlgmr.msrb.gmra.mxu3 %v901_v30  ;;  %v816_v31 = vpop.f32.mrf.mxu0  ;;  %v3028_v30 = vor.u32 %v3419_v29, %v3027_v9  ;;  %v3440_v9 = vld [vmem:[#allocation7 + $0x74] sm:$0xf]  ;;  %v3116_v29 = vor.u32 %v3441_v27, %v3115_v26 }
  0xde   : > { %v835_v32 = vpop.f32.mrf.mxu1  ;;  %v888_v54 = vadd.f32 %v4143_v12, %v816_v31  ;;  %v4155_v19 = vpop.f32.mrf.mxu2  ;;  %1430 = vmatpush.bf16.msra.mxu2 %v2960_v25  ;;  %v2947_v31 = vld [vmem:[#allocation6 + $0x20] sm:$0xf]  ;;  %1448 = vmatpush.bf16.msra.mxu3 %v3032_v28 }
  0xdf   : > { %v889_v60 = vadd.f32 %v4145_v13, %v835_v32  ;;  %v3399_v32 = vld [vmem:[#allocation6 + $0x24] sm:$0xf0] }
  0xe0   : > { %v896_v7 = vmax.f32 %v888_v54, 0.0  ;;  %v4157_v22 = vpop.f32.mrf.mxu3  ;;  %v2948_v34 = vor.u32 %v3399_v32, %v2947_v31  ;;  %v3415_v54 = vld [vmem:[#allocation6 + $0xa4] sm:$0xf0]  ;;  %v3107_v31 = vld [vmem:[#allocation7 + $0x60] sm:$0xf] }
  0xe1   : > { %v897_v11 = vmax.f32 %v889_v60, 0.0  ;;  %v3012_v55 = vor.u32 %v3415_v54, %v3011_v51  ;;  %v2933_v60 = vld [vmem:[#allocation6 + $0x8] sm:$0xf0]  ;;  %v3439_v32 = vld [vmem:[#allocation7 + $0x64] sm:$0xf0] }
  0xe2   : > { %1431 = vmatpush.bf16.msra.mxu2 %v2952_v36  ;;  %1449 = vmatpush.bf16.msra.mxu3 %v3024_v40  ;;  %v3108_v41 = vor.u32 %v3439_v32, %v3107_v31  ;;  %v3436_v51 = vld [vmem:[#allocation7 + $0x54] sm:$0xf]  ;;  %v3454_v54 = vld [vmem:[#allocation7 + $0xe4] sm:$0xf] }
  0xe5   : > { %v818_v61 = vpop.f32.mrf.mxu0 }
  0xe6   : > { %v890_v2 = vadd.f32 %v4143_v12, %v818_v61  ;;  %v837_v3 = vpop.f32.mrf.mxu1  ;;  %v3035_v12 = vld [vmem:[#allocation6 + $0xd0] sm:$0xf]  ;;  %v4159_v47 = vpop.f32.mrf.mxu2  ;;  %1432 = vmatpush.bf16.msra.mxu2 %v2944_v48  ;;  %1450 = vmatpush.bf16.msra.mxu3 %v3016_v53  ;;  %v2936_v61 = vor.u32 %v3394_v58, %v2933_v60  ;;  %v3180_v48 = vor.u32 %v3457_v43, %v3179_v42  ;;  %v3101_v53 = vld [vmem:[#allocation7 + $0x58] sm:$0xf0]  ;;  %v3093_v42 = vld [vmem:[#allocation7 + $0x48] sm:$0xf0] }
  0xe7   : > { %v891_v6 = vadd.f32 %v4145_v13, %v837_v3  ;;  %v3036_v18 = vor.u32 %v3421_v17, %v3035_v12  ;;  %v2955_v13 = vld [vmem:[#allocation6 + $0x30] sm:$0xf]  ;;  %v936_v12 = vld [vmem:[%s4610_s4] sm:$0x3]  ;;  %v3176_v60 = vor.u32 %v3454_v54, %v3173_v57  ;;  %v3165_v43 = vld [vmem:[#allocation7 + $0xd8] sm:$0xf0] }
  0xe8   : > { %v898_v10 = vmax.f32 %v890_v2, 0.0  ;;  %v2956_v23 = vor.u32 %v3401_v20, %v2955_v13  ;;  %v4161_v52 = vpop.f32.mrf.mxu3  ;;  %v3413_v2 = vld [vmem:[#allocation6 + $0x94] sm:$0xf0]  ;;  %v4174_v13 = vperm.slane %v936_v12, 0  ;;  %v3450_v57 = vld [vmem:[#allocation7 + $0xc4] sm:$0xf] }
  0xe9   : > { %v899_v14 = vmax.f32 %v891_v6, 0.0  ;;  %1409 = vmatpush.bf16.msra.mxu1 %v3036_v18  ;;  %v3004_v3 = vor.u32 %v3413_v2, %v3003_v0  ;;  %v2995_v6 = vld [vmem:[#allocation6 + $0x80] sm:$0xf] }
  0xea   : > { %v902_v15 = vpack.c.bf16 %v898_v10, %v896_v7  ;;  %1392 = vmatpush.bf16.msra.mxu0 %v2956_v23  ;;  %1433 = vmatpush.bf16.msra.mxu2 %v2936_v61  ;;  %v3000_v7 = vor.u32 %v3410_v4, %v2997_v5  ;;  %v3411_v10 = vld [vmem:[#allocation6 + $0x84] sm:$0xf0]  ;;  %v4177_v23 = vperm.slane %v936_v12, 1 }
  0xeb   : > { %v903_v16 = vpack.c.bf16 %v899_v14, %v897_v11  ;;  %1451 = vmatpush.bf16.msra.mxu3 %v3008_v1  ;;  %v2996_v14 = vor.u32 %v3411_v10, %v2995_v6  ;;  %v3104_v1 = vor.u32 %v3436_v51, %v3101_v53  ;;  %v3433_v51 = vld [vmem:[#allocation7 + $0x34] sm:$0xf0]  ;;  %v3432_v53 = vld [vmem:[#allocation7 + $0x34] sm:$0xf] }
  0xec   : > { %1115 = vmatmul.bf16.gmra.mxu0 %v902_v15  ;;  %1153 = vmatmul.bf16.gmra.mxu2 %v902_v15 }
  0xed   : > { %1134 = vmatmul.bf16.gmra.mxu1 %v903_v16  ;;  %1172 = vmatmul.bf16.gmra.mxu3 %v903_v16 }
  0xee   : > { %1410 = vmatpush.bf16.msra.mxu1 %v3028_v30  ;;  %1393 = vmatpush.bf16.msra.mxu0 %v2948_v34  ;;  %v4163_v11 = vpop.f32.mrf.mxu2  ;;  %v3117_v30 = vld [vmem:[#allocation7 + $0x78] sm:$0xf0] }
  0xef   : > { %1452 = vmatpush.bf16.msra.mxu3 %v3000_v7  ;;  %v3120_v36 = vor.u32 %v3440_v9, %v3117_v30 }
  0xf0   : > { %v4165_v15 = vpop.f32.mrf.mxu3 }
  0xf1   : > { %1706 = vmatpush.bf16.msrb.mxu2 %v3120_v36 }
  0xf2   : > { %1411 = vmatpush.bf16.msra.mxu1 %v3020_v8  ;;  %1394 = vmatpush.bf16.msra.mxu0 %v2940_v45  ;;  %v3181_v8 = vld [vmem:[#allocation7 + $0xf8] sm:$0xf0]  ;;  %v3112_v45 = vor.u32 %v3438_v37, %v3109_v38  ;;  %v3455_v37 = vld [vmem:[#allocation7 + $0xe4] sm:$0xf0] }
  0xf3   : > { %v3184_v46 = vor.u32 %v3456_v39, %v3181_v8  ;;  %v3091_v39 = vld [vmem:[#allocation7 + $0x40] sm:$0xf] }
  0xf5   : > { %1725 = vmatpush.bf16.msrb.mxu3 %v3184_v46  ;;  %1707 = vmatpush.bf16.msrb.mxu2 %v3112_v45  ;;  %v3163_v46 = vld [vmem:[#allocation7 + $0xd0] sm:$0xf] }
  0xf6   : > { %1412 = vmatpush.bf16.msra.mxu1 %v3012_v55  ;;  %1395 = vmatpush.bf16.msra.mxu0 %v2932_v59  ;;  %v4167_v16 = vpop.f32.mrf.mxu2  ;;  %v3100_v59 = vor.u32 %v3437_v50, %v3099_v49  ;;  %v3083_v50 = vld [vmem:[#allocation7 + $0x30] sm:$0xf] }
  0xf7   : > { %v3084_v54 = vor.u32 %v3433_v51, %v3083_v50 }
  0xf8   : > { %v4172_v17 = vpop.f32.mrf.mxu3 }
  0xf9   : > { %1726 = vmatpush.bf16.msrb.mxu3 %v3176_v60  ;;  %1708 = vmatpush.bf16.msrb.mxu2 %v3104_v1  ;;  %v3155_v60 = vld [vmem:[#allocation7 + $0xc0] sm:$0xf]  ;;  %v3430_v1 = vld [vmem:[#allocation7 + $0x24] sm:$0xf] }
  0xfa   : > { %1413 = vmatpush.bf16.msra.mxu1 %v3004_v3  ;;  %1668 = vmatpush.bf16.msrb.mxu0 %v3116_v29 }
  0xfe   : > { %1414 = vmatpush.bf16.msra.mxu1 %v2996_v14  ;;  %1669 = vmatpush.bf16.msrb.mxu0 %v3108_v41  ;;  %v3434_v41 = vld [vmem:[#allocation7 + $0x44] sm:$0xf] }
 0x102   : > { %1687 = vmatpush.bf16.msrb.mxu1 %v3180_v48  ;;  %1670 = vmatpush.bf16.msrb.mxu0 %v3100_v59  ;;  %v3453_v48 = vld [vmem:[#allocation7 + $0xd4] sm:$0xf0] }
 0x103   : > { %v3164_v49 = vor.u32 %v3453_v48, %v3163_v46 }
 0x159   : > { %v1111_v18 = vpop.f32.mrf.mxu0 }
 0x15a   : > { %v1130_v20 = vpop.f32.mrf.mxu1  ;;  %v1112_v21 = vadd.f32 %v1111_v18, %v4174_v13 }
 0x15c   : > { %v1131_v33 = vadd.f32 %v1130_v20, %v1112_v21 }
 0x15e   : > { %v1178_v55 = vmax.f32 %v1131_v33, 0.0 }
 0x15f   : > { %v1149_v24 = vpop.f32.mrf.mxu2 }
 0x160   : > { %v1168_v25 = vpop.f32.mrf.mxu3  ;;  %v1150_v40 = vadd.f32 %v1149_v24, %v4177_v23 }
 0x161   : > { %v1113_v28 = vpop.f32.mrf.mxu0 }
 0x162   : > { %v1114_v34 = vadd.f32 %v1113_v28, %v4174_v13  ;;  %v1132_v35 = vpop.f32.mrf.mxu1  ;;  %v1169_v61 = vadd.f32 %v1168_v25, %v1150_v40  ;;  %v3435_v40 = vld [vmem:[#allocation7 + $0x44] sm:$0xf0] }
 0x163   : > { %v3092_v8 = vor.u32 %v3435_v40, %v3091_v39  ;;  %v3131_v39 = vld [vmem:[#allocation7 + $0x90] sm:$0xf] }
 0x164   : > { %v1133_v44 = vadd.f32 %v1132_v35, %v1114_v34  ;;  %v1179_v5 = vmax.f32 %v1169_v61, 0.0  ;;  %v3451_v61 = vld [vmem:[#allocation7 + $0xc4] sm:$0xf0] }
 0x165   : > { %1671 = vmatpush.bf16.msrb.mxu0 %v3092_v8 }
 0x166   : > { %v1180_v56 = vmax.f32 %v1133_v44, 0.0  ;;  %v3096_v44 = vor.u32 %v3434_v41, %v3093_v42  ;;  %v3445_v41 = vld [vmem:[#allocation7 + $0x94] sm:$0xf0]  ;;  %v3442_v42 = vld [vmem:[#allocation7 + $0x84] sm:$0xf] }
 0x167   : > { %v1151_v58 = vpop.f32.mrf.mxu2  ;;  %v3132_v8 = vor.u32 %v3445_v41, %v3131_v39  ;;  %v1820_v41 = vld [vmem:[%s4615_s9 + $0x1b0] sm:$0xff] }
 0x168   : > { %v1186_v62 = vpack.c.bf16 %v1180_v56, %v1178_v55  ;;  %v1152_v63 = vadd.f32 %v1151_v58, %v4177_v23  ;;  %v1170_v0 = vpop.f32.mrf.mxu3  ;;  %1709 = vmatpush.bf16.msrb.mxu2 %v3096_v44  ;;  %v3085_v55 = vld [vmem:[#allocation7 + $0x38] sm:$0xf0]  ;;  %v3157_v58 = vld [vmem:[#allocation7 + $0xc8] sm:$0xf0] }
 0x169   : > { %v1116_v2 = vpop.f32.mrf.mxu0  ;;  %v3088_v56 = vor.u32 %v3432_v53, %v3085_v55  ;;  %1672 = vmatpush.bf16.msrb.mxu0 %v3084_v54  ;;  %v3160_v59 = vor.u32 %v3450_v57, %v3157_v58  ;;  %v1797_v57 = vld [vmem:[%s4615_s9 + $0xf8] sm:$0xff]  ;;  %v1794_v58 = vld [vmem:[%s4615_s9 + $0xe0] sm:$0xff] }
 0x16a   : > { %v1171_v3 = vadd.f32 %v1170_v0, %v1152_v63  ;;  %v1135_v4 = vpop.f32.mrf.mxu1  ;;  %1396 = vmatmul.bf16.vlgmr.msra.gmra.mxu0 %v1186_v62  ;;  %1434 = vmatmul.bf16.vlgmr.msra.gmra.mxu2 %v1186_v62  ;;  %v1117_v10 = vadd.f32 %v1116_v2, %v4174_v13  ;;  %v3156_v62 = vor.u32 %v3451_v61, %v3155_v60  ;;  %v3075_v63 = vld [vmem:[#allocation7 + $0x20] sm:$0xf]  ;;  %v3431_v0 = vld [vmem:[#allocation7 + $0x24] sm:$0xf0]  ;;  %v1792_v61 = vld [vmem:[%s4615_s9 + $0xd0] sm:$0xff] }
 0x16b   : > { %v3076_v2 = vor.u32 %v3431_v0, %v3075_v63  ;;  %v1795_v60 = vld [vmem:[%s4615_s9 + $0xe8] sm:$0xff] }
 0x16c   : > { %v1181_v6 = vmax.f32 %v1171_v3, 0.0  ;;  %v1136_v20 = vadd.f32 %v1135_v4, %v1117_v10  ;;  %1710 = vmatpush.bf16.msrb.mxu2 %v3088_v56  ;;  %v3077_v3 = vld [vmem:[#allocation7 + $0x28] sm:$0xf0]  ;;  %v3448_v4 = vld [vmem:[#allocation7 + $0xb4] sm:$0xf] }
 0x16d   : > { %v3147_v10 = vld [vmem:[#allocation7 + $0xb0] sm:$0xf]  ;;  %1673 = vmatpush.bf16.msrb.mxu0 %v3076_v2  ;;  %v1829_v2 = vld [vmem:[%s4615_s9 + $0x1f8] sm:$0xff] }
 0x16e   : > { %v1187_v7 = vpack.c.bf16 %v1181_v6, %v1179_v5  ;;  %v1182_v27 = vmax.f32 %v1136_v20, 0.0  ;;  %v3149_v5 = vld [vmem:[#allocation7 + $0xb8] sm:$0xf0]  ;;  %v3080_v6 = vor.u32 %v3430_v1, %v3077_v3  ;;  %v3429_v20 = vld [vmem:[#allocation7 + $0x14] sm:$0xf0]  ;;  %v1796_v56 = vld [vmem:[%s4615_s9 + $0xf0] sm:$0xff] }
 0x16f   : > { %v1154_v14 = vpop.f32.mrf.mxu2  ;;  %v1793_v1 = vld [vmem:[%s4615_s9 + $0xd8] sm:$0xff]  ;;  %v1828_v3 = vld [vmem:[%s4615_s9 + $0x1f0] sm:$0xff] }
 0x170   : > { %v1173_v12 = vpop.f32.mrf.mxu3  ;;  %1415 = vmatmul.bf16.vlgmr.msra.gmra.mxu1 %v1187_v7  ;;  %1453 = vmatmul.bf16.vlgmr.msra.gmra.mxu3 %v1187_v7  ;;  %v1155_v25 = vadd.f32 %v1154_v14, %v4177_v23  ;;  %v3152_v7 = vor.u32 %v3448_v4, %v3149_v5  ;;  %v3449_v14 = vld [vmem:[#allocation7 + $0xb4] sm:$0xf0] }
 0x171   : > { %v1118_v18 = vpop.f32.mrf.mxu0  ;;  %1711 = vmatpush.bf16.msrb.mxu2 %v3080_v6  ;;  %v1827_v6 = vld [vmem:[%s4615_s9 + $0x1e8] sm:$0xff] }
 0x172   : > { %v1119_v21 = vadd.f32 %v1118_v18, %v4174_v13  ;;  %v1137_v24 = vpop.f32.mrf.mxu1  ;;  %v1174_v29 = vadd.f32 %v1173_v12, %v1155_v25  ;;  %v3171_v13 = vld [vmem:[#allocation7 + $0xe0] sm:$0xf]  ;;  %v3148_v12 = vor.u32 %v3449_v14, %v3147_v10  ;;  %v3067_v18 = vld [vmem:[#allocation7 + $0x10] sm:$0xf]  ;;  %v3069_v25 = vld [vmem:[#allocation7 + $0x18] sm:$0xf0] }
 0x173   : > { %v3172_v38 = vor.u32 %v3455_v37, %v3171_v13  ;;  %v3444_v37 = vld [vmem:[#allocation7 + $0x94] sm:$0xf]  ;;  %v1790_v10 = vld [vmem:[%s4615_s9 + $0xc0] sm:$0xff]  ;;  %v1791_v14 = vld [vmem:[%s4615_s9 + $0xc8] sm:$0xff] }
 0x174   : > { %v1138_v26 = vadd.f32 %v1137_v24, %v1119_v21  ;;  %v1183_v34 = vmax.f32 %v1174_v29, 0.0  ;;  %v3428_v21 = vld [vmem:[#allocation7 + $0x14] sm:$0xf]  ;;  %v3068_v24 = vor.u32 %v3429_v20, %v3067_v18  ;;  %v1825_v20 = vld [vmem:[%s4615_s9 + $0x1d8] sm:$0xff] }
 0x175   : > { %1688 = vmatpush.bf16.msrb.mxu1 %v3172_v38  ;;  %v3133_v38 = vld [vmem:[#allocation7 + $0x98] sm:$0xf0] }
 0x176   : > { %v1184_v9 = vmax.f32 %v1138_v26, 0.0  ;;  %v3072_v26 = vor.u32 %v3428_v21, %v3069_v25  ;;  %1674 = vmatpush.bf16.msrb.mxu0 %v3068_v24  ;;  %v3136_v40 = vor.u32 %v3444_v37, %v3133_v38  ;;  %v1824_v21 = vld [vmem:[%s4615_s9 + $0x1d0] sm:$0xff]  ;;  %v1785_v37 = vld [vmem:[%s4615_s9 + $0x98] sm:$0xff] }
 0x177   : > { %v1156_v28 = vpop.f32.mrf.mxu2 }
 0x178   : > { %v1157_v30 = vadd.f32 %v1156_v28, %v4177_v23  ;;  %v1188_v31 = vpack.c.bf16 %v1184_v9, %v1182_v27  ;;  %v1175_v32 = vpop.f32.mrf.mxu3  ;;  %v3452_v23 = vld [vmem:[#allocation7 + $0xd4] sm:$0xf]  ;;  %v3446_v27 = vld [vmem:[#allocation7 + $0xa4] sm:$0xf]  ;;  %v3141_v9 = vld [vmem:[#allocation7 + $0xa8] sm:$0xf0]  ;;  %1712 = vmatpush.bf16.msrb.mxu2 %v3072_v26 }
 0x179   : > { %v3168_v45 = vor.u32 %v3452_v23, %v3165_v43  ;;  %1689 = vmatpush.bf16.msrb.mxu1 %v3164_v49  ;;  %v3139_v28 = vld [vmem:[#allocation7 + $0xa0] sm:$0xf]  ;;  %v3144_v29 = vor.u32 %v3446_v27, %v3141_v9  ;;  %v3125_v23 = vld [vmem:[#allocation7 + $0x88] sm:$0xf0]  ;;  %v1788_v27 = vld [vmem:[%s4615_s9 + $0xb0] sm:$0xff] }
 0x17a   : > { %v1176_v33 = vadd.f32 %v1175_v32, %v1157_v30  ;;  %1401 = vmatmul.bf16.gmra.mxu0 %v1188_v31  ;;  %1439 = vmatmul.bf16.gmra.mxu2 %v1188_v31  ;;  %v3447_v30 = vld [vmem:[#allocation7 + $0xa4] sm:$0xf0]  ;;  %v3059_v32 = vld [vmem:[#allocation7] sm:$0xf]  ;;  %v3128_v44 = vor.u32 %v3442_v42, %v3125_v23  ;;  %v1789_v9 = vld [vmem:[%s4615_s9 + $0xb8] sm:$0xff] }
 0x17b   : > { %1727 = vmatpush.bf16.msrb.mxu3 %v3168_v45  ;;  %v3140_v31 = vor.u32 %v3447_v30, %v3139_v28  ;;  %v3123_v43 = vld [vmem:[#allocation7 + $0x80] sm:$0xf]  ;;  %v3443_v45 = vld [vmem:[#allocation7 + $0x84] sm:$0xf0] }
 0x17c   : > { %v1185_v35 = vmax.f32 %v1176_v33, 0.0  ;;  %v3427_v33 = vld [vmem:[#allocation7 + $0x4] sm:$0xf0]  ;;  %v3124_v46 = vor.u32 %v3443_v45, %v3123_v43  ;;  %v1222_v49 = vld [vmem:[%s4612_s6] sm:$0x3] }
 0x17d   : > { %1690 = vmatpush.bf16.msrb.mxu1 %v3156_v62  ;;  %v4189_v53 = vperm.slane %v1222_v49, 0  ;;  %v4207_v63 = vperm.slane %v1222_v49, 1  ;;  %v1782_v23 = vld [vmem:[%s4615_s9 + $0x80] sm:$0xff]  ;;  %v1783_v43 = vld [vmem:[%s4615_s9 + $0x88] sm:$0xff] }
 0x17e   : > { %v1189_v36 = vpack.c.bf16 %v1185_v35, %v1183_v34  ;;  %v3426_v34 = vld [vmem:[#allocation7 + $0x4] sm:$0xf]  ;;  %v3060_v35 = vor.u32 %v3427_v33, %v3059_v32  ;;  %v1787_v32 = vld [vmem:[%s4615_s9 + $0xa8] sm:$0xff] }
 0x17f   : > { %1728 = vmatpush.bf16.msrb.mxu3 %v3160_v59  ;;  %v1819_v45 = vld [vmem:[%s4615_s9 + $0x1a8] sm:$0xff]  ;;  %v1818_v49 = vld [vmem:[%s4615_s9 + $0x1a0] sm:$0xff] }
 0x180   : > { %1420 = vmatmul.bf16.gmra.mxu1 %v1189_v36  ;;  %1458 = vmatmul.bf16.gmra.mxu3 %v1189_v36  ;;  %v3061_v36 = vld [vmem:[#allocation7 + $0x8] sm:$0xf0] }
 0x181   : > { %1691 = vmatpush.bf16.msrb.mxu1 %v3148_v12  ;;  %v3064_v13 = vor.u32 %v3426_v34, %v3061_v36  ;;  %1675 = vmatpush.bf16.msrb.mxu0 %v3060_v35  ;;  %v1826_v12 = vld [vmem:[%s4615_s9 + $0x1e0] sm:$0xff]  ;;  %v1823_v34 = vld [vmem:[%s4615_s9 + $0x1c8] sm:$0xff] }
 0x182   : > { %v1822_v35 = vld [vmem:[%s4615_s9 + $0x1c0] sm:$0xff] }
 0x183   : > { %1729 = vmatpush.bf16.msrb.mxu3 %v3152_v7  ;;  %1713 = vmatpush.bf16.msrb.mxu2 %v3064_v13  ;;  %v1784_v13 = vld [vmem:[%s4615_s9 + $0x90] sm:$0xff] }
 0x185   : > { %1692 = vmatpush.bf16.msrb.mxu1 %v3140_v31  ;;  %1836 = vmatpush.msra.mxu0 %v1796_v56  ;;  %v1786_v31 = vld [vmem:[%s4615_s9 + $0xa0] sm:$0xff] }
 0x187   : > { %1730 = vmatpush.bf16.msrb.mxu3 %v3144_v29  ;;  %1894 = vmatpush.msra.mxu2 %v1797_v57 }
 0x188   : > { %1837 = vmatpush.msra.mxu0 %v1794_v58 }
 0x189   : > { %1693 = vmatpush.bf16.msrb.mxu1 %v3132_v8  ;;  %1895 = vmatpush.msra.mxu2 %v1795_v60 }
 0x18a   : > { %1838 = vmatpush.msra.mxu0 %v1792_v61 }
 0x18b   : > { %1731 = vmatpush.bf16.msrb.mxu3 %v3136_v40  ;;  %1896 = vmatpush.msra.mxu2 %v1793_v1  ;;  %v1821_v40 = vld [vmem:[%s4615_s9 + $0x1b8] sm:$0xff] }
 0x18c   : > { %1839 = vmatpush.msra.mxu0 %v1790_v10  ;;  %v1778_v10 = vld [vmem:[%s4615_s9 + $0x60] sm:$0xff] }
 0x18d   : > { %1694 = vmatpush.bf16.msrb.mxu1 %v3124_v46  ;;  %1897 = vmatpush.msra.mxu2 %v1791_v14  ;;  %v1780_v46 = vld [vmem:[%s4615_s9 + $0x70] sm:$0xff] }
 0x18e   : > { %1840 = vmatpush.msra.mxu0 %v1788_v27  ;;  %v1816_v14 = vld [vmem:[%s4615_s9 + $0x190] sm:$0xff]  ;;  %v1775_v27 = vld [vmem:[%s4615_s9 + $0x48] sm:$0xff] }
 0x18f   : > { %1732 = vmatpush.bf16.msrb.mxu3 %v3128_v44  ;;  %1898 = vmatpush.msra.mxu2 %v1789_v9  ;;  %v1811_v9 = vld [vmem:[%s4615_s9 + $0x168] sm:$0xff] }
 0x190   : > { %1841 = vmatpush.msra.mxu0 %v1786_v31  ;;  %v1809_v31 = vld [vmem:[%s4615_s9 + $0x158] sm:$0xff] }
 0x191   : > { %1865 = vmatpush.msra.mxu1 %v1828_v3  ;;  %1899 = vmatpush.msra.mxu2 %v1787_v32  ;;  %v1770_v32 = vld [vmem:[%s4615_s9 + $0x20] sm:$0xff] }
 0x192   : > { %1842 = vmatpush.msra.mxu0 %v1784_v13  ;;  %v1806_v13 = vld [vmem:[%s4615_s9 + $0x140] sm:$0xff] }
 0x193   : > { %1923 = vmatpush.msra.mxu3 %v1829_v2  ;;  %1866 = vmatpush.msra.mxu1 %v1826_v12  ;;  %v1815_v12 = vld [vmem:[%s4615_s9 + $0x188] sm:$0xff] }
 0x194   : > { %1900 = vmatpush.msra.mxu2 %v1785_v37  ;;  %1843 = vmatpush.msra.mxu0 %v1782_v23  ;;  %v1769_v37 = vld [vmem:[%s4615_s9 + $0x18] sm:$0xff] }
 0x195   : > { %1924 = vmatpush.msra.mxu3 %v1827_v6  ;;  %1867 = vmatpush.msra.mxu1 %v1824_v21  ;;  %v1777_v21 = vld [vmem:[%s4615_s9 + $0x58] sm:$0xff] }
 0x196   : > { %1901 = vmatpush.msra.mxu2 %v1783_v43  ;;  %1844 = vmatpush.msra.mxu0 %v1780_v46  ;;  %v1801_v23 = vld [vmem:[%s4615_s9 + $0x118] sm:$0xff]  ;;  %v1800_v43 = vld [vmem:[%s4615_s9 + $0x110] sm:$0xff] }
 0x197   : > { %1925 = vmatpush.msra.mxu3 %v1825_v20  ;;  %1868 = vmatpush.msra.mxu1 %v1822_v35  ;;  %v1814_v20 = vld [vmem:[%s4615_s9 + $0x180] sm:$0xff]  ;;  %v1807_v35 = vld [vmem:[%s4615_s9 + $0x148] sm:$0xff] }
 0x198   : > { %1845 = vmatpush.msra.mxu0 %v1778_v10  ;;  %v3237_v10 = vld [vmem:[#allocation9 + $0x68] sm:$0xf0] }
 0x199   : > { %1926 = vmatpush.msra.mxu3 %v1823_v34  ;;  %1869 = vmatpush.msra.mxu1 %v1820_v41  ;;  %v1771_v34 = vld [vmem:[%s4615_s9 + $0x28] sm:$0xff] }
 0x19a   : > { %v1767_v41 = vld [vmem:[%s4615_s9 + $0x8] sm:$0xff] }
 0x19b   : > { %1927 = vmatpush.msra.mxu3 %v1821_v40  ;;  %1870 = vmatpush.msra.mxu1 %v1818_v49  ;;  %v1804_v40 = vld [vmem:[%s4615_s9 + $0x130] sm:$0xff] }
 0x19d   : > { %1928 = vmatpush.msra.mxu3 %v1819_v45  ;;  %1871 = vmatpush.msra.mxu1 %v1816_v14  ;;  %v1798_v45 = vld [vmem:[%s4615_s9 + $0x100] sm:$0xff] }
 0x19f   : > { %1872 = vmatpush.msra.mxu1 %v1814_v20  ;;  %v3307_v20 = vld [vmem:[#allocation9 + $0xf0] sm:$0xf] }
 0x1e7   : > { %v1397_v48 = vpop.f32.mrf.mxu0 }
 0x1e8   : > { %v1398_v55 = vadd.f32 %v1397_v48, %v4189_v53 }
 0x1ed   : > { %v1416_v50 = vpop.f32.mrf.mxu1  ;;  %v1435_v51 = vpop.f32.mrf.mxu2 }
 0x1ee   : > { %v1417_v62 = vadd.f32 %v1416_v50, %v1398_v55  ;;  %v1436_v25 = vadd.f32 %v1435_v51, %v4207_v63  ;;  %v1781_v50 = vld [vmem:[%s4615_s9 + $0x78] sm:$0xff] }
 0x1ef   : > { %v1399_v54 = vpop.f32.mrf.mxu0  ;;  %1902 = vmatpush.msra.mxu2 %v1781_v50 }
 0x1f0   : > { %v1400_v0 = vadd.f32 %v1399_v54, %v4189_v53  ;;  %v1464_v24 = vmax.f32 %v1417_v62, 0.0  ;;  %v1817_v54 = vld [vmem:[%s4615_s9 + $0x198] sm:$0xff] }
 0x1f1   : > { %1929 = vmatpush.msra.mxu3 %v1817_v54 }
 0x1f3   : > { %v1454_v59 = vpop.f32.mrf.mxu3  ;;  %1930 = vmatpush.msra.mxu3 %v1815_v12  ;;  %v3488_v12 = vld [vmem:[#allocation9 + $0xf4] sm:$0xf] }
 0x1f4   : > { %v1455_v28 = vadd.f32 %v1454_v59, %v1436_v25  ;;  %v1774_v25 = vld [vmem:[%s4615_s9 + $0x40] sm:$0xff] }
 0x1f5   : > { %v1418_v4 = vpop.f32.mrf.mxu1  ;;  %v1437_v5 = vpop.f32.mrf.mxu2 }
 0x1f6   : > { %v1419_v7 = vadd.f32 %v1418_v4, %v1400_v0  ;;  %v1438_v30 = vadd.f32 %v1437_v5, %v4207_v63  ;;  %v1465_v8 = vmax.f32 %v1455_v28, 0.0  ;;  %v1772_v28 = vld [vmem:[%s4615_s9 + $0x30] sm:$0xff] }
 0x1f7   : > { %v1402_v18 = vpop.f32.mrf.mxu0 }
 0x1f8   : > { %v1466_v26 = vmax.f32 %v1419_v7, 0.0  ;;  %v1403_v51 = vadd.f32 %v1402_v18, %v4189_v53  ;;  %v1776_v18 = vld [vmem:[%s4615_s9 + $0x50] sm:$0xff] }
 0x1f9   : > { %1846 = vmatpush.msra.mxu0 %v1776_v18  ;;  %v3309_v18 = vld [vmem:[#allocation9 + $0xf8] sm:$0xf0] }
 0x1fa   : > { %v1472_v29 = vpack.c.bf16 %v1466_v26, %v1464_v24  ;;  %v1813_v24 = vld [vmem:[%s4615_s9 + $0x178] sm:$0xff]  ;;  %v1812_v26 = vld [vmem:[%s4615_s9 + $0x170] sm:$0xff] }
 0x1fb   : > { %v1456_v33 = vpop.f32.mrf.mxu3  ;;  %1931 = vmatpush.msra.mxu3 %v1813_v24  ;;  %1847 = vmatpush.msra.mxu0 %v1774_v25  ;;  %v3312_v25 = vor.u32 %v3488_v12, %v3309_v18  ;;  %v3485_v12 = vld [vmem:[#allocation9 + $0xd4] sm:$0xf0]  ;;  %v3211_v18 = vld [vmem:[#allocation9 + $0x30] sm:$0xf] }
 0x1fc   : > { %v1457_v36 = vadd.f32 %v1456_v33, %v1438_v30  ;;  %1676 = vmatmul.bf16.vlgmr.msrb.gmra.mxu0 %v1472_v29  ;;  %1714 = vmatmul.bf16.vlgmr.msrb.gmra.mxu2 %v1472_v29  ;;  %v1810_v29 = vld [vmem:[%s4615_s9 + $0x160] sm:$0xff]  ;;  %v1773_v30 = vld [vmem:[%s4615_s9 + $0x38] sm:$0xff]  ;;  %v1808_v33 = vld [vmem:[%s4615_s9 + $0x150] sm:$0xff] }
 0x1fd   : > { %v1421_v38 = vpop.f32.mrf.mxu1  ;;  %v1440_v39 = vpop.f32.mrf.mxu2  ;;  %1873 = vmatpush.msra.mxu1 %v1812_v26  ;;  %1932 = vmatpush.msra.mxu3 %v1811_v9  ;;  %v3227_v26 = vld [vmem:[#allocation9 + $0x50] sm:$0xf] }
 0x1fe   : > { %v1467_v42 = vmax.f32 %v1457_v36, 0.0  ;;  %v1422_v56 = vadd.f32 %v1421_v38, %v1403_v51  ;;  %v1441_v62 = vadd.f32 %v1440_v39, %v4207_v63  ;;  %1848 = vmatpush.msra.mxu0 %v1772_v28  ;;  %v1768_v36 = vld [vmem:[%s4615_s9 + $0x10] sm:$0xff]  ;;  %v1805_v38 = vld [vmem:[%s4615_s9 + $0x138] sm:$0xff]  ;;  %v1766_v39 = vld [vmem:[%s4615_s9] sm:$0xff] }
 0x1ff   : > { %v1404_v48 = vpop.f32.mrf.mxu0  ;;  %1874 = vmatpush.msra.mxu1 %v1810_v29  ;;  %1933 = vmatpush.msra.mxu3 %v1809_v31  ;;  %v3229_v31 = vld [vmem:[#allocation9 + $0x58] sm:$0xf0] }
 0x200   : > { %v1473_v44 = vpack.c.bf16 %v1467_v42, %v1465_v8  ;;  %v1405_v57 = vadd.f32 %v1404_v48, %v4189_v53  ;;  %v1468_v61 = vmax.f32 %v1422_v56, 0.0  ;;  %1849 = vmatpush.msra.mxu0 %v1770_v32  ;;  %v1803_v8 = vld [vmem:[%s4615_s9 + $0x128] sm:$0xff]  ;;  %v1802_v42 = vld [vmem:[%s4615_s9 + $0x120] sm:$0xff] }
 0x201   : > { %1875 = vmatpush.msra.mxu1 %v1808_v33  ;;  %1934 = vmatpush.msra.mxu3 %v1807_v35  ;;  %v1744_v48 = vld [vmem:[%s4614_s8] sm:$0x3]  ;;  %v3486_v32 = vld [vmem:[#allocation9 + $0xe4] sm:$0xf]  ;;  %v3301_v35 = vld [vmem:[#allocation9 + $0xe8] sm:$0xf0] }
 0x202   : > { %1695 = vmatmul.bf16.vlgmr.msrb.gmra.mxu1 %v1473_v44  ;;  %1733 = vmatmul.bf16.vlgmr.msrb.gmra.mxu3 %v1473_v44  ;;  %v1799_v44 = vld [vmem:[%s4615_s9 + $0x108] sm:$0xff]  ;;  %v4397_v50 = vperm.slane %v1744_v48, 0 }
 0x203   : > { %v1459_v55 = vpop.f32.mrf.mxu3  ;;  %1850 = vmatpush.msra.mxu0 %v1768_v36  ;;  %1876 = vmatpush.msra.mxu1 %v1806_v13  ;;  %v3299_v36 = vld [vmem:[#allocation9 + $0xe0] sm:$0xf] }
 0x204   : > { %v1460_v1 = vadd.f32 %v1459_v55, %v1441_v62  ;;  %1935 = vmatpush.msra.mxu3 %v1805_v38  ;;  %v3473_v62 = vld [vmem:[#allocation9 + $0x74] sm:$0xf0]  ;;  %v3487_v38 = vld [vmem:[#allocation9 + $0xe4] sm:$0xf0] }
 0x205   : > { %v1423_v58 = vpop.f32.mrf.mxu1  ;;  %v1442_v60 = vpop.f32.mrf.mxu2  ;;  %1851 = vmatpush.msra.mxu0 %v1766_v39  ;;  %1877 = vmatpush.msra.mxu1 %v1804_v40 }
 0x206   : > { %v1424_v59 = vadd.f32 %v1423_v58, %v1405_v57  ;;  %v1443_v2 = vadd.f32 %v1442_v60, %v4207_v63  ;;  %v1469_v6 = vmax.f32 %v1460_v1, 0.0  ;;  %v1779_v63 = vld [vmem:[%s4615_s9 + $0x68] sm:$0xff]  ;;  %1936 = vmatpush.msra.mxu3 %v1803_v8  ;;  %v4401_v60 = vperm.slane %v1744_v48, 1 }
 0x207   : > { %1903 = vmatpush.msra.mxu2 %v1779_v63  ;;  %1878 = vmatpush.msra.mxu1 %v1802_v42 }
 0x208   : > { %v1470_v0 = vmax.f32 %v1424_v59, 0.0  ;;  %1937 = vmatpush.msra.mxu3 %v1801_v23 }
 0x209   : > { %1904 = vmatpush.msra.mxu2 %v1777_v21  ;;  %1879 = vmatpush.msra.mxu1 %v1800_v43 }
 0x20a   : > { %v1474_v3 = vpack.c.bf16 %v1470_v0, %v1468_v61  ;;  %1938 = vmatpush.msra.mxu3 %v1799_v44  ;;  %v3243_v61 = vld [vmem:[#allocation9 + $0x70] sm:$0xf] }
 0x20b   : > { %v1461_v4 = vpop.f32.mrf.mxu3  ;;  %1905 = vmatpush.msra.mxu2 %v1775_v27  ;;  %1880 = vmatpush.msra.mxu1 %v1798_v45  ;;  %v3244_v1 = vor.u32 %v3473_v62, %v3243_v61  ;;  %v3469_v27 = vld [vmem:[#allocation9 + $0x54] sm:$0xf0] }
 0x20c   : > { %v1462_v5 = vadd.f32 %v1461_v4, %v1443_v2  ;;  %1681 = vmatmul.bf16.gmra.mxu0 %v1474_v3  ;;  %1719 = vmatmul.bf16.gmra.mxu2 %v1474_v3  ;;  %v3472_v2 = vld [vmem:[#allocation9 + $0x74] sm:$0xf]  ;;  %v3245_v3 = vld [vmem:[#allocation9 + $0x78] sm:$0xf0]  ;;  %v3228_v13 = vor.u32 %v3469_v27, %v3227_v26  ;;  %v3285_v27 = vld [vmem:[#allocation9 + $0xc8] sm:$0xf0] }
 0x20d   : > { %1906 = vmatpush.msra.mxu2 %v1773_v30  ;;  %2154 = vmatpush.bf16.msrb.mxu0 %v3244_v1  ;;  %v3468_v30 = vld [vmem:[#allocation9 + $0x54] sm:$0xf] }
 0x20e   : > { %v1471_v53 = vmax.f32 %v1462_v5, 0.0  ;;  %2211 = vmatpush.bf16.msrb.mxu3 %v3312_v25  ;;  %v3232_v42 = vor.u32 %v3468_v30, %v3229_v31  ;;  %v3213_v25 = vld [vmem:[#allocation9 + $0x38] sm:$0xf0]  ;;  %v3203_v31 = vld [vmem:[#allocation9 + $0x20] sm:$0xf] }
 0x20f   : > { %1907 = vmatpush.msra.mxu2 %v1771_v34 }
 0x210   : > { %v1475_v7 = vpack.c.bf16 %v1471_v53, %v1469_v6  ;;  %v3248_v6 = vor.u32 %v3472_v2, %v3245_v3  ;;  %v3471_v53 = vld [vmem:[#allocation9 + $0x64] sm:$0xf0] }
 0x211   : > { %1908 = vmatpush.msra.mxu2 %v1769_v37  ;;  %v3304_v37 = vor.u32 %v3486_v32, %v3301_v35  ;;  %v3463_v32 = vld [vmem:[#allocation9 + $0x24] sm:$0xf0]  ;;  %v3205_v35 = vld [vmem:[#allocation9 + $0x28] sm:$0xf0] }
 0x212   : > { %1700 = vmatmul.bf16.gmra.mxu1 %v1475_v7  ;;  %1738 = vmatmul.bf16.gmra.mxu3 %v1475_v7  ;;  %v3470_v7 = vld [vmem:[#allocation9 + $0x64] sm:$0xf] }
 0x213   : > { %1909 = vmatpush.msra.mxu2 %v1767_v41  ;;  %v3240_v28 = vor.u32 %v3470_v7, %v3237_v10  ;;  %v3300_v41 = vor.u32 %v3487_v38, %v3299_v36  ;;  %2212 = vmatpush.bf16.msrb.mxu3 %v3304_v37  ;;  %v3221_v10 = vld [vmem:[#allocation9 + $0x48] sm:$0xf0]  ;;  %v3277_v37 = vld [vmem:[#allocation9 + $0xb8] sm:$0xf0]  ;;  %v3275_v38 = vld [vmem:[#allocation9 + $0xb0] sm:$0xf] }
 0x215   : > { %2192 = vmatpush.bf16.msrb.mxu2 %v3248_v6  ;;  %v3467_v6 = vld [vmem:[#allocation9 + $0x44] sm:$0xf0] }
 0x219   : > { %2193 = vmatpush.bf16.msrb.mxu2 %v3240_v28  ;;  %v3283_v28 = vld [vmem:[#allocation9 + $0xc0] sm:$0xf] }
 0x21d   : > { %2194 = vmatpush.bf16.msrb.mxu2 %v3232_v42  ;;  %v3461_v42 = vld [vmem:[#allocation9 + $0x14] sm:$0xf0] }
 0x279   : > { %v1677_v46 = vpop.f32.mrf.mxu0 }
 0x27a   : > { %v1678_v49 = vadd.f32 %v1677_v46, %v4155_v19  ;;  %v3235_v19 = vld [vmem:[#allocation9 + $0x60] sm:$0xf] }
 0x27b   : > { %v3236_v63 = vor.u32 %v3471_v53, %v3235_v19  ;;  %v3466_v53 = vld [vmem:[#allocation9 + $0x44] sm:$0xf] }
 0x27d   : > { %2155 = vmatpush.bf16.msrb.mxu0 %v3236_v63 }
 0x27f   : > { %v1696_v51 = vpop.f32.mrf.mxu1  ;;  %v1715_v54 = vpop.f32.mrf.mxu2 }
 0x280   : > { %v1697_v55 = vadd.f32 %v1696_v51, %v1678_v49  ;;  %v1716_v59 = vadd.f32 %v1715_v54, %v4157_v22 }
 0x281   : > { %v1679_v56 = vpop.f32.mrf.mxu0  ;;  %2156 = vmatpush.bf16.msrb.mxu0 %v3228_v13  ;;  %v3480_v13 = vld [vmem:[#allocation9 + $0xb4] sm:$0xf] }
 0x282   : > { %v1750_v57 = vadd.f32 %v4397_v50, %v1697_v55  ;;  %v1680_v4 = vadd.f32 %v1679_v56, %v4159_v47  ;;  %v3489_v47 = vld [vmem:[#allocation9 + $0xf4] sm:$0xf0] }
 0x283   : > { %v3308_v29 = vor.u32 %v3489_v47, %v3307_v20  ;;  %v3465_v20 = vld [vmem:[#allocation9 + $0x34] sm:$0xf0]  ;;  %v3482_v47 = vld [vmem:[#allocation9 + $0xc4] sm:$0xf] }
 0x284   : > { %v1758_v58 = vmax.f32 %v1750_v57, 0.0 }
 0x285   : > { %v1734_v0 = vpop.f32.mrf.mxu3  ;;  %2173 = vmatpush.bf16.msrb.mxu1 %v3308_v29  ;;  %v3483_v29 = vld [vmem:[#allocation9 + $0xc4] sm:$0xf0] }
 0x286   : > { %v1735_v5 = vadd.f32 %v1734_v0, %v1716_v59  ;;  %1852 = vmatmul.f32.vlgmr.msra.gmra.mxu0 %v1758_v58  ;;  %1910 = vmatmul.f32.vlgmr.msra.gmra.mxu2 %v1758_v58  ;;  %v3284_v30 = vor.u32 %v3483_v29, %v3283_v28 }
 0x287   : > { %v1698_v14 = vpop.f32.mrf.mxu1  ;;  %v1717_v22 = vpop.f32.mrf.mxu2 }
 0x288   : > { %v1751_v21 = vadd.f32 %v4401_v60, %v1735_v5  ;;  %v1699_v24 = vadd.f32 %v1698_v14, %v1680_v4  ;;  %v1718_v39 = vadd.f32 %v1717_v22, %v4161_v52  ;;  %v3219_v5 = vld [vmem:[#allocation9 + $0x40] sm:$0xf]  ;;  %v3484_v14 = vld [vmem:[#allocation9 + $0xd4] sm:$0xf]  ;;  %v3291_v22 = vld [vmem:[#allocation9 + $0xd0] sm:$0xf] }
 0x289   : > { %v1682_v9 = vpop.f32.mrf.mxu0  ;;  %2174 = vmatpush.bf16.msrb.mxu1 %v3300_v41  ;;  %v3220_v7 = vor.u32 %v3467_v6, %v3219_v5  ;;  %v3475_v5 = vld [vmem:[#allocation9 + $0x84] sm:$0xf0] }
 0x28a   : > { %v1759_v33 = vmax.f32 %v1751_v21, 0.0  ;;  %v1752_v34 = vadd.f32 %v4397_v50, %v1699_v24  ;;  %v1683_v23 = vadd.f32 %v1682_v9, %v4163_v11  ;;  %v3292_v21 = vor.u32 %v3485_v12, %v3291_v22  ;;  %v3464_v24 = vld [vmem:[#allocation9 + $0x34] sm:$0xf]  ;;  %v2253_v22 = vld [vmem:[%s4619_s13 + $0x78] sm:$0xff] }
 0x28b   : > { %2157 = vmatpush.bf16.msrb.mxu0 %v3220_v7  ;;  %v3216_v26 = vor.u32 %v3464_v24, %v3213_v25  ;;  %v3288_v9 = vor.u32 %v3482_v47, %v3285_v27  ;;  %v1830_v7 = vld [vmem:[%s4616_s10] sm:$0x3]  ;;  %v2269_v12 = vld [vmem:[%s4619_s13 + $0xf8] sm:$0xff] }
 0x28c   : > { %1881 = vmatmul.f32.vlgmr.msra.gmra.mxu1 %v1759_v33  ;;  %1939 = vmatmul.f32.vlgmr.msra.gmra.mxu3 %v1759_v33  ;;  %v1760_v40 = vmax.f32 %v1752_v34, 0.0  ;;  %v3204_v33 = vor.u32 %v3463_v32, %v3203_v31  ;;  %v3462_v34 = vld [vmem:[#allocation9 + $0x24] sm:$0xf]  ;;  %v1833_v29 = vperm.slane %v1830_v7, 1  ;;  %v2249_v31 = vld [vmem:[%s4619_s13 + $0x58] sm:$0xff] }
 0x28d   : > { %v1736_v8 = vpop.f32.mrf.mxu3  ;;  %2175 = vmatpush.bf16.msrb.mxu1 %v3292_v21  ;;  %v3208_v36 = vor.u32 %v3462_v34, %v3205_v35  ;;  %v2250_v47 = vld [vmem:[%s4619_s13 + $0x60] sm:$0xff]  ;;  %v2248_v34 = vld [vmem:[%s4619_s13 + $0x50] sm:$0xff]  ;;  %v2265_v35 = vld [vmem:[%s4619_s13 + $0xd8] sm:$0xff] }
 0x28e   : > { %v1737_v43 = vadd.f32 %v1736_v8, %v1718_v39  ;;  %1855 = vmatmul.f32.gmra.mxu0 %v1760_v40  ;;  %1913 = vmatmul.f32.gmra.mxu2 %v1760_v40  ;;  %v3280_v39 = vor.u32 %v3480_v13, %v3277_v37  ;;  %v3481_v40 = vld [vmem:[#allocation9 + $0xb4] sm:$0xf0]  ;;  %v3195_v8 = vld [vmem:[#allocation9 + $0x10] sm:$0xf]  ;;  %v2247_v37 = vld [vmem:[%s4619_s13 + $0x48] sm:$0xff] }
 0x28f   : > { %v1701_v44 = vpop.f32.mrf.mxu1  ;;  %v1720_v45 = vpop.f32.mrf.mxu2  ;;  %v3276_v41 = vor.u32 %v3481_v40, %v3275_v38  ;;  %v2264_v38 = vld [vmem:[%s4619_s13 + $0xd0] sm:$0xff] }
 0x290   : > { %v1702_v46 = vadd.f32 %v1701_v44, %v1683_v23  ;;  %v1753_v48 = vadd.f32 %v4401_v60, %v1737_v43  ;;  %v1721_v54 = vadd.f32 %v1720_v45, %v4165_v15  ;;  %v3460_v23 = vld [vmem:[#allocation9 + $0x14] sm:$0xf]  ;;  %v3196_v43 = vor.u32 %v3461_v42, %v3195_v8  ;;  %v3197_v44 = vld [vmem:[#allocation9 + $0x18] sm:$0xf0]  ;;  %v2246_v8 = vld [vmem:[%s4619_s13 + $0x40] sm:$0xff] }
 0x291   : > { %v1684_v51 = vpop.f32.mrf.mxu0  ;;  %2176 = vmatpush.bf16.msrb.mxu1 %v3284_v30  ;;  %v3200_v45 = vor.u32 %v3460_v23, %v3197_v44  ;;  %v2263_v42 = vld [vmem:[%s4619_s13 + $0xc8] sm:$0xff] }
 0x292   : > { %v1761_v52 = vmax.f32 %v1753_v48, 0.0  ;;  %v1754_v49 = vadd.f32 %v4397_v50, %v1702_v46  ;;  %v1685_v56 = vadd.f32 %v1684_v51, %v4167_v16  ;;  %v3478_v46 = vld [vmem:[#allocation9 + $0xa4] sm:$0xf]  ;;  %v3269_v48 = vld [vmem:[#allocation9 + $0xa8] sm:$0xf0] }
 0x293   : > { %v3479_v51 = vld [vmem:[#allocation9 + $0xa4] sm:$0xf0] }
 0x294   : > { %1884 = vmatmul.f32.gmra.mxu1 %v1761_v52  ;;  %1942 = vmatmul.f32.gmra.mxu3 %v1761_v52  ;;  %v1762_v11 = vmax.f32 %v1754_v49, 0.0  ;;  %v3267_v52 = vld [vmem:[#allocation9 + $0xa0] sm:$0xf]  ;;  %v3272_v49 = vor.u32 %v3478_v46, %v3269_v48  ;;  %v2244_v46 = vld [vmem:[%s4619_s13 + $0x30] sm:$0xff] }
 0x295   : > { %v1739_v55 = vpop.f32.mrf.mxu3  ;;  %2177 = vmatpush.bf16.msrb.mxu1 %v3276_v41 }
 0x296   : > { %v1740_v57 = vadd.f32 %v1739_v55, %v1721_v54  ;;  %1858 = vmatmul.f32.gmra.mxu0 %v1762_v11  ;;  %1916 = vmatmul.f32.gmra.mxu2 %v1762_v11  ;;  %v3268_v54 = vor.u32 %v3479_v51, %v3267_v52  ;;  %v3187_v11 = vld [vmem:[#allocation9] sm:$0xf]  ;;  %v3459_v55 = vld [vmem:[#allocation9 + $0x4] sm:$0xf0] }
 0x297   : > { %v1703_v58 = vpop.f32.mrf.mxu1  ;;  %v1722_v62 = vpop.f32.mrf.mxu2 }
 0x298   : > { %v1704_v59 = vadd.f32 %v1703_v58, %v1685_v56  ;;  %v1755_v61 = vadd.f32 %v4401_v60, %v1740_v57  ;;  %v1723_v2 = vadd.f32 %v1722_v62, %v4172_v17  ;;  %v3293_v17 = vld [vmem:[#allocation9 + $0xd8] sm:$0xf0]  ;;  %v3458_v56 = vld [vmem:[#allocation9 + $0x4] sm:$0xf]  ;;  %v3188_v57 = vor.u32 %v3459_v55, %v3187_v11  ;;  %v3189_v58 = vld [vmem:[#allocation9 + $0x8] sm:$0xf0] }
 0x299   : > { %v3296_v63 = vor.u32 %v3484_v14, %v3293_v17  ;;  %2178 = vmatpush.bf16.msrb.mxu1 %v3268_v54  ;;  %v3261_v62 = vld [vmem:[#allocation9 + $0x98] sm:$0xf0]  ;;  %v4419_v17 = vperm.slane %v1830_v7, 0  ;;  %v2258_v7 = vld [vmem:[%s4619_s13 + $0xa0] sm:$0xff] }
 0x29a   : > { %v1763_v0 = vmax.f32 %v1755_v61, 0.0  ;;  %v1756_v1 = vadd.f32 %v4397_v50, %v1704_v59  ;;  %v3224_v50 = vor.u32 %v3466_v53, %v3221_v10  ;;  %v3192_v59 = vor.u32 %v3458_v56, %v3189_v58  ;;  %v3476_v61 = vld [vmem:[#allocation9 + $0x94] sm:$0xf] }
 0x29b   : > { %2213 = vmatpush.bf16.msrb.mxu3 %v3296_v63  ;;  %v2252_v63 = vld [vmem:[%s4619_s13 + $0x70] sm:$0xff] }
 0x29c   : > { %1887 = vmatmul.f32.gmra.mxu1 %v1763_v0  ;;  %1945 = vmatmul.f32.gmra.mxu3 %v1763_v0  ;;  %v1764_v15 = vmax.f32 %v1756_v1, 0.0  ;;  %v3259_v0 = vld [vmem:[#allocation9 + $0x90] sm:$0xf]  ;;  %v3264_v1 = vor.u32 %v3476_v61, %v3261_v62 }
 0x29d   : > { %v1741_v3 = vpop.f32.mrf.mxu3  ;;  %2195 = vmatpush.bf16.msrb.mxu2 %v3224_v50 }
 0x29e   : > { %v1742_v19 = vadd.f32 %v1741_v3, %v1723_v2  ;;  %1861 = vmatmul.f32.gmra.mxu0 %v1764_v15  ;;  %1919 = vmatmul.f32.gmra.mxu2 %v1764_v15  ;;  %v3477_v2 = vld [vmem:[#allocation9 + $0x94] sm:$0xf0]  ;;  %v3474_v3 = vld [vmem:[#allocation9 + $0x84] sm:$0xf] }
 0x29f   : > { %2214 = vmatpush.bf16.msrb.mxu3 %v3288_v9  ;;  %v3260_v15 = vor.u32 %v3477_v2, %v3259_v0  ;;  %v2266_v9 = vld [vmem:[%s4619_s13 + $0xe0] sm:$0xff]  ;;  %v2243_v2 = vld [vmem:[%s4619_s13 + $0x28] sm:$0xff] }
 0x2a0   : > { %v1757_v16 = vadd.f32 %v4401_v60, %v1742_v19  ;;  %v3212_v60 = vor.u32 %v3465_v20, %v3211_v18  ;;  %v3253_v19 = vld [vmem:[#allocation9 + $0x88] sm:$0xf0]  ;;  %v2268_v20 = vld [vmem:[%s4619_s13 + $0xf0] sm:$0xff] }
 0x2a1   : > { %2196 = vmatpush.bf16.msrb.mxu2 %v3216_v26  ;;  %2179 = vmatpush.bf16.msrb.mxu1 %v3260_v15  ;;  %v2251_v18 = vld [vmem:[%s4619_s13 + $0x68] sm:$0xff]  ;;  %v2262_v15 = vld [vmem:[%s4619_s13 + $0xc0] sm:$0xff] }
 0x2a2   : > { %v1765_v4 = vmax.f32 %v1757_v16, 0.0  ;;  %2158 = vmatpush.bf16.msrb.mxu0 %v3212_v60  ;;  %v3251_v16 = vld [vmem:[#allocation9 + $0x80] sm:$0xf]  ;;  %v2267_v60 = vld [vmem:[%s4619_s13 + $0xe8] sm:$0xff] }
 0x2a3   : > { %2215 = vmatpush.bf16.msrb.mxu3 %v3280_v39  ;;  %v3252_v6 = vor.u32 %v3475_v5, %v3251_v16  ;;  %v2241_v16 = vld [vmem:[%s4619_s13 + $0x18] sm:$0xff]  ;;  %v2240_v5 = vld [vmem:[%s4619_s13 + $0x10] sm:$0xff] }
 0x2a4   : > { %1890 = vmatmul.f32.gmra.mxu1 %v1765_v4  ;;  %1948 = vmatmul.f32.gmra.mxu3 %v1765_v4  ;;  %v3256_v4 = vor.u32 %v3474_v3, %v3253_v19  ;;  %v2242_v3 = vld [vmem:[%s4619_s13 + $0x20] sm:$0xff]  ;;  %v2261_v19 = vld [vmem:[%s4619_s13 + $0xb8] sm:$0xff] }
 0x2a5   : > { %2197 = vmatpush.bf16.msrb.mxu2 %v3208_v36  ;;  %2180 = vmatpush.bf16.msrb.mxu1 %v3252_v6  ;;  %v2259_v6 = vld [vmem:[%s4619_s13 + $0xa8] sm:$0xff] }
 0x2a6   : > { %2159 = vmatpush.bf16.msrb.mxu0 %v3204_v33 }
 0x2a7   : > { %2216 = vmatpush.bf16.msrb.mxu3 %v3272_v49 }
 0x2a9   : > { %2198 = vmatpush.bf16.msrb.mxu2 %v3200_v45  ;;  %2303 = vmatpush.msra.mxu1 %v2269_v12  ;;  %v2245_v45 = vld [vmem:[%s4619_s13 + $0x38] sm:$0xff] }
 0x2aa   : > { %2160 = vmatpush.bf16.msrb.mxu0 %v3196_v43 }
 0x2ab   : > { %2217 = vmatpush.bf16.msrb.mxu3 %v3264_v1  ;;  %2304 = vmatpush.msra.mxu1 %v2268_v20 }
 0x2ad   : > { %2199 = vmatpush.bf16.msrb.mxu2 %v3192_v59  ;;  %2305 = vmatpush.msra.mxu1 %v2267_v60 }
 0x2ae   : > { %2161 = vmatpush.bf16.msrb.mxu0 %v3188_v57 }
 0x2af   : > { %2218 = vmatpush.bf16.msrb.mxu3 %v3256_v4  ;;  %2306 = vmatpush.msra.mxu1 %v2266_v9  ;;  %v2260_v4 = vld [vmem:[%s4619_s13 + $0xb0] sm:$0xff] }
 0x2b1   : > { %3493 = vmatpush.msra.mxu2 %v2253_v22  ;;  %2307 = vmatpush.msra.mxu1 %v2265_v35 }
 0x2b2   : > { %2274 = vmatpush.msra.mxu0 %v2253_v22  ;;  %v2254_v22 = vld [vmem:[%s4619_s13 + $0x80] sm:$0xff] }
 0x2b3   : > { %3509 = vmatpush.msra.mxu3 %v2269_v12  ;;  %3494 = vmatpush.msra.mxu2 %v2252_v63 }
 0x2b4   : > { %2275 = vmatpush.msra.mxu0 %v2252_v63  ;;  %2308 = vmatpush.msra.mxu1 %v2264_v38  ;;  %v1988_v63 = vld [vmem:[%s4618_s12] sm:$0x3] }
 0x2b5   : > { %3510 = vmatpush.msra.mxu3 %v2268_v20  ;;  %3495 = vmatpush.msra.mxu2 %v2251_v18 }
 0x2b6   : > { %2276 = vmatpush.msra.mxu0 %v2251_v18  ;;  %2309 = vmatpush.msra.mxu1 %v2263_v42  ;;  %v1990_v18 = vperm.slane %v1988_v63, 0 }
 0x2b7   : > { %3511 = vmatpush.msra.mxu3 %v2267_v60  ;;  %3496 = vmatpush.msra.mxu2 %v2250_v47 }
 0x2b8   : > { %2277 = vmatpush.msra.mxu0 %v2250_v47  ;;  %2310 = vmatpush.msra.mxu1 %v2262_v15 }
 0x2b9   : > { %3512 = vmatpush.msra.mxu3 %v2266_v9  ;;  %3497 = vmatpush.msra.mxu2 %v2249_v31 }
 0x2ba   : > { %2278 = vmatpush.msra.mxu0 %v2249_v31  ;;  %2311 = vmatpush.msra.mxu1 %v2261_v19 }
 0x2bb   : > { %3498 = vmatpush.msra.mxu2 %v2248_v34  ;;  %3513 = vmatpush.msra.mxu3 %v2265_v35 }
 0x2bc   : > { %2279 = vmatpush.msra.mxu0 %v2248_v34  ;;  %2312 = vmatpush.msra.mxu1 %v2260_v4 }
 0x2bd   : > { %3499 = vmatpush.msra.mxu2 %v2247_v37  ;;  %3514 = vmatpush.msra.mxu3 %v2264_v38 }
 0x2be   : > { %2280 = vmatpush.msra.mxu0 %v2247_v37  ;;  %2313 = vmatpush.msra.mxu1 %v2259_v6 }
 0x2bf   : > { %3500 = vmatpush.msra.mxu2 %v2246_v8  ;;  %3515 = vmatpush.msra.mxu3 %v2263_v42 }
 0x2c0   : > { %2281 = vmatpush.msra.mxu0 %v2246_v8  ;;  %2314 = vmatpush.msra.mxu1 %v2258_v7 }
 0x2c1   : > { %3501 = vmatpush.msra.mxu2 %v2245_v45  ;;  %3516 = vmatpush.msra.mxu3 %v2262_v15 }
 0x2c2   : > { %2282 = vmatpush.msra.mxu0 %v2245_v45 }
 0x2c3   : > { %3502 = vmatpush.msra.mxu2 %v2244_v46  ;;  %3517 = vmatpush.msra.mxu3 %v2261_v19 }
 0x2c4   : > { %2283 = vmatpush.msra.mxu0 %v2244_v46 }
 0x2c5   : > { %3503 = vmatpush.msra.mxu2 %v2243_v2  ;;  %3518 = vmatpush.msra.mxu3 %v2260_v4 }
 0x2c6   : > { %2284 = vmatpush.msra.mxu0 %v2243_v2 }
 0x2c7   : > { %3504 = vmatpush.msra.mxu2 %v2242_v3  ;;  %3519 = vmatpush.msra.mxu3 %v2259_v6 }
 0x2c8   : > { %2285 = vmatpush.msra.mxu0 %v2242_v3 }
 0x2c9   : > { %3505 = vmatpush.msra.mxu2 %v2241_v16  ;;  %3520 = vmatpush.msra.mxu3 %v2258_v7 }
 0x2ca   : > { %2286 = vmatpush.msra.mxu0 %v2241_v16 }
 0x2cb   : > { %3506 = vmatpush.msra.mxu2 %v2240_v5 }
 0x2cc   : > { %2287 = vmatpush.msra.mxu0 %v2240_v5 }
 0x303   : > { %v1853_v53 = vpop.f32.mrf.mxu0 }
 0x304   : > { %v1854_v24 = vadd.f32 %v1853_v53, %v4419_v17  ;;  %v2239_v53 = vld [vmem:[%s4619_s13 + $0x8] sm:$0xff] }
 0x305   : > { %2288 = vmatpush.msra.mxu0 %v2239_v53  ;;  %3507 = vmatpush.msra.mxu2 %v2239_v53 }
 0x309   : > { %v1882_v10 = vpop.f32.mrf.mxu1  ;;  %v1911_v50 = vpop.f32.mrf.mxu2 }
 0x30a   : > { %v1883_v28 = vadd.f32 %v1882_v10, %v1854_v24  ;;  %v1912_v36 = vadd.f32 %v1911_v50, %v1833_v29  ;;  %v2238_v10 = vld [vmem:[%s4619_s13] sm:$0xff]  ;;  %v2257_v50 = vld [vmem:[%s4619_s13 + $0x98] sm:$0xff] }
 0x30b   : > { %v1856_v14 = vpop.f32.mrf.mxu0  ;;  %2289 = vmatpush.msra.mxu0 %v2238_v10  ;;  %2315 = vmatpush.msra.mxu1 %v2257_v50 }
 0x30c   : > { %v1857_v25 = vadd.f32 %v1856_v14, %v4419_v17  ;;  %v2256_v14 = vld [vmem:[%s4619_s13 + $0x90] sm:$0xff]  ;;  %3521 = vmatpush.msra.mxu3 %v2257_v50  ;;  %3508 = vmatpush.msra.mxu2 %v2238_v10 }
 0x30d   : > { %2316 = vmatpush.msra.mxu1 %v2256_v14 }
 0x30e   : > { %3522 = vmatpush.msra.mxu3 %v2256_v14 }
 0x30f   : > { %v1940_v21 = vpop.f32.mrf.mxu3 }
 0x310   : > { %v1941_v40 = vadd.f32 %v1940_v21, %v1912_v36 }
 0x311   : > { %v1885_v26 = vpop.f32.mrf.mxu1  ;;  %v1914_v27 = vpop.f32.mrf.mxu2 }
 0x312   : > { %v1886_v30 = vadd.f32 %v1885_v26, %v1857_v25  ;;  %v1915_v13 = vadd.f32 %v1914_v27, %v1833_v29  ;;  %v1991_v25 = vperm.slane %v1988_v63, 1 }
 0x313   : > { %v1859_v32 = vpop.f32.mrf.mxu0 }
 0x314   : > { %v1952_v33 = vpack.c.bf16 %v1886_v30, %v1883_v28  ;;  %v1860_v49 = vadd.f32 %v1859_v32, %v4419_v17 }
 0x316   : > { %2162 = vmatmul.bf16.vlgmr.msrb.gmra.mxu0 %v1952_v33  ;;  %2200 = vmatmul.bf16.vlgmr.msrb.gmra.mxu2 %v1952_v33 }
 0x317   : > { %v1943_v39 = vpop.f32.mrf.mxu3 }
 0x318   : > { %v1944_v41 = vadd.f32 %v1943_v39, %v1915_v13 }
 0x319   : > { %v1888_v23 = vpop.f32.mrf.mxu1  ;;  %v1917_v43 = vpop.f32.mrf.mxu2 }
 0x31a   : > { %v1953_v44 = vpack.c.bf16 %v1944_v41, %v1941_v40  ;;  %v1889_v11 = vadd.f32 %v1888_v23, %v1860_v49  ;;  %v1918_v58 = vadd.f32 %v1917_v43, %v1833_v29 }
 0x31b   : > { %v1862_v48 = vpop.f32.mrf.mxu0 }
 0x31c   : > { %2181 = vmatmul.bf16.vlgmr.msrb.gmra.mxu1 %v1953_v44  ;;  %2219 = vmatmul.bf16.vlgmr.msrb.gmra.mxu3 %v1953_v44  ;;  %v1863_v51 = vadd.f32 %v1862_v48, %v4419_v17  ;;  %v2255_v17 = vld [vmem:[%s4619_s13 + $0x88] sm:$0xff] }
 0x31d   : > { %2317 = vmatpush.msra.mxu1 %v2255_v17  ;;  %3523 = vmatpush.msra.mxu3 %v2255_v17 }
 0x31f   : > { %v1946_v52 = vpop.f32.mrf.mxu3  ;;  %2318 = vmatpush.msra.mxu1 %v2254_v22  ;;  %3524 = vmatpush.msra.mxu3 %v2254_v22 }
 0x320   : > { %v1947_v62 = vadd.f32 %v1946_v52, %v1918_v58 }
 0x321   : > { %v1891_v54 = vpop.f32.mrf.mxu1  ;;  %v1920_v56 = vpop.f32.mrf.mxu2 }
 0x322   : > { %v1892_v55 = vadd.f32 %v1891_v54, %v1863_v51  ;;  %v1921_v59 = vadd.f32 %v1920_v56, %v1833_v29 }
 0x324   : > { %v1954_v57 = vpack.c.bf16 %v1892_v55, %v1889_v11 }
 0x326   : > { %2167 = vmatmul.bf16.gmra.mxu0 %v1954_v57  ;;  %2205 = vmatmul.bf16.gmra.mxu2 %v1954_v57 }
 0x327   : > { %v1949_v61 = vpop.f32.mrf.mxu3 }
 0x328   : > { %v1950_v0 = vadd.f32 %v1949_v61, %v1921_v59  ;;  %v3668_v59 = vld [vmem:[%s4646_s19] ss:$0 sm:$0xff]  ;;  %v2332_v61 = vlaneseq }
 0x32a   : > { %v1955_v1 = vpack.c.bf16 %v1950_v0, %v1947_v62  ;;  %v2333_v2 = vand.u32 127, %v2332_v61 }
 0x32c   : > { %2186 = vmatmul.bf16.gmra.mxu1 %v1955_v1  ;;  %2224 = vmatmul.bf16.gmra.mxu3 %v1955_v1  ;;  %vm2334_vm2 = vcmp.ge.s32.totalorder %v2333_v2, 7  ;;  %vm2335_vm3 = vcmp.lt.s32.totalorder %v2333_v2, 10 }
 0x32d   : > { %vm4528_vm4 = vmand %vm2334_vm2, %vm2335_vm3 }
 0x393   : > { %v2163_v12 = vpop.f32.mrf.mxu0 }
 0x394   : > { %v2164_v20 = vadd.f32 %v2163_v12, %v1990_v18 }
 0x399   : > { %v2182_v21 = vpop.f32.mrf.mxu1  ;;  %v2201_v60 = vpop.f32.mrf.mxu2 }
 0x39a   : > { %v2183_v24 = vadd.f32 %v2182_v21, %v2164_v20  ;;  %v2202_v27 = vadd.f32 %v2201_v60, %v1991_v25 }
 0x39b   : > { %v2165_v47 = vpop.f32.mrf.mxu0 }
 0x39c   : > { %v2230_v26 = vmax.f32 %v2183_v24, 0.0  ;;  %v2166_v28 = vadd.f32 %v2165_v47, %v1990_v18 }
 0x39e   : > { %2290 = vmatmul.f32.vlgmr.msra.gmra.mxu0 %v2230_v26 }
 0x39f   : > { %v2220_v9 = vpop.f32.mrf.mxu3 }
 0x3a0   : > { %v2221_v29 = vadd.f32 %v2220_v9, %v2202_v27 }
 0x3a1   : > { %v2184_v30 = vpop.f32.mrf.mxu1  ;;  %v2203_v31 = vpop.f32.mrf.mxu2 }
 0x3a2   : > { %v2231_v32 = vmax.f32 %v2221_v29, 0.0  ;;  %v2185_v33 = vadd.f32 %v2184_v30, %v2166_v28  ;;  %v2204_v36 = vadd.f32 %v2203_v31, %v1991_v25 }
 0x3a3   : > { %v2168_v34 = vpop.f32.mrf.mxu0 }
 0x3a4   : > { %v2232_v35 = vmax.f32 %v2185_v33, 0.0  ;;  %2319 = vmatmul.f32.vlgmr.msra.gmra.mxu1 %v2231_v32  ;;  %v2169_v37 = vadd.f32 %v2168_v34, %v1990_v18 }
 0x3a6   : > { %2293 = vmatmul.f32.gmra.mxu0 %v2232_v35 }
 0x3a7   : > { %v2222_v13 = vpop.f32.mrf.mxu3 }
 0x3a8   : > { %v2223_v38 = vadd.f32 %v2222_v13, %v2204_v36 }
 0x3a9   : > { %v2187_v39 = vpop.f32.mrf.mxu1  ;;  %v2206_v40 = vpop.f32.mrf.mxu2 }
 0x3aa   : > { %v2233_v41 = vmax.f32 %v2223_v38, 0.0  ;;  %v2188_v8 = vadd.f32 %v2187_v39, %v2169_v37  ;;  %v2207_v43 = vadd.f32 %v2206_v40, %v1991_v25 }
 0x3ab   : > { %v2170_v23 = vpop.f32.mrf.mxu0 }
 0x3ac   : > { %v2234_v42 = vmax.f32 %v2188_v8, 0.0  ;;  %2322 = vmatmul.f32.gmra.mxu1 %v2233_v41  ;;  %v2171_v45 = vadd.f32 %v2170_v23, %v1990_v18 }
 0x3ae   : > { %2296 = vmatmul.f32.vlgmr.msra.gmra.mxu2 %v2234_v42 }
 0x3af   : > { %v2225_v44 = vpop.f32.mrf.mxu3 }
 0x3b0   : > { %v2226_v46 = vadd.f32 %v2225_v44, %v2207_v43 }
 0x3b1   : > { %v2189_v48 = vpop.f32.mrf.mxu1  ;;  %v2208_v51 = vpop.f32.mrf.mxu2 }
 0x3b2   : > { %v2235_v52 = vmax.f32 %v2226_v46, 0.0  ;;  %v2190_v49 = vadd.f32 %v2189_v48, %v2171_v45  ;;  %v2209_v11 = vadd.f32 %v2208_v51, %v1991_v25 }
 0x3b4   : > { %v2236_v54 = vmax.f32 %v2190_v49, 0.0  ;;  %2325 = vmatmul.f32.vlgmr.msra.gmra.mxu3 %v2235_v52 }
 0x3b6   : > { %2299 = vmatmul.f32.gmra.mxu2 %v2236_v54 }
 0x3b7   : > { %v2227_v55 = vpop.f32.mrf.mxu3 }
 0x3b8   : > { %v2228_v56 = vadd.f32 %v2227_v55, %v2209_v11 }
 0x3ba   : > { %v2237_v57 = vmax.f32 %v2228_v56, 0.0 }
 0x3bc   : > { %2328 = vmatmul.f32.gmra.mxu3 %v2237_v57 }
 0x41b   : > { %v2291_v58 = vpop.f32.mrf.mxu0 }
 0x41c   : > { %v2292_v62 = vadd.f32 %v3668_v59, %v2291_v58 }
 0x421   : > { %v2320_v0 = vpop.f32.mrf.mxu1 }
 0x422   : > { %v2321_v1 = vadd.f32 %v2320_v0, %v2292_v62 }
 0x423   : > { %v2294_v15 = vpop.f32.mrf.mxu0 }
 0x424   : > { %3669 = vtanh.f32 %v2321_v1  ;;  %v2295_v3 = vadd.f32 %v3668_v59, %v2294_v15 }
 0x429   : > { %v2323_v19 = vpop.f32.mrf.mxu1 }
 0x42a   : > { %v3670_v16 = vpop.eup %3669  ;;  %v2324_v5 = vadd.f32 %v2323_v19, %v2295_v3 }
 0x42b   : > { %v2341_v6 = vmul.f32 0.6931472, %v3670_v16 }
 0x42c   : > { %3671 = vtanh.f32 %v2324_v5 }
 0x42d   : > { %v2345_v53 = vsel %vm4528_vm4, %v2341_v6, %v2321_v1 }
 0x42e   : > { %2350 = vst.msk [vmem:[%s4534_s16] sm:$0xff] %vm2349_vm5, %v2345_v53 }
 0x431   : > { %v2297_v7 = vpop.f32.mrf.mxu2 }
 0x432   : > { %v3672_v10 = vpop.eup %3671  ;;  %v2298_v17 = vadd.f32 %v3668_v59, %v2297_v7 }
 0x433   : > { %v2342_v50 = vmul.f32 0.6931472, %v3672_v10 }
 0x435   : > { %v2346_v14 = vsel %vm4528_vm4, %v2342_v50, %v2324_v5 }
 0x436   : > { %2351 = vst.msk [vmem:[%s4534_s16 + $0x8] sm:$0xff] %vm2349_vm5, %v2346_v14 }
 0x437   : > { %v2326_v22 = vpop.f32.mrf.mxu3 }
 0x438   : > { %v2327_v63 = vadd.f32 %v2326_v22, %v2298_v17 }
 0x439   : > { %v2300_v12 = vpop.f32.mrf.mxu2 }
 0x43a   : > { %3673 = vtanh.f32 %v2327_v63  ;;  %v2301_v18 = vadd.f32 %v3668_v59, %v2300_v12 }
 0x43f   : > { %v2329_v20 = vpop.f32.mrf.mxu3 }
 0x440   : > { %v3674_v21 = vpop.eup %3673  ;;  %v2330_v60 = vadd.f32 %v2329_v20, %v2301_v18 }
 0x441   : > { %v2343_v24 = vmul.f32 0.6931472, %v3674_v21 }
 0x442   : > { %3675 = vtanh.f32 %v2330_v60 }
 0x443   : > { %v2347_v25 = vsel %vm4528_vm4, %v2343_v24, %v2327_v63 }
 0x444   : > { %2352 = vst.msk [vmem:[%s4534_s16 + $0x10] sm:$0xff] %vm2349_vm5, %v2347_v25 }
 0x448   : > { %v3676_v47 = vpop.eup %3675  ;;  %2360 = sbr.rel (!%p4041_p4) target bundleno = 1140 (0x474), region = 104 }
 0x449   : > { %v2344_v26 = vmul.f32 0.6931472, %v3676_v47 }
 0x44b   : > { %v2348_v27 = vsel %vm4528_vm4, %v2344_v26, %v2330_v60 }
 0x44c   : > { %2353 = vst.msk [vmem:[%s4534_s16 + $0x18] sm:$0xff] %vm2349_vm5, %v2348_v27 }
 0x44d   : > { %s4658_s14 = smov (!%p2363_p11, %s2362_s14), 4 }
 0x44e   : > { %s3315_s28 = sshll.u32 %s4658_s14, 3 }
 0x44f   : > { %p3318_p12 = scmp.eq.s32.totalorder %s3315_s28, 0 }
 0x450   : > { %s4563_s29 = sshrl.u32 (!%p3318_p12), %s4658_s14, 2 }
 0x451   : > { %2371 = sbr.rel (%p3318_p12) target bundleno = 1140 (0x474), region = 108  ;;  %p3319_p13 = scmp.le.s32.totalorder (!%p3318_p12), %s4563_s29, 0 }
 0x456   : > { %2543 = sbr.rel (%p3319_p13) target bundleno = 1123 (0x463), region = 185  ;;  %s4651_s21 = smov (!%p3319_p13), %s4557_s23 }
 0x457   : > { %s4652_s1 = smov (!%p3319_p13), %s4534_s16  ;;  %s4572_s20 = smov (!%p3319_p13), 0  }
 0x458   : > { %s3907_s24 = smov (!%p3319_p13), 0  }
 0x45b LB: >> { %v2440_v9 = vld [vmem:[%s3901_s1] sm:$0xff]  ;;  %v2442_v28 = vld [vmem:[%s3901_s1 + $0x8] sm:$0xff]  ;;  %v2444_v29 = vld [vmem:[%s3901_s1 + $0x10] sm:$0xff]  ;;  %s2448_s30 = sadd.s32 1, %s3905_s20  ;;  %s2434_s24 = sadd.s32 1, %s3909_s24   ;;  %s3909_s24 = sphi %s3907_s24, %s2434_s24   ;;  %s3905_s20 = sphi %s4572_s20, %s4653_s20   ;;  %s3901_s1 = sphi %s4652_s1, %s2453_s1   ;;  %s3897_s21 = sphi %s4651_s21, %s2454_s21  }
 0x45c   : >> { %2441 = vst [vmem:[%s3897_s21] sm:$0xff] %v2440_v9  ;;  %v2446_v30 = vld [vmem:[%s3901_s1 + $0x18] sm:$0xff]  ;;  %p2449_p0 = scmp.ge.s32.totalorder %s2448_s30, %s4563_s29  ;;  %p2433_p1 = scmp.ge.s32.totalorder %s2434_s24, %s4563_s29 }
 0x45d   : >> { %2443 = vst [vmem:[%s3897_s21 + $0x8] sm:$0xff] %v2442_v28 }
 0x45e   : >> { %2445 = vst [vmem:[%s3897_s21 + $0x10] sm:$0xff] %v2444_v29  ;;  %s4660_s30 = smov (%p2449_p0, %s2448_s30), 0  ;;  %2436 = sbr.rel (!%p2433_p1) target bundleno = 1115 (0x45b), region = 191 }
 0x45f   : >> { %2447 = vst [vmem:[%s3897_s21 + $0x18] sm:$0xff] %v2446_v30  ;;  %s3320_s17 = sshll.u32 %s4660_s30, 5  ;;  %s4653_s20 = smov %s4660_s30 }
 0x460   : >> { %s2453_s1 = scalar_lea.vmem %s4534_s16, %s3320_s17 [#allocation10]   ;;  %s2454_s21 = scalar_lea.vmem %s4557_s23, %s3320_s17  }
 0x463 PF: > { %s4588_s3 = sand.u32 3, %s4658_s14   ;;  %s3491_s19 = sshll.u32 %s4563_s29, 5 }
 0x464   : > { %s2459_s22 = scalar_lea.vmem %s4534_s16, %s3491_s19 [#allocation10]   ;;  %s2461_s25 = scalar_lea.vmem %s4557_s23, %s3491_s19  }
 0x465   : > { %p3325_p2 = scmp.le.s32.totalorder %s4588_s3, 0 }
 0x466   : > { %s3911_s7 = smov (!%p3325_p2), %s2461_s25   ;;  %s3915_s15 = smov (!%p3325_p2), %s2459_s22  }
 0x467   : > { %2557 = sbr.rel (%p3325_p2) target bundleno = 1140 (0x474), region = 196  ;;  %s3919_s18 = smov (!%p3325_p2), 0  }
 0x468   : > { %s3923_s26 = smov (!%p3325_p2), 0  }
 0x46c LB: >> { %v2471_v31 = vld [vmem:[%s3917_s15] sm:$0xff]  ;;  %s2473_s14 = sadd.s32 1, %s3921_s18  ;;  %s2465_s26 = sadd.s32 1, %s3925_s26   ;;  %s3925_s26 = sphi %s3923_s26, %s2465_s26   ;;  %s3921_s18 = sphi %s3919_s18, %s3920_s18   ;;  %s3917_s15 = sphi %s3915_s15, %s2478_s15   ;;  %s3913_s7 = sphi %s3911_s7, %s2479_s7  }
 0x46d   : >> { %2472 = vst [vmem:[%s3913_s7] sm:$0xff] %v2471_v31  ;;  %p2474_p3 = scmp.ge.s32.totalorder %s2473_s14, %s4588_s3  ;;  %p2464_p4 = scmp.ge.s32.totalorder %s2465_s26, %s4588_s3 }
 0x46f   : >> { %s4662_s14 = smov (%p2474_p3, %s2473_s14), 0  ;;  %2467 = sbr.rel (!%p2464_p4) target bundleno = 1132 (0x46c), region = 202 }
 0x470   : >> { %s3326_s16 = sshll.u32 %s4662_s14, 3  ;;  %s3920_s18 = smov %s4662_s14  }
 0x471   : >> { %s2478_s15 = scalar_lea.vmem %s2459_s22, %s3326_s16 [#allocation10]   ;;  %s2479_s7 = scalar_lea.vmem %s2461_s25, %s3326_s16  }
 0x474 PF: > { %s4654_s20 = sld [smem:[#allocation16_spill]] }
 0x475   : > { %s4655_s18 = sld [smem:[#allocation15_spill]] }
 0x476   : > { %s4656_s19 = sld [smem:[#allocation17_spill]] }
 0x47a   : > { %p25_p5 = scmp.ge.s32.totalorder %s4654_s20, 9  }
 0x47c   :  { %27 = sbr.rel (!%p25_p5) target bundleno = 10 (0xa), region = 213 }
 0x481   :  { %2495 = vsyncpa [#allocation3], 1 }
 0x482   :  { %2497 = vsyncpa [#allocation3 + $0x1], 1 }
 0x483   :  { %2498 = vsyncpa [#allocation5], 1 }
 0x484   :  { %2499 = vsyncpa [#allocation8], 1 }

// kernel: tpu_custom_call.1
= control target key start
LH: loop header
LB: loop body
LE: loop exit
PB: predicated region body
PF: predicated region fallthrough
CT: control target
= control target key end

     0   :  { %s4606_s0 = inlined_call_operand.vmem [shape: f32[200,37], index: 0, kind: input, shape index: {}]   ;;  %s4607_s1 = inlined_call_operand.hbm [shape: bf16[128,512], index: 1, kind: input, shape index: {}]   ;;  %s4608_s2 = inlined_call_operand.vmem [shape: f32[1,256], index: 2, kind: input, shape index: {}]   ;;  %s4609_s3 = inlined_call_operand.hbm [shape: bf16[256,256], index: 3, kind: input, shape index: {}]   ;;  %s4610_s4 = inlined_call_operand.vmem [shape: f32[1,256], index: 4, kind: input, shape index: {}]   ;;  %s4611_s5 = inlined_call_operand.hbm [shape: bf16[256,256], index: 5, kind: input, shape index: {}]   ;;  %s4612_s6 = inlined_call_operand.vmem [shape: f32[1,256], index: 6, kind: input, shape index: {}]   ;;  %s4613_s7 = inlined_call_operand.hbm [shape: bf16[256,256], index: 7, kind: input, shape index: {}]   ;;  %s4614_s8 = inlined_call_operand.vmem [shape: f32[1,256], index: 8, kind: input, shape index: {}]   ;;  %s4615_s9 = inlined_call_operand.vmem [shape: f32[256,256], index: 9, kind: input, shape index: {}]   ;;  %s4616_s10 = inlined_call_operand.vmem [shape: f32[1,256], index: 10, kind: input, shape index: {}]   ;;  %s4617_s11 = inlined_call_operand.hbm [shape: bf16[256,256], index: 11, kind: input, shape index: {}]   ;;  %s4618_s12 = inlined_call_operand.vmem [shape: f32[1,256], index: 12, kind: input, shape index: {}]   ;;  %s4619_s13 = inlined_call_operand.vmem [shape: f32[256,16], index: 13, kind: input, shape index: {}]   ;;  %s4620_s14 = inlined_call_operand.vmem [shape: f32[1,16], index: 14, kind: input, shape index: {}]   ;;  %s4621_s15 = inlined_call_operand.vmem [shape: f32[200,16], index: 15, kind: output, shape index: {}]  }
   0x1   :  { %4627 = sst [smem:[#allocation19_spill]] %s4607_s1 }
   0x2   :  { %4628 = sst [smem:[#allocation20_spill]] %s4609_s3 }
   0x3   :  { %4629 = sst [smem:[#allocation21_spill]] %s4613_s7 }
   0x4   :  { %4630 = sst [smem:[#allocation22_spill]] %s4620_s14 }
   0x5   :  { %4631 = sst [smem:[#allocation23_spill]] %s4621_s15 }
   0x6   :  { %20 = vsyncpa [#allocation3], 0 }
   0x7   :  { %21 = vsyncpa [#allocation5], 0 }
   0x8   :  { %22 = vsyncpa [#allocation8], 0  ;;  %s4016_s18 = smov 0   ;;  %s4018_s19 = smov 0  }
   0x9   :  { %s4020_s20 = smov 0  }
   0xa LB: > { %4632 = sst [smem:[#allocation14_spill]] %s3885_s18  ;;  %s4029_s21 = sadd.s32 4294967295, %s3893_s20   ;;  %s3893_s20 = sphi %s4020_s20, %s4654_s20   ;;  %s3889_s19 = sphi %s4018_s19, %s4656_s19   ;;  %s3885_s18 = sphi %s4016_s18, %s4655_s18  }
   0xb   : > { %4633 = sst [smem:[#allocation15_spill]] %s3889_s19  ;;  %s4031_s22 = sadd.s32 1, %s3893_s20  }
   0xc   : > { %4634 = sst [smem:[#allocation16_spill]] %s4031_s22  ;;  %s352_s23 = ssub.s32 %s3893_s20, %s4031_s22 }
   0xd   : > { %s355_s24 = sadd.s32 1, %s3889_s19  ;;  %p353_p0 = scmp.eq.s32.totalorder %s352_s23, 0 }
   0xe   : > { %p365_p1 = scmp.ne.s32.totalorder %s3889_s19, %s3885_s18  ;;  %p366_p2 = scmp.eq.s32.totalorder %s4029_s21, 6 }
   0xf   : > { %p2633_p3 = scmp.ge.s32.totalorder %s3893_s20, 1  ;;  %p379_p5 = scmp.lt.s32.totalorder %s3893_s20, 8 }
  0x10   : > { %s4039_s25 = scalar_select %p353_p0, %s3889_s19, %s355_s24  }
  0x11   : > { %p4041_p4 = por %p366_p2, %p365_p1  ;;  %p3561_p6 = scmp.eq.s32.totalorder %s4029_s21, 0 }
  0x12   : > { %4635 = sst [smem:[#allocation17_spill]] %s4039_s25  ;;  %p4046_p7 = pnand %p2633_p3, %p379_p5 }
  0x13   : > { %s4636_s26 = scalar_select %p4041_p4, 1, 0 }
  0x14   : > { %s4639_s3 = sld [smem:[#allocation20_spill]]  ;;  %p3545_p8 = pneg %p4046_p7 }
  0x15   : > { %4637 = sst [smem:[#allocation18_spill]] %s4636_s26  ;;  %s3927_s16 = smov [#allocation4]  }
  0x16   : > { %s409_s17 = sshll.u32 %s3927_s16, 4  ;;  %p4057_p9 = pnand %p3561_p6, %p3545_p8  ;;  %s410_s17 = int_to_ptr.vmem [resolvable:$true] %s409_s17 }
  0x17   : > { %s4641_s7 = sld [smem:[#allocation21_spill]]  ;;  %s3928_s28 = smov 128  }
  0x18   : > { %s3929_s29 = smov 8   ;;  %s4642_s1 = sld [smem:[#allocation19_spill]] }
  0x19   : > { %s3931_s20 = smov [#allocation2]   ;;  %s424_s14 = sshll.u32 %s4611_s5, 4  ;;  %s425_s14 = int_to_ptr.hbm [resolvable:$true] %s424_s14 }
  0x1a   : > { %s407_s30 = sshll.u32 %s4639_s3, 4  ;;  %s3930_s3 = smov [#allocation7]   ;;  %s408_s30 = int_to_ptr.hbm [resolvable:$true] %s407_s30 }
  0x1b   : > { %3551 = dma.hbm_to_vmem [thread:$0]  (!%p4057_p9), %s408_s30, 4096, %s410_s17, [#allocation5], %s3928_s28, %s3928_s28, %s3929_s29  }
  0x1c   : > { %s443_s16 = sshll.u32 %s3930_s3, 4  ;;  %s392_s24 = sshll.u32 %s3931_s20, 4  ;;  %s444_s16 = int_to_ptr.vmem [resolvable:$true] %s443_s16  ;;  %s393_s24 = int_to_ptr.vmem [resolvable:$true] %s392_s24 }
  0x1d   : > { %s441_s25 = sshll.u32 %s4641_s7, 4  ;;  %s3932_s30 = smov 256   ;;  %s442_s25 = int_to_ptr.hbm [resolvable:$true] %s441_s25 }
  0x1e   : > { %s390_s15 = sshll.u32 %s4642_s1, 4  ;;  %s3933_s17 = smov 16   ;;  %s391_s15 = int_to_ptr.hbm [resolvable:$true] %s390_s15 }
  0x1f   : > { %3557 = dma.hbm_to_vmem [thread:$0]  (!%p4057_p9), %s442_s25, 4096, %s444_s16, [#allocation8], %s3928_s28, %s3928_s28, %s3929_s29  }
  0x20   : > { %3548 = dma.hbm_to_vmem [thread:$0]  (!%p4057_p9), %s391_s15, 4096, %s393_s24, [#allocation3], %s3932_s30, %s3932_s30, %s3933_s17  }
  0x21   : > { %s3934_s3 = smov [#allocation6]   ;;  %s464_s18 = sshll.u32 %s4617_s11, 4  ;;  %s465_s18 = int_to_ptr.hbm [resolvable:$true] %s464_s18 }
  0x22   : > { %s426_s19 = sshll.u32 %s3934_s3, 4  ;;  %s3935_s25 = smov [#allocation9]   ;;  %s427_s19 = int_to_ptr.vmem [resolvable:$true] %s426_s19 }
  0x23   : > { %3554 = dma.hbm_to_vmem [thread:$0]  (!%p4057_p9), %s425_s14, 4096, %s427_s19, [#allocation5], %s3928_s28, %s3928_s28, %s3929_s29  }
  0x24   : > { %s466_s16 = sshll.u32 %s3935_s25, 4  ;;  %508 = sbr.rel (%p4046_p7) target bundleno = 1140 (0x474), region = 80  ;;  %s467_s16 = int_to_ptr.vmem [resolvable:$true] %s466_s16 }
  0x25   : > { %3560 = dma.hbm_to_vmem [thread:$0]  (!%p4057_p9), %s465_s18, 4096, %s467_s16, [#allocation8], %s3928_s28, %s3928_s28, %s3929_s29  }
  0x29   : > { %3872 = dma.done.wait (%p3561_p6), [#allocation3], 4096  }
  0x2a   : > { %3874 = vsyncadd (%p3561_p6), [#allocation3], 4294963200 }
  0x2b   : > { %3876 = dma.done.wait (%p3561_p6), [#allocation5], 8192  }
  0x2c   : > { %3878 = vsyncadd (%p3561_p6), [#allocation5], 4294959104 }
  0x2d   : > { %3880 = dma.done.wait (%p3561_p6), [#allocation8], 8192  }
  0x2e   : > { %3882 = vsyncadd (%p3561_p6), [#allocation8], 4294959104  ;;  %v2763_v0 = vld [vmem:[#allocation2 + $0xe0] sm:$0xf]  ;;  %v3360_v1 = vld [vmem:[#allocation2 + $0xec] sm:$0xf0] }
  0x2f   : > { %v3358_v2 = vld [vmem:[#allocation2 + $0xe4] sm:$0xf]  ;;  %v2764_v3 = vor.u32 %v3360_v1, %v2763_v0  ;;  %v2765_v4 = vld [vmem:[#allocation2 + $0xf0] sm:$0xf0]  ;;  %v2747_v5 = vld [vmem:[#allocation2 + $0xc0] sm:$0xf] }
  0x30   : > { %v3356_v6 = vld [vmem:[#allocation2 + $0xcc] sm:$0xf0]  ;;  %v2768_v7 = vor.u32 %v3358_v2, %v2765_v4  ;;  %v3354_v8 = vld [vmem:[#allocation2 + $0xc4] sm:$0xf]  ;;  %v2749_v9 = vld [vmem:[#allocation2 + $0xd0] sm:$0xf0] }
  0x31   : > { %802 = vmatpush.bf16.msra.mxu0 %v2764_v3  ;;  %v2748_v10 = vor.u32 %v3356_v6, %v2747_v5  ;;  %v2752_v11 = vor.u32 %v3354_v8, %v2749_v9  ;;  %v2731_v12 = vld [vmem:[#allocation2 + $0xa0] sm:$0xf]  ;;  %v3352_v13 = vld [vmem:[#allocation2 + $0xac] sm:$0xf0]  ;;  %v3350_v14 = vld [vmem:[#allocation2 + $0xa4] sm:$0xf] }
  0x32   : > { %821 = vmatpush.bf16.msra.mxu1 %v2768_v7  ;;  %v2733_v15 = vld [vmem:[#allocation2 + $0xb0] sm:$0xf0]  ;;  %v2732_v16 = vor.u32 %v3352_v13, %v2731_v12  ;;  %s4098_s1 = sshll.u32 %s4029_s21, 2  ;;  %v2715_v18 = vld [vmem:[#allocation2 + $0x80] sm:$0xf]  ;;  %vm603_vm0 = vcmask 302080  }
  0x33   : > { %v2736_v17 = vor.u32 %v3350_v14, %v2733_v15  ;;  %v3348_v19 = vld [vmem:[#allocation2 + $0x8c] sm:$0xf0]  ;;  %v3346_v20 = vld [vmem:[#allocation2 + $0x84] sm:$0xf]  ;;  %v2717_v21 = vld [vmem:[#allocation2 + $0x90] sm:$0xf0] }
  0x34   : > { %p585_p10 = scmp.lt.s32.totalorder %s4098_s1, 24  ;;  %v2716_v22 = vor.u32 %v3348_v19, %v2715_v18  ;;  %v2720_v23 = vor.u32 %v3346_v20, %v2717_v21  ;;  %v2699_v24 = vld [vmem:[#allocation2 + $0x60] sm:$0xf]  ;;  %v3344_v25 = vld [vmem:[#allocation2 + $0x6c] sm:$0xf0]  ;;  %vm4112_vm1 = vmpackc.low %vm603_vm0, %vm603_vm0  ;;  %s4645_s30 = sld [smem:[#allocation14_spill]] }
  0x35   : > { %803 = vmatpush.bf16.msra.mxu0 %v2748_v10  ;;  %v3342_v26 = vld [vmem:[#allocation2 + $0x64] sm:$0xf]  ;;  %v2701_v27 = vld [vmem:[#allocation2 + $0x70] sm:$0xf0]  ;;  %v2700_v28 = vor.u32 %v3344_v25, %v2699_v24  ;;  %v2683_v30 = vld [vmem:[#allocation2 + $0x40] sm:$0xf] }
  0x36   : > { %822 = vmatpush.bf16.msra.mxu1 %v2752_v11  ;;  %s4102_s7 = scalar_select %p585_p10, %s4098_s1, 24  ;;  %v2704_v29 = vor.u32 %v3342_v26, %v2701_v27  ;;  %v3340_v31 = vld [vmem:[#allocation2 + $0x4c] sm:$0xf0]  ;;  %v3338_v32 = vld [vmem:[#allocation2 + $0x44] sm:$0xf]  ;;  %vm2349_vm5 = vcmask 130048  }
  0x37   : > { %v2685_v33 = vld [vmem:[#allocation2 + $0x50] sm:$0xf0]  ;;  %v2667_v34 = vld [vmem:[#allocation2 + $0x20] sm:$0xf]  ;;  %v3336_v35 = vld [vmem:[#allocation2 + $0x2c] sm:$0xf0]  ;;  %v2684_v36 = vor.u32 %v3340_v31, %v2683_v30 }
  0x38   : > { %s2648_s14 = sshll.u32 %s4102_s7, 3  ;;  %v3334_v37 = vld [vmem:[#allocation2 + $0x24] sm:$0xf]  ;;  %v2771_v38 = vld [vmem:[#allocation2 + $0xe8] sm:$0xf]  ;;  %v2688_v41 = vor.u32 %v3338_v32, %v2685_v33  ;;  %v2668_v51 = vor.u32 %v3336_v35, %v2667_v34  ;;  %s4646_s19 = sld [smem:[#allocation22_spill]] }
  0x39   : > { %804 = vmatpush.bf16.msra.mxu0 %v2732_v16  ;;  %v3361_v39 = vld [vmem:[#allocation2 + $0xf4] sm:$0xf0]  ;;  %v3359_v40 = vld [vmem:[#allocation2 + $0xec] sm:$0xf]  ;;  %v2773_v43 = vld [vmem:[#allocation2 + $0xf8] sm:$0xf0]  ;;  %s4108_s26 = scalar_lea.vmem %s4606_s0, %s2648_s14 }
  0x3a   : > { %823 = vmatpush.bf16.msra.mxu1 %v2736_v17  ;;  %v2772_v42 = vor.u32 %v3361_v39, %v2771_v38  ;;  %v2755_v44 = vld [vmem:[#allocation2 + $0xc8] sm:$0xf]  ;;  %v3357_v45 = vld [vmem:[#allocation2 + $0xd4] sm:$0xf0]  ;;  %v2669_v46 = vld [vmem:[#allocation2 + $0x30] sm:$0xf0]  ;;  %v2776_v47 = vor.u32 %v3359_v40, %v2773_v43 }
  0x3b   : > { %v3355_v48 = vld [vmem:[#allocation2 + $0xcc] sm:$0xf]  ;;  %v2757_v49 = vld [vmem:[#allocation2 + $0xd8] sm:$0xf0]  ;;  %v2756_v50 = vor.u32 %v3357_v45, %v2755_v44  ;;  %v2651_v52 = vld [vmem:[#allocation2] sm:$0xf]  ;;  %v2672_v56 = vor.u32 %v3334_v37, %v2669_v46 }
  0x3c   : > { %840 = vmatpush.bf16.msra.mxu2 %v2772_v42  ;;  %859 = vmatpush.bf16.msra.mxu3 %v2776_v47  ;;  %v2760_v53 = vor.u32 %v3355_v48, %v2757_v49  ;;  %v2739_v54 = vld [vmem:[#allocation2 + $0xa8] sm:$0xf]  ;;  %v3353_v55 = vld [vmem:[#allocation2 + $0xb4] sm:$0xf0]  ;;  %v3332_v57 = vld [vmem:[#allocation2 + $0xc] sm:$0xf0] }
  0x3d   : > { %805 = vmatpush.bf16.msra.mxu0 %v2716_v22  ;;  %v3351_v58 = vld [vmem:[#allocation2 + $0xac] sm:$0xf]  ;;  %v2741_v59 = vld [vmem:[#allocation2 + $0xb8] sm:$0xf0]  ;;  %v3330_v60 = vld [vmem:[#allocation2 + $0x4] sm:$0xf]  ;;  %v2740_v63 = vor.u32 %v3353_v55, %v2739_v54  ;;  %v2652_v0 = vor.u32 %v3332_v57, %v2651_v52 }
  0x3e   : > { %824 = vmatpush.bf16.msra.mxu1 %v2720_v23  ;;  %v2653_v61 = vld [vmem:[#allocation2 + $0x10] sm:$0xf0]  ;;  %v599_v62 = vld [vmem:[%s4108_s26] sm:$0xff]  ;;  %v600_v1 = vld [vmem:[%s4108_s26 + $0x8] sm:$0xff]  ;;  %v2744_v2 = vor.u32 %v3351_v58, %v2741_v59  ;;  %s577_s22 = sand.u32 1, %s4645_s30   ;;  %s2362_s14 = ssub.s32 (%p4041_p4), 25, %s4098_s1 }
  0x3f   : > { %v2723_v3 = vld [vmem:[#allocation2 + $0x88] sm:$0xf]  ;;  %v3349_v4 = vld [vmem:[#allocation2 + $0x94] sm:$0xf0]  ;;  %v2656_v5 = vor.u32 %v3330_v60, %v2653_v61  ;;  %v3347_v6 = vld [vmem:[#allocation2 + $0x8c] sm:$0xf]  ;;  %v4116_v9 = vpack.c.bf16 %v600_v1, %v599_v62 }
  0x40   : > { %841 = vmatpush.bf16.msra.mxu2 %v2756_v50  ;;  %860 = vmatpush.bf16.msra.mxu3 %v2760_v53  ;;  %v2725_v7 = vld [vmem:[#allocation2 + $0x98] sm:$0xf0]  ;;  %v2724_v10 = vor.u32 %v3349_v4, %v2723_v3  ;;  %v2707_v11 = vld [vmem:[#allocation2 + $0x68] sm:$0xf]  ;;  %v2859_v12 = vld [vmem:[#allocation4 + $0x70] sm:$0xf] }
  0x41   : > { %806 = vmatpush.bf16.msra.mxu0 %v2700_v28  ;;  %v3377_v13 = vld [vmem:[#allocation4 + $0x74] sm:$0xf0]  ;;  %v2728_v14 = vor.u32 %v3347_v6, %v2725_v7  ;;  %v2923_v17 = vld [vmem:[#allocation4 + $0xf0] sm:$0xf]  ;;  %v3343_v19 = vld [vmem:[#allocation2 + $0x6c] sm:$0xf] }
  0x42   : > { %825 = vmatpush.bf16.msra.mxu1 %v2704_v29  ;;  %v3345_v15 = vld [vmem:[#allocation2 + $0x74] sm:$0xf0]  ;;  %v2860_v16 = vor.u32 %v3377_v13, %v2859_v12  ;;  %v2709_v20 = vld [vmem:[#allocation2 + $0x78] sm:$0xf0]  ;;  %v2851_v22 = vld [vmem:[#allocation4 + $0x60] sm:$0xf] }
  0x43   : > { %v3393_v18 = vld [vmem:[#allocation4 + $0xf4] sm:$0xf0]  ;;  %v3375_v23 = vld [vmem:[#allocation4 + $0x64] sm:$0xf0]  ;;  %v2915_v24 = vld [vmem:[#allocation4 + $0xe0] sm:$0xf]  ;;  %v2708_v25 = vor.u32 %v3345_v15, %v2707_v11  ;;  %v2712_v28 = vor.u32 %v3343_v19, %v2709_v20 }
  0x44   : > { %842 = vmatpush.bf16.msra.mxu2 %v2740_v63  ;;  %861 = vmatpush.bf16.msra.mxu3 %v2744_v2  ;;  %v2924_v21 = vor.u32 %v3393_v18, %v2923_v17  ;;  %v2852_v26 = vor.u32 %v3375_v23, %v2851_v22  ;;  %v3391_v27 = vld [vmem:[#allocation4 + $0xe4] sm:$0xf0]  ;;  %v3341_v30 = vld [vmem:[#allocation2 + $0x54] sm:$0xf0]  ;;  %v3339_v31 = vld [vmem:[#allocation2 + $0x4c] sm:$0xf] }
  0x45   : > { %807 = vmatpush.bf16.msra.mxu0 %v2684_v36  ;;  %v2691_v29 = vld [vmem:[#allocation2 + $0x48] sm:$0xf]  ;;  %v2693_v32 = vld [vmem:[#allocation2 + $0x58] sm:$0xf0]  ;;  %v2916_v33 = vor.u32 %v3391_v27, %v2915_v24  ;;  %v2843_v34 = vld [vmem:[#allocation4 + $0x50] sm:$0xf] }
  0x46   : > { %826 = vmatpush.bf16.msra.mxu1 %v2688_v41  ;;  %v2692_v35 = vor.u32 %v3341_v30, %v2691_v29  ;;  %v3373_v36 = vld [vmem:[#allocation4 + $0x54] sm:$0xf0]  ;;  %v2907_v37 = vld [vmem:[#allocation4 + $0xd0] sm:$0xf]  ;;  %v2696_v39 = vor.u32 %v3339_v31, %v2693_v32  ;;  %v2675_v40 = vld [vmem:[#allocation2 + $0x28] sm:$0xf] }
  0x47   : > { %v3389_v38 = vld [vmem:[#allocation4 + $0xd4] sm:$0xf0]  ;;  %v3335_v42 = vld [vmem:[#allocation2 + $0x2c] sm:$0xf]  ;;  %v2844_v43 = vor.u32 %v3373_v36, %v2843_v34  ;;  %v2677_v44 = vld [vmem:[#allocation2 + $0x38] sm:$0xf0] }
  0x48   : > { %843 = vmatpush.bf16.msra.mxu2 %v2724_v10  ;;  %862 = vmatpush.bf16.msra.mxu3 %v2728_v14  ;;  %v3337_v41 = vld [vmem:[#allocation2 + $0x34] sm:$0xf0]  ;;  %v2908_v45 = vor.u32 %v3389_v38, %v2907_v37  ;;  %v2835_v46 = vld [vmem:[#allocation4 + $0x40] sm:$0xf]  ;;  %v3371_v47 = vld [vmem:[#allocation4 + $0x44] sm:$0xf0]  ;;  %v2680_v54 = vor.u32 %v3335_v42, %v2677_v44 }
  0x49   : > { %808 = vmatpush.bf16.msra.mxu0 %v2668_v51  ;;  %v2836_v48 = vor.u32 %v3371_v47, %v2835_v46  ;;  %v2899_v49 = vld [vmem:[#allocation4 + $0xc0] sm:$0xf]  ;;  %v3387_v50 = vld [vmem:[#allocation4 + $0xc4] sm:$0xf0]  ;;  %v601_v51 = vld [vmem:[%s4108_s26 + $0x10] sm:$0xff]  ;;  %v2676_v52 = vor.u32 %v3337_v41, %v2675_v40  ;;  %s2646_s25 = sshll.u32 %s577_s22, 5 }
  0x4a   : > { %827 = vmatpush.bf16.msra.mxu1 %v2672_v56  ;;  %v602_v53 = vld [vmem:[%s4108_s26 + $0x18] sm:$0xff]  ;;  %v2659_v55 = vld [vmem:[#allocation2 + $0x8] sm:$0xf]  ;;  %v3331_v57 = vld [vmem:[#allocation2 + $0xc] sm:$0xf]  ;;  %v2900_v60 = vor.u32 %v3387_v50, %v2899_v49  ;;  %s4534_s16 = scalar_lea.vmem [#allocation10], %s2646_s25  }
  0x4b   : > { %v3333_v56 = vld [vmem:[#allocation2 + $0x14] sm:$0xf0]  ;;  %v2661_v58 = vld [vmem:[#allocation2 + $0x18] sm:$0xf0]  ;;  %v3376_v59 = vld [vmem:[#allocation4 + $0x74] sm:$0xf] }
  0x4c   : > { %844 = vmatpush.bf16.msra.mxu2 %v2708_v25  ;;  %863 = vmatpush.bf16.msra.mxu3 %v2712_v28  ;;  %v2861_v61 = vld [vmem:[#allocation4 + $0x78] sm:$0xf0]  ;;  %v3392_v62 = vld [vmem:[#allocation4 + $0xf4] sm:$0xf]  ;;  %v2660_v1 = vor.u32 %v3333_v56, %v2659_v55  ;;  %v2664_v2 = vor.u32 %v3331_v57, %v2661_v58  ;;  %v2853_v6 = vld [vmem:[#allocation4 + $0x68] sm:$0xf0] }
  0x4d   : > { %809 = vmatpush.bf16.msra.mxu0 %v2652_v0  ;;  %v2925_v63 = vld [vmem:[#allocation4 + $0xf8] sm:$0xf0]  ;;  %v2781_v0 = vpack.c.bf16 %v602_v53, %v601_v51  ;;  %v2864_v3 = vor.u32 %v3376_v59, %v2861_v61  ;;  %v3390_v7 = vld [vmem:[#allocation4 + $0xe4] sm:$0xf]  ;;  %v2917_v10 = vld [vmem:[#allocation4 + $0xe8] sm:$0xf0] }
  0x4e   : > { %828 = vmatpush.bf16.msra.mxu1 %v2656_v5  ;;  %v2928_v4 = vor.u32 %v3392_v62, %v2925_v63  ;;  %v3374_v5 = vld [vmem:[#allocation4 + $0x64] sm:$0xf]  ;;  %v2920_v12 = vor.u32 %v3390_v7, %v2917_v10  ;;  %v3372_v13 = vld [vmem:[#allocation4 + $0x54] sm:$0xf]  ;;  %v2845_v14 = vld [vmem:[#allocation4 + $0x58] sm:$0xf0] }
  0x4f   : > { %v2856_v11 = vor.u32 %v3374_v5, %v2853_v6  ;;  %v3388_v15 = vld [vmem:[#allocation4 + $0xd4] sm:$0xf]  ;;  %v2848_v17 = vor.u32 %v3372_v13, %v2845_v14  ;;  %v3370_v19 = vld [vmem:[#allocation4 + $0x44] sm:$0xf]  ;;  %v2837_v20 = vld [vmem:[#allocation4 + $0x48] sm:$0xf0] }
  0x50   : > { %2779 = vmatmul.msk.bf16.vlgmr.msra.gmra.mxu0 %vm4112_vm1, %v4116_v9  ;;  %845 = vmatpush.bf16.msra.mxu2 %v2692_v35  ;;  %v2901_v22 = vld [vmem:[#allocation4 + $0xc8] sm:$0xf0]  ;;  %v2840_v23 = vor.u32 %v3370_v19, %v2837_v20  ;;  %v3368_v25 = vld [vmem:[#allocation4 + $0x34] sm:$0xf]  ;;  %v3369_v28 = vld [vmem:[#allocation4 + $0x34] sm:$0xf0] }
  0x51   : > { %1102 = vmatpush.bf16.msrb.mxu0 %v2860_v16  ;;  %2785 = vmatmul.msk.bf16.vlgmr.msra.gmra.mxu1 %vm4112_vm1, %v4116_v9  ;;  %v2909_v16 = vld [vmem:[#allocation4 + $0xd8] sm:$0xf0]  ;;  %v2891_v29 = vld [vmem:[#allocation4 + $0xb0] sm:$0xf]  ;;  %v3385_v31 = vld [vmem:[#allocation4 + $0xb4] sm:$0xf0] }
  0x52   : > { %1121 = vmatpush.bf16.msrb.mxu1 %v2924_v21  ;;  %864 = vmatpush.bf16.msra.mxu3 %v2696_v39  ;;  %v2912_v18 = vor.u32 %v3388_v15, %v2909_v16  ;;  %v3386_v21 = vld [vmem:[#allocation4 + $0xc4] sm:$0xf]  ;;  %v3384_v32 = vld [vmem:[#allocation4 + $0xb4] sm:$0xf]  ;;  %v2893_v34 = vld [vmem:[#allocation4 + $0xb8] sm:$0xf0] }
  0x53   : > { %v2904_v24 = vor.u32 %v3386_v21, %v2901_v22  ;;  %v2896_v35 = vor.u32 %v3384_v32, %v2893_v34  ;;  %v3366_v36 = vld [vmem:[#allocation4 + $0x24] sm:$0xf]  ;;  %v2821_v37 = vld [vmem:[#allocation4 + $0x28] sm:$0xf0]  ;;  %v2819_v39 = vld [vmem:[#allocation4 + $0x20] sm:$0xf] }
  0x54   : > { %846 = vmatpush.bf16.msra.mxu2 %v2676_v52  ;;  %v2824_v38 = vor.u32 %v3366_v36, %v2821_v37  ;;  %v3367_v40 = vld [vmem:[#allocation4 + $0x24] sm:$0xf0]  ;;  %v2883_v41 = vld [vmem:[#allocation4 + $0xa0] sm:$0xf]  ;;  %v2885_v44 = vld [vmem:[#allocation4 + $0xa8] sm:$0xf0] }
  0x55   : > { %1103 = vmatpush.bf16.msrb.mxu0 %v2852_v26  ;;  %v2829_v26 = vld [vmem:[#allocation4 + $0x38] sm:$0xf0]  ;;  %v2820_v8 = vor.u32 %v3367_v40, %v2819_v39  ;;  %v3383_v42 = vld [vmem:[#allocation4 + $0xa4] sm:$0xf0]  ;;  %v3364_v47 = vld [vmem:[#allocation4 + $0x14] sm:$0xf] }
  0x56   : > { %1122 = vmatpush.bf16.msrb.mxu1 %v2916_v33  ;;  %865 = vmatpush.bf16.msra.mxu3 %v2680_v54  ;;  %v2832_v27 = vor.u32 %v3368_v25, %v2829_v26  ;;  %v2892_v33 = vor.u32 %v3385_v31, %v2891_v29  ;;  %v2811_v50 = vld [vmem:[#allocation4 + $0x10] sm:$0xf]  ;;  %v3365_v51 = vld [vmem:[#allocation4 + $0x14] sm:$0xf0]  ;;  %v3380_v55 = vld [vmem:[#allocation4 + $0x94] sm:$0xf] }
  0x57   : > { %v2875_v52 = vld [vmem:[#allocation4 + $0x90] sm:$0xf]  ;;  %v2812_v53 = vor.u32 %v3365_v51, %v2811_v50  ;;  %v3381_v54 = vld [vmem:[#allocation4 + $0x94] sm:$0xf0]  ;;  %v2877_v56 = vld [vmem:[#allocation4 + $0x98] sm:$0xf0] }
  0x58   : > { %847 = vmatpush.bf16.msra.mxu2 %v2660_v1  ;;  %v2876_v57 = vor.u32 %v3381_v54, %v2875_v52  ;;  %v2880_v58 = vor.u32 %v3380_v55, %v2877_v56  ;;  %v3362_v59 = vld [vmem:[#allocation4 + $0x4] sm:$0xf]  ;;  %v2803_v61 = vld [vmem:[#allocation4] sm:$0xf]  ;;  %v3363_v63 = vld [vmem:[#allocation4 + $0x4] sm:$0xf0] }
  0x59   : > { %1104 = vmatpush.bf16.msrb.mxu0 %v2844_v43  ;;  %v3382_v43 = vld [vmem:[#allocation4 + $0xa4] sm:$0xf]  ;;  %v3379_v1 = vld [vmem:[#allocation4 + $0x84] sm:$0xf0]  ;;  %v2869_v5 = vld [vmem:[#allocation4 + $0x88] sm:$0xf0] }
  0x5a   : > { %1123 = vmatpush.bf16.msrb.mxu1 %v2908_v45  ;;  %866 = vmatpush.bf16.msra.mxu3 %v2664_v2  ;;  %v2884_v45 = vor.u32 %v3383_v42, %v2883_v41  ;;  %v2888_v46 = vor.u32 %v3382_v43, %v2885_v44  ;;  %v2804_v2 = vor.u32 %v3363_v63, %v2803_v61  ;;  %v878_v10 = vld [vmem:[%s4608_s2] sm:$0x3]  ;;  %v2987_v20 = vld [vmem:[#allocation6 + $0x70] sm:$0xf]  ;;  %v3409_v21 = vld [vmem:[#allocation6 + $0x74] sm:$0xf0] }
  0x5b   : > { %2791 = vmatmul.msk.bf16.vlgmr.msra.gmra.mxu2 %vm4112_vm1, %v4116_v9  ;;  %v4145_v13 = vperm.slane %v878_v10, 1  ;;  %v3408_v22 = vld [vmem:[#allocation6 + $0x74] sm:$0xf]  ;;  %v2988_v25 = vor.u32 %v3409_v21, %v2987_v20  ;;  %v2989_v26 = vld [vmem:[#allocation6 + $0x78] sm:$0xf0]  ;;  %s3490_s15 = sshll.u32 (%p4041_p4), %s4029_s21, 5 }
  0x5c   : > { %1140 = vmatpush.bf16.msrb.mxu2 %v2864_v3  ;;  %v3407_v34 = vld [vmem:[#allocation6 + $0x64] sm:$0xf0]  ;;  %v2981_v37 = vld [vmem:[#allocation6 + $0x68] sm:$0xf0]  ;;  %v3053_v39 = vld [vmem:[#allocation6 + $0xf8] sm:$0xf0] }
  0x5d   : > { %1105 = vmatpush.bf16.msrb.mxu0 %v2836_v48  ;;  %2797 = vmatmul.msk.bf16.vlgmr.msra.gmra.mxu3 %vm4112_vm1, %v4116_v9  ;;  %v2827_v9 = vld [vmem:[#allocation4 + $0x30] sm:$0xf]  ;;  %v2813_v48 = vld [vmem:[#allocation4 + $0x18] sm:$0xf0]  ;;  %v3425_v42 = vld [vmem:[#allocation6 + $0xf4] sm:$0xf0] }
  0x5e   : > { %1124 = vmatpush.bf16.msrb.mxu1 %v2900_v60  ;;  %1159 = vmatpush.bf16.msrb.mxu3 %v2928_v4  ;;  %v2828_v30 = vor.u32 %v3369_v28, %v2827_v9  ;;  %v2816_v49 = vor.u32 %v3364_v47, %v2813_v48  ;;  %v2805_v60 = vld [vmem:[#allocation4 + $0x8] sm:$0xf0]  ;;  %v3378_v4 = vld [vmem:[#allocation4 + $0x84] sm:$0xf]  ;;  %v2992_v28 = vor.u32 %v3408_v22, %v2989_v26  ;;  %v2971_v44 = vld [vmem:[#allocation6 + $0x50] sm:$0xf] }
  0x5f   : > { %v2808_v62 = vor.u32 %v3362_v59, %v2805_v60  ;;  %v2872_v6 = vor.u32 %v3378_v4, %v2869_v5  ;;  %v3404_v47 = vld [vmem:[#allocation6 + $0x54] sm:$0xf]  ;;  %v2973_v48 = vld [vmem:[#allocation6 + $0x58] sm:$0xf0]  ;;  %v3045_v51 = vld [vmem:[#allocation6 + $0xe8] sm:$0xf0] }
  0x60   : > { %2782 = vmatmul.msk.bf16.gmra.mxu0 %vm4112_vm1, %v2781_v0  ;;  %1141 = vmatpush.bf16.msrb.mxu2 %v2856_v11  ;;  %v2976_v50 = vor.u32 %v3404_v47, %v2973_v48  ;;  %v3043_v52 = vld [vmem:[#allocation6 + $0xe0] sm:$0xf]  ;;  %v3402_v59 = vld [vmem:[#allocation6 + $0x44] sm:$0xf]  ;;  %v2965_v63 = vld [vmem:[#allocation6 + $0x48] sm:$0xf0] }
  0x61   : > { %2788 = vmatmul.msk.bf16.gmra.mxu1 %vm4112_vm1, %v2781_v0  ;;  %1106 = vmatpush.bf16.msrb.mxu0 %v2828_v30  ;;  %v2968_v4 = vor.u32 %v3402_v59, %v2965_v63  ;;  %v3401_v20 = vld [vmem:[#allocation6 + $0x34] sm:$0xf0]  ;;  %v3400_v21 = vld [vmem:[#allocation6 + $0x34] sm:$0xf]  ;;  %v3418_v26 = vld [vmem:[#allocation6 + $0xc4] sm:$0xf] }
  0x62   : > { %1160 = vmatpush.bf16.msrb.mxu3 %v2920_v12  ;;  %1125 = vmatpush.bf16.msrb.mxu1 %v2892_v33  ;;  %v4143_v12 = vperm.slane %v878_v10, 0  ;;  %v2979_v33 = vld [vmem:[#allocation6 + $0x60] sm:$0xf]  ;;  %v3005_v63 = vld [vmem:[#allocation6 + $0x98] sm:$0xf0]  ;;  %p2363_p11 = scmp.lt.s32.totalorder (%p4041_p4), %s2362_s14, 4 }
  0x63   : > { %v2980_v36 = vor.u32 %v3407_v34, %v2979_v33  ;;  %v3398_v33 = vld [vmem:[#allocation6 + $0x24] sm:$0xf]  ;;  %s4650_s27 = sld [smem:[#allocation23_spill]] (%p4041_p4) }
  0x64   : > { %1142 = vmatpush.bf16.msrb.mxu2 %v2848_v17 }
  0x65   : > { %1107 = vmatpush.bf16.msrb.mxu0 %v2820_v8  ;;  %v3051_v8 = vld [vmem:[#allocation6 + $0xf0] sm:$0xf] }
  0x66   : > { %1161 = vmatpush.bf16.msrb.mxu3 %v2912_v18  ;;  %1126 = vmatpush.bf16.msrb.mxu1 %v2884_v45  ;;  %v3052_v43 = vor.u32 %v3425_v42, %v3051_v8  ;;  %v3405_v45 = vld [vmem:[#allocation6 + $0x54] sm:$0xf0]  ;;  %v2939_v42 = vld [vmem:[#allocation6 + $0x10] sm:$0xf] }
  0x68   : > { %1143 = vmatpush.bf16.msrb.mxu2 %v2840_v23 }
  0x69   : > { %1108 = vmatpush.bf16.msrb.mxu0 %v2812_v53  ;;  %v3423_v53 = vld [vmem:[#allocation6 + $0xe4] sm:$0xf0]  ;;  %s4557_s23 = scalar_lea.vmem (%p4041_p4), %s4650_s27, %s3490_s15  }
  0x6a   : > { %1162 = vmatpush.bf16.msrb.mxu3 %v2904_v24  ;;  %1127 = vmatpush.bf16.msrb.mxu1 %v2876_v57  ;;  %v3044_v56 = vor.u32 %v3423_v53, %v3043_v52  ;;  %v2963_v57 = vld [vmem:[#allocation6 + $0x40] sm:$0xf] }
  0x6b   : > { %2794 = vmatmul.msk.bf16.gmra.mxu2 %vm4112_vm1, %v2781_v0 }
  0x6c   : > { %1144 = vmatpush.bf16.msrb.mxu2 %v2832_v27 }
  0x6d   : > { %2800 = vmatmul.msk.bf16.gmra.mxu3 %vm4112_vm1, %v2781_v0  ;;  %v2867_v0 = vld [vmem:[#allocation4 + $0x80] sm:$0xf]  ;;  %1109 = vmatpush.bf16.msrb.mxu0 %v2804_v2 }
  0x6e   : > { %1163 = vmatpush.bf16.msrb.mxu3 %v2896_v35  ;;  %v2868_v3 = vor.u32 %v3379_v1, %v2867_v0  ;;  %v3406_v35 = vld [vmem:[#allocation6 + $0x64] sm:$0xf]  ;;  %v3420_v0 = vld [vmem:[#allocation6 + $0xd4] sm:$0xf]  ;;  %v3037_v1 = vld [vmem:[#allocation6 + $0xd8] sm:$0xf0] }
  0x6f   : > { %v2984_v40 = vor.u32 %v3406_v35, %v2981_v37  ;;  %v3040_v5 = vor.u32 %v3420_v0, %v3037_v1  ;;  %v2949_v35 = vld [vmem:[#allocation6 + $0x28] sm:$0xf0]  ;;  %v3416_v37 = vld [vmem:[#allocation6 + $0xb4] sm:$0xf]  ;;  %v3003_v0 = vld [vmem:[#allocation6 + $0x90] sm:$0xf] }
  0x70   : > { %1145 = vmatpush.bf16.msrb.mxu2 %v2824_v38  ;;  %1128 = vmatpush.bf16.msrb.mxu1 %v2868_v3  ;;  %v3424_v38 = vld [vmem:[#allocation6 + $0xf4] sm:$0xf] }
  0x71   : > { %1388 = vmatpush.bf16.msra.mxu0 %v2988_v25  ;;  %v3056_v41 = vor.u32 %v3424_v38, %v3053_v39  ;;  %v3021_v38 = vld [vmem:[#allocation6 + $0xb8] sm:$0xf0]  ;;  %v3019_v39 = vld [vmem:[#allocation6 + $0xb0] sm:$0xf] }
  0x72   : > { %1164 = vmatpush.bf16.msrb.mxu3 %v2888_v46  ;;  %v2972_v46 = vor.u32 %v3405_v45, %v2971_v44  ;;  %v3396_v44 = vld [vmem:[#allocation6 + $0x14] sm:$0xf] }
  0x74   : > { %1146 = vmatpush.bf16.msrb.mxu2 %v2816_v49  ;;  %v3422_v49 = vld [vmem:[#allocation6 + $0xe4] sm:$0xf]  ;;  %1407 = vmatpush.bf16.msra.mxu1 %v3052_v43  ;;  %v3397_v43 = vld [vmem:[#allocation6 + $0x14] sm:$0xf0] }
  0x75   : > { %1389 = vmatpush.bf16.msra.mxu0 %v2980_v36  ;;  %v3048_v55 = vor.u32 %v3422_v49, %v3045_v51  ;;  %v2952_v36 = vor.u32 %v3398_v33, %v2949_v35  ;;  %v2940_v45 = vor.u32 %v3397_v43, %v2939_v42  ;;  %v3414_v49 = vld [vmem:[#allocation6 + $0xa4] sm:$0xf]  ;;  %v3011_v51 = vld [vmem:[#allocation6 + $0xa0] sm:$0xf]  ;;  %v3179_v42 = vld [vmem:[#allocation7 + $0xf0] sm:$0xf] }
  0x76   : > { %1165 = vmatpush.bf16.msrb.mxu3 %v2880_v58  ;;  %v3403_v58 = vld [vmem:[#allocation6 + $0x44] sm:$0xf0]  ;;  %v3457_v43 = vld [vmem:[#allocation7 + $0xf4] sm:$0xf0] }
  0x78   : > { %1147 = vmatpush.bf16.msrb.mxu2 %v2808_v62  ;;  %v2964_v62 = vor.u32 %v3403_v58, %v2963_v57  ;;  %1408 = vmatpush.bf16.msra.mxu1 %v3044_v56  ;;  %v2931_v56 = vld [vmem:[#allocation6] sm:$0xf]  ;;  %v3395_v57 = vld [vmem:[#allocation6 + $0x4] sm:$0xf0]  ;;  %v3394_v58 = vld [vmem:[#allocation6 + $0x4] sm:$0xf] }
  0x79   : > { %1390 = vmatpush.bf16.msra.mxu0 %v2972_v46  ;;  %v2941_v46 = vld [vmem:[#allocation6 + $0x18] sm:$0xf0]  ;;  %v2932_v59 = vor.u32 %v3395_v57, %v2931_v56  ;;  %v3173_v57 = vld [vmem:[#allocation7 + $0xe8] sm:$0xf0] }
  0x7a   : > { %1166 = vmatpush.bf16.msrb.mxu3 %v2872_v6  ;;  %v2944_v48 = vor.u32 %v3396_v44, %v2941_v46 }
  0x7c   : > { %1426 = vmatpush.bf16.msra.mxu2 %v2992_v28 }
  0x7d   : > { %1391 = vmatpush.bf16.msra.mxu0 %v2964_v62  ;;  %v3412_v62 = vld [vmem:[#allocation6 + $0x94] sm:$0xf] }
  0x7e   : > { %1445 = vmatpush.bf16.msra.mxu3 %v3056_v41  ;;  %v3417_v41 = vld [vmem:[#allocation6 + $0xb4] sm:$0xf0]  ;;  %v3008_v1 = vor.u32 %v3412_v62, %v3005_v63 }
  0x7f   : > { %v3020_v8 = vor.u32 %v3417_v41, %v3019_v39  ;;  %v3456_v39 = vld [vmem:[#allocation7 + $0xf4] sm:$0xf] }
  0x80   : > { %1427 = vmatpush.bf16.msra.mxu2 %v2984_v40  ;;  %v3024_v40 = vor.u32 %v3416_v37, %v3021_v38  ;;  %v3438_v37 = vld [vmem:[#allocation7 + $0x64] sm:$0xf]  ;;  %v3109_v38 = vld [vmem:[#allocation7 + $0x68] sm:$0xf0] }
  0x82   : > { %1446 = vmatpush.bf16.msra.mxu3 %v3048_v55 }
  0x84   : > { %1428 = vmatpush.bf16.msra.mxu2 %v2976_v50  ;;  %v3013_v50 = vld [vmem:[#allocation6 + $0xa8] sm:$0xf0] }
  0x85   : > { %v3016_v53 = vor.u32 %v3414_v49, %v3013_v50  ;;  %v3099_v49 = vld [vmem:[#allocation7 + $0x50] sm:$0xf]  ;;  %v3437_v50 = vld [vmem:[#allocation7 + $0x54] sm:$0xf0] }
  0x86   : > { %1447 = vmatpush.bf16.msra.mxu3 %v3040_v5  ;;  %v2997_v5 = vld [vmem:[#allocation6 + $0x88] sm:$0xf0] }
  0x88   : > { %1429 = vmatpush.bf16.msra.mxu2 %v2968_v4  ;;  %v3410_v4 = vld [vmem:[#allocation6 + $0x84] sm:$0xf] }
  0xcd   : > { %v811_v7 = vpop.f32.mrf.mxu0 }
  0xce   : > { %v830_v11 = vpop.f32.mrf.mxu1  ;;  %v884_v14 = vadd.f32 %v4143_v12, %v811_v7 }
  0xcf   : > { %v885_v15 = vadd.f32 %v4145_v13, %v830_v11 }
  0xd0   : > { %v892_v23 = vmax.f32 %v884_v14, 0.0 }
  0xd1   : > { %v893_v27 = vmax.f32 %v885_v15, 0.0 }
  0xd5   : > { %v813_v16 = vpop.f32.mrf.mxu0 }
  0xd6   : > { %v886_v17 = vadd.f32 %v4143_v12, %v813_v16  ;;  %v832_v18 = vpop.f32.mrf.mxu1 }
  0xd7   : > { %v887_v19 = vadd.f32 %v4145_v13, %v832_v18 }
  0xd8   : > { %v894_v24 = vmax.f32 %v886_v17, 0.0  ;;  %v3421_v17 = vld [vmem:[#allocation6 + $0xd4] sm:$0xf0] }
  0xd9   : > { %v895_v9 = vmax.f32 %v887_v19, 0.0 }
  0xda   : > { %v900_v29 = vpack.c.bf16 %v894_v24, %v892_v23  ;;  %v2957_v24 = vld [vmem:[#allocation6 + $0x38] sm:$0xf0] }
  0xdb   : > { %v901_v30 = vpack.c.bf16 %v895_v9, %v893_v27  ;;  %v2960_v25 = vor.u32 %v3400_v21, %v2957_v24  ;;  %v3029_v27 = vld [vmem:[#allocation6 + $0xc8] sm:$0xf0]  ;;  %v3027_v9 = vld [vmem:[#allocation6 + $0xc0] sm:$0xf] }
  0xdc   : > { %1110 = vmatmul.bf16.vlgmr.msrb.gmra.mxu0 %v900_v29  ;;  %1148 = vmatmul.bf16.vlgmr.msrb.gmra.mxu2 %v900_v29  ;;  %v3032_v28 = vor.u32 %v3418_v26, %v3029_v27  ;;  %v3419_v29 = vld [vmem:[#allocation6 + $0xc4] sm:$0xf0]  ;;  %v3115_v26 = vld [vmem:[#allocation7 + $0x70] sm:$0xf]  ;;  %v3441_v27 = vld [vmem:[#allocation7 + $0x74] sm:$0xf0] }
  0xdd   : > { %1129 = vmatmul.bf16.vlgmr.msrb.gmra.mxu1 %v901_v30  ;;  %1167 = vmatmul.bf16.vlgmr.msrb.gmra.mxu3 %v901_v30  ;;  %v816_v31 = vpop.f32.mrf.mxu0  ;;  %v3028_v30 = vor.u32 %v3419_v29, %v3027_v9  ;;  %v3440_v9 = vld [vmem:[#allocation7 + $0x74] sm:$0xf]  ;;  %v3116_v29 = vor.u32 %v3441_v27, %v3115_v26 }
  0xde   : > { %v835_v32 = vpop.f32.mrf.mxu1  ;;  %v888_v54 = vadd.f32 %v4143_v12, %v816_v31  ;;  %v4155_v19 = vpop.f32.mrf.mxu2  ;;  %1430 = vmatpush.bf16.msra.mxu2 %v2960_v25  ;;  %v2947_v31 = vld [vmem:[#allocation6 + $0x20] sm:$0xf]  ;;  %1448 = vmatpush.bf16.msra.mxu3 %v3032_v28 }
  0xdf   : > { %v889_v60 = vadd.f32 %v4145_v13, %v835_v32  ;;  %v3399_v32 = vld [vmem:[#allocation6 + $0x24] sm:$0xf0] }
  0xe0   : > { %v896_v7 = vmax.f32 %v888_v54, 0.0  ;;  %v4157_v22 = vpop.f32.mrf.mxu3  ;;  %v2948_v34 = vor.u32 %v3399_v32, %v2947_v31  ;;  %v3415_v54 = vld [vmem:[#allocation6 + $0xa4] sm:$0xf0]  ;;  %v3107_v31 = vld [vmem:[#allocation7 + $0x60] sm:$0xf] }
  0xe1   : > { %v897_v11 = vmax.f32 %v889_v60, 0.0  ;;  %v3012_v55 = vor.u32 %v3415_v54, %v3011_v51  ;;  %v2933_v60 = vld [vmem:[#allocation6 + $0x8] sm:$0xf0]  ;;  %v3439_v32 = vld [vmem:[#allocation7 + $0x64] sm:$0xf0] }
  0xe2   : > { %1431 = vmatpush.bf16.msra.mxu2 %v2952_v36  ;;  %1449 = vmatpush.bf16.msra.mxu3 %v3024_v40  ;;  %v3108_v41 = vor.u32 %v3439_v32, %v3107_v31  ;;  %v3436_v51 = vld [vmem:[#allocation7 + $0x54] sm:$0xf]  ;;  %v3454_v54 = vld [vmem:[#allocation7 + $0xe4] sm:$0xf] }
  0xe5   : > { %v818_v61 = vpop.f32.mrf.mxu0 }
  0xe6   : > { %v890_v2 = vadd.f32 %v4143_v12, %v818_v61  ;;  %v837_v3 = vpop.f32.mrf.mxu1  ;;  %v3035_v12 = vld [vmem:[#allocation6 + $0xd0] sm:$0xf]  ;;  %v4159_v47 = vpop.f32.mrf.mxu2  ;;  %1432 = vmatpush.bf16.msra.mxu2 %v2944_v48  ;;  %1450 = vmatpush.bf16.msra.mxu3 %v3016_v53  ;;  %v2936_v61 = vor.u32 %v3394_v58, %v2933_v60  ;;  %v3180_v48 = vor.u32 %v3457_v43, %v3179_v42  ;;  %v3101_v53 = vld [vmem:[#allocation7 + $0x58] sm:$0xf0]  ;;  %v3093_v42 = vld [vmem:[#allocation7 + $0x48] sm:$0xf0] }
  0xe7   : > { %v891_v6 = vadd.f32 %v4145_v13, %v837_v3  ;;  %v3036_v18 = vor.u32 %v3421_v17, %v3035_v12  ;;  %v2955_v13 = vld [vmem:[#allocation6 + $0x30] sm:$0xf]  ;;  %v936_v12 = vld [vmem:[%s4610_s4] sm:$0x3]  ;;  %v3176_v60 = vor.u32 %v3454_v54, %v3173_v57  ;;  %v3165_v43 = vld [vmem:[#allocation7 + $0xd8] sm:$0xf0] }
  0xe8   : > { %v898_v10 = vmax.f32 %v890_v2, 0.0  ;;  %v2956_v23 = vor.u32 %v3401_v20, %v2955_v13  ;;  %v4161_v52 = vpop.f32.mrf.mxu3  ;;  %v3413_v2 = vld [vmem:[#allocation6 + $0x94] sm:$0xf0]  ;;  %v4174_v13 = vperm.slane %v936_v12, 0  ;;  %v3450_v57 = vld [vmem:[#allocation7 + $0xc4] sm:$0xf] }
  0xe9   : > { %v899_v14 = vmax.f32 %v891_v6, 0.0  ;;  %1409 = vmatpush.bf16.msra.mxu1 %v3036_v18  ;;  %v3004_v3 = vor.u32 %v3413_v2, %v3003_v0  ;;  %v2995_v6 = vld [vmem:[#allocation6 + $0x80] sm:$0xf] }
  0xea   : > { %v902_v15 = vpack.c.bf16 %v898_v10, %v896_v7  ;;  %1392 = vmatpush.bf16.msra.mxu0 %v2956_v23  ;;  %1433 = vmatpush.bf16.msra.mxu2 %v2936_v61  ;;  %v3000_v7 = vor.u32 %v3410_v4, %v2997_v5  ;;  %v3411_v10 = vld [vmem:[#allocation6 + $0x84] sm:$0xf0]  ;;  %v4177_v23 = vperm.slane %v936_v12, 1 }
  0xeb   : > { %v903_v16 = vpack.c.bf16 %v899_v14, %v897_v11  ;;  %1451 = vmatpush.bf16.msra.mxu3 %v3008_v1  ;;  %v2996_v14 = vor.u32 %v3411_v10, %v2995_v6  ;;  %v3104_v1 = vor.u32 %v3436_v51, %v3101_v53  ;;  %v3433_v51 = vld [vmem:[#allocation7 + $0x34] sm:$0xf0]  ;;  %v3432_v53 = vld [vmem:[#allocation7 + $0x34] sm:$0xf] }
  0xec   : > { %1115 = vmatmul.bf16.gmra.mxu0 %v902_v15  ;;  %1153 = vmatmul.bf16.gmra.mxu2 %v902_v15 }
  0xed   : > { %1134 = vmatmul.bf16.gmra.mxu1 %v903_v16  ;;  %1172 = vmatmul.bf16.gmra.mxu3 %v903_v16 }
  0xee   : > { %1410 = vmatpush.bf16.msra.mxu1 %v3028_v30  ;;  %1393 = vmatpush.bf16.msra.mxu0 %v2948_v34  ;;  %v4163_v11 = vpop.f32.mrf.mxu2  ;;  %v3117_v30 = vld [vmem:[#allocation7 + $0x78] sm:$0xf0] }
  0xef   : > { %1452 = vmatpush.bf16.msra.mxu3 %v3000_v7  ;;  %v3120_v36 = vor.u32 %v3440_v9, %v3117_v30 }
  0xf0   : > { %v4165_v15 = vpop.f32.mrf.mxu3 }
  0xf1   : > { %1706 = vmatpush.bf16.msrb.mxu2 %v3120_v36 }
  0xf2   : > { %1411 = vmatpush.bf16.msra.mxu1 %v3020_v8  ;;  %1394 = vmatpush.bf16.msra.mxu0 %v2940_v45  ;;  %v3181_v8 = vld [vmem:[#allocation7 + $0xf8] sm:$0xf0]  ;;  %v3112_v45 = vor.u32 %v3438_v37, %v3109_v38  ;;  %v3455_v37 = vld [vmem:[#allocation7 + $0xe4] sm:$0xf0] }
  0xf3   : > { %v3184_v46 = vor.u32 %v3456_v39, %v3181_v8  ;;  %v3091_v39 = vld [vmem:[#allocation7 + $0x40] sm:$0xf] }
  0xf5   : > { %1725 = vmatpush.bf16.msrb.mxu3 %v3184_v46  ;;  %1707 = vmatpush.bf16.msrb.mxu2 %v3112_v45  ;;  %v3163_v46 = vld [vmem:[#allocation7 + $0xd0] sm:$0xf] }
  0xf6   : > { %1412 = vmatpush.bf16.msra.mxu1 %v3012_v55  ;;  %1395 = vmatpush.bf16.msra.mxu0 %v2932_v59  ;;  %v4167_v16 = vpop.f32.mrf.mxu2  ;;  %v3100_v59 = vor.u32 %v3437_v50, %v3099_v49  ;;  %v3083_v50 = vld [vmem:[#allocation7 + $0x30] sm:$0xf] }
  0xf7   : > { %v3084_v54 = vor.u32 %v3433_v51, %v3083_v50 }
  0xf8   : > { %v4172_v17 = vpop.f32.mrf.mxu3 }
  0xf9   : > { %1726 = vmatpush.bf16.msrb.mxu3 %v3176_v60  ;;  %1708 = vmatpush.bf16.msrb.mxu2 %v3104_v1  ;;  %v3155_v60 = vld [vmem:[#allocation7 + $0xc0] sm:$0xf]  ;;  %v3430_v1 = vld [vmem:[#allocation7 + $0x24] sm:$0xf] }
  0xfa   : > { %1413 = vmatpush.bf16.msra.mxu1 %v3004_v3  ;;  %1668 = vmatpush.bf16.msrb.mxu0 %v3116_v29 }
  0xfe   : > { %1414 = vmatpush.bf16.msra.mxu1 %v2996_v14  ;;  %1669 = vmatpush.bf16.msrb.mxu0 %v3108_v41  ;;  %v3434_v41 = vld [vmem:[#allocation7 + $0x44] sm:$0xf] }
 0x102   : > { %1687 = vmatpush.bf16.msrb.mxu1 %v3180_v48  ;;  %1670 = vmatpush.bf16.msrb.mxu0 %v3100_v59  ;;  %v3453_v48 = vld [vmem:[#allocation7 + $0xd4] sm:$0xf0] }
 0x103   : > { %v3164_v49 = vor.u32 %v3453_v48, %v3163_v46 }
 0x159   : > { %v1111_v18 = vpop.f32.mrf.mxu0 }
 0x15a   : > { %v1130_v20 = vpop.f32.mrf.mxu1  ;;  %v1112_v21 = vadd.f32 %v1111_v18, %v4174_v13 }
 0x15c   : > { %v1131_v33 = vadd.f32 %v1130_v20, %v1112_v21 }
 0x15e   : > { %v1178_v55 = vmax.f32 %v1131_v33, 0.0 }
 0x15f   : > { %v1149_v24 = vpop.f32.mrf.mxu2 }
 0x160   : > { %v1168_v25 = vpop.f32.mrf.mxu3  ;;  %v1150_v40 = vadd.f32 %v1149_v24, %v4177_v23 }
 0x161   : > { %v1113_v28 = vpop.f32.mrf.mxu0 }
 0x162   : > { %v1114_v34 = vadd.f32 %v1113_v28, %v4174_v13  ;;  %v1132_v35 = vpop.f32.mrf.mxu1  ;;  %v1169_v61 = vadd.f32 %v1168_v25, %v1150_v40  ;;  %v3435_v40 = vld [vmem:[#allocation7 + $0x44] sm:$0xf0] }
 0x163   : > { %v3092_v8 = vor.u32 %v3435_v40, %v3091_v39  ;;  %v3131_v39 = vld [vmem:[#allocation7 + $0x90] sm:$0xf] }
 0x164   : > { %v1133_v44 = vadd.f32 %v1132_v35, %v1114_v34  ;;  %v1179_v5 = vmax.f32 %v1169_v61, 0.0  ;;  %v3451_v61 = vld [vmem:[#allocation7 + $0xc4] sm:$0xf0] }
 0x165   : > { %1671 = vmatpush.bf16.msrb.mxu0 %v3092_v8 }
 0x166   : > { %v1180_v56 = vmax.f32 %v1133_v44, 0.0  ;;  %v3096_v44 = vor.u32 %v3434_v41, %v3093_v42  ;;  %v3445_v41 = vld [vmem:[#allocation7 + $0x94] sm:$0xf0]  ;;  %v3442_v42 = vld [vmem:[#allocation7 + $0x84] sm:$0xf] }
 0x167   : > { %v1151_v58 = vpop.f32.mrf.mxu2  ;;  %v3132_v8 = vor.u32 %v3445_v41, %v3131_v39  ;;  %v1820_v41 = vld [vmem:[%s4615_s9 + $0x1b0] sm:$0xff] }
 0x168   : > { %v1186_v62 = vpack.c.bf16 %v1180_v56, %v1178_v55  ;;  %v1152_v63 = vadd.f32 %v1151_v58, %v4177_v23  ;;  %v1170_v0 = vpop.f32.mrf.mxu3  ;;  %1709 = vmatpush.bf16.msrb.mxu2 %v3096_v44  ;;  %v3085_v55 = vld [vmem:[#allocation7 + $0x38] sm:$0xf0]  ;;  %v3157_v58 = vld [vmem:[#allocation7 + $0xc8] sm:$0xf0] }
 0x169   : > { %v1116_v2 = vpop.f32.mrf.mxu0  ;;  %v3088_v56 = vor.u32 %v3432_v53, %v3085_v55  ;;  %1672 = vmatpush.bf16.msrb.mxu0 %v3084_v54  ;;  %v3160_v59 = vor.u32 %v3450_v57, %v3157_v58  ;;  %v1797_v57 = vld [vmem:[%s4615_s9 + $0xf8] sm:$0xff]  ;;  %v1794_v58 = vld [vmem:[%s4615_s9 + $0xe0] sm:$0xff] }
 0x16a   : > { %v1171_v3 = vadd.f32 %v1170_v0, %v1152_v63  ;;  %v1135_v4 = vpop.f32.mrf.mxu1  ;;  %1396 = vmatmul.bf16.vlgmr.msra.gmra.mxu0 %v1186_v62  ;;  %1434 = vmatmul.bf16.vlgmr.msra.gmra.mxu2 %v1186_v62  ;;  %v1117_v10 = vadd.f32 %v1116_v2, %v4174_v13  ;;  %v3156_v62 = vor.u32 %v3451_v61, %v3155_v60  ;;  %v3075_v63 = vld [vmem:[#allocation7 + $0x20] sm:$0xf]  ;;  %v3431_v0 = vld [vmem:[#allocation7 + $0x24] sm:$0xf0]  ;;  %v1792_v61 = vld [vmem:[%s4615_s9 + $0xd0] sm:$0xff] }
 0x16b   : > { %v3076_v2 = vor.u32 %v3431_v0, %v3075_v63  ;;  %v1795_v60 = vld [vmem:[%s4615_s9 + $0xe8] sm:$0xff] }
 0x16c   : > { %v1181_v6 = vmax.f32 %v1171_v3, 0.0  ;;  %v1136_v20 = vadd.f32 %v1135_v4, %v1117_v10  ;;  %1710 = vmatpush.bf16.msrb.mxu2 %v3088_v56  ;;  %v3077_v3 = vld [vmem:[#allocation7 + $0x28] sm:$0xf0]  ;;  %v3448_v4 = vld [vmem:[#allocation7 + $0xb4] sm:$0xf] }
 0x16d   : > { %v3147_v10 = vld [vmem:[#allocation7 + $0xb0] sm:$0xf]  ;;  %1673 = vmatpush.bf16.msrb.mxu0 %v3076_v2  ;;  %v1829_v2 = vld [vmem:[%s4615_s9 + $0x1f8] sm:$0xff] }
 0x16e   : > { %v1187_v7 = vpack.c.bf16 %v1181_v6, %v1179_v5  ;;  %v1182_v27 = vmax.f32 %v1136_v20, 0.0  ;;  %v3149_v5 = vld [vmem:[#allocation7 + $0xb8] sm:$0xf0]  ;;  %v3080_v6 = vor.u32 %v3430_v1, %v3077_v3  ;;  %v3429_v20 = vld [vmem:[#allocation7 + $0x14] sm:$0xf0]  ;;  %v1796_v56 = vld [vmem:[%s4615_s9 + $0xf0] sm:$0xff] }
 0x16f   : > { %v1154_v14 = vpop.f32.mrf.mxu2  ;;  %v1793_v1 = vld [vmem:[%s4615_s9 + $0xd8] sm:$0xff]  ;;  %v1828_v3 = vld [vmem:[%s4615_s9 + $0x1f0] sm:$0xff] }
 0x170   : > { %v1173_v12 = vpop.f32.mrf.mxu3  ;;  %1415 = vmatmul.bf16.vlgmr.msra.gmra.mxu1 %v1187_v7  ;;  %1453 = vmatmul.bf16.vlgmr.msra.gmra.mxu3 %v1187_v7  ;;  %v1155_v25 = vadd.f32 %v1154_v14, %v4177_v23  ;;  %v3152_v7 = vor.u32 %v3448_v4, %v3149_v5  ;;  %v3449_v14 = vld [vmem:[#allocation7 + $0xb4] sm:$0xf0] }
 0x171   : > { %v1118_v18 = vpop.f32.mrf.mxu0  ;;  %1711 = vmatpush.bf16.msrb.mxu2 %v3080_v6  ;;  %v1827_v6 = vld [vmem:[%s4615_s9 + $0x1e8] sm:$0xff] }
 0x172   : > { %v1119_v21 = vadd.f32 %v1118_v18, %v4174_v13  ;;  %v1137_v24 = vpop.f32.mrf.mxu1  ;;  %v1174_v29 = vadd.f32 %v1173_v12, %v1155_v25  ;;  %v3171_v13 = vld [vmem:[#allocation7 + $0xe0] sm:$0xf]  ;;  %v3148_v12 = vor.u32 %v3449_v14, %v3147_v10  ;;  %v3067_v18 = vld [vmem:[#allocation7 + $0x10] sm:$0xf]  ;;  %v3069_v25 = vld [vmem:[#allocation7 + $0x18] sm:$0xf0] }
 0x173   : > { %v3172_v38 = vor.u32 %v3455_v37, %v3171_v13  ;;  %v3444_v37 = vld [vmem:[#allocation7 + $0x94] sm:$0xf]  ;;  %v1790_v10 = vld [vmem:[%s4615_s9 + $0xc0] sm:$0xff]  ;;  %v1791_v14 = vld [vmem:[%s4615_s9 + $0xc8] sm:$0xff] }
 0x174   : > { %v1138_v26 = vadd.f32 %v1137_v24, %v1119_v21  ;;  %v1183_v34 = vmax.f32 %v1174_v29, 0.0  ;;  %v3428_v21 = vld [vmem:[#allocation7 + $0x14] sm:$0xf]  ;;  %v3068_v24 = vor.u32 %v3429_v20, %v3067_v18  ;;  %v1825_v20 = vld [vmem:[%s4615_s9 + $0x1d8] sm:$0xff] }
 0x175   : > { %1688 = vmatpush.bf16.msrb.mxu1 %v3172_v38  ;;  %v3133_v38 = vld [vmem:[#allocation7 + $0x98] sm:$0xf0] }
 0x176   : > { %v1184_v9 = vmax.f32 %v1138_v26, 0.0  ;;  %v3072_v26 = vor.u32 %v3428_v21, %v3069_v25  ;;  %1674 = vmatpush.bf16.msrb.mxu0 %v3068_v24  ;;  %v3136_v40 = vor.u32 %v3444_v37, %v3133_v38  ;;  %v1824_v21 = vld [vmem:[%s4615_s9 + $0x1d0] sm:$0xff]  ;;  %v1785_v37 = vld [vmem:[%s4615_s9 + $0x98] sm:$0xff] }
 0x177   : > { %v1156_v28 = vpop.f32.mrf.mxu2 }
 0x178   : > { %v1157_v30 = vadd.f32 %v1156_v28, %v4177_v23  ;;  %v1188_v31 = vpack.c.bf16 %v1184_v9, %v1182_v27  ;;  %v1175_v32 = vpop.f32.mrf.mxu3  ;;  %v3452_v23 = vld [vmem:[#allocation7 + $0xd4] sm:$0xf]  ;;  %v3446_v27 = vld [vmem:[#allocation7 + $0xa4] sm:$0xf]  ;;  %v3141_v9 = vld [vmem:[#allocation7 + $0xa8] sm:$0xf0]  ;;  %1712 = vmatpush.bf16.msrb.mxu2 %v3072_v26 }
 0x179   : > { %v3168_v45 = vor.u32 %v3452_v23, %v3165_v43  ;;  %1689 = vmatpush.bf16.msrb.mxu1 %v3164_v49  ;;  %v3139_v28 = vld [vmem:[#allocation7 + $0xa0] sm:$0xf]  ;;  %v3144_v29 = vor.u32 %v3446_v27, %v3141_v9  ;;  %v3125_v23 = vld [vmem:[#allocation7 + $0x88] sm:$0xf0]  ;;  %v1788_v27 = vld [vmem:[%s4615_s9 + $0xb0] sm:$0xff] }
 0x17a   : > { %v1176_v33 = vadd.f32 %v1175_v32, %v1157_v30  ;;  %1401 = vmatmul.bf16.gmra.mxu0 %v1188_v31  ;;  %1439 = vmatmul.bf16.gmra.mxu2 %v1188_v31  ;;  %v3447_v30 = vld [vmem:[#allocation7 + $0xa4] sm:$0xf0]  ;;  %v3059_v32 = vld [vmem:[#allocation7] sm:$0xf]  ;;  %v3128_v44 = vor.u32 %v3442_v42, %v3125_v23  ;;  %v1789_v9 = vld [vmem:[%s4615_s9 + $0xb8] sm:$0xff] }
 0x17b   : > { %1727 = vmatpush.bf16.msrb.mxu3 %v3168_v45  ;;  %v3140_v31 = vor.u32 %v3447_v30, %v3139_v28  ;;  %v3123_v43 = vld [vmem:[#allocation7 + $0x80] sm:$0xf]  ;;  %v3443_v45 = vld [vmem:[#allocation7 + $0x84] sm:$0xf0] }
 0x17c   : > { %v1185_v35 = vmax.f32 %v1176_v33, 0.0  ;;  %v3427_v33 = vld [vmem:[#allocation7 + $0x4] sm:$0xf0]  ;;  %v3124_v46 = vor.u32 %v3443_v45, %v3123_v43  ;;  %v1222_v49 = vld [vmem:[%s4612_s6] sm:$0x3] }
 0x17d   : > { %1690 = vmatpush.bf16.msrb.mxu1 %v3156_v62  ;;  %v4189_v53 = vperm.slane %v1222_v49, 0  ;;  %v4207_v63 = vperm.slane %v1222_v49, 1  ;;  %v1782_v23 = vld [vmem:[%s4615_s9 + $0x80] sm:$0xff]  ;;  %v1783_v43 = vld [vmem:[%s4615_s9 + $0x88] sm:$0xff] }
 0x17e   : > { %v1189_v36 = vpack.c.bf16 %v1185_v35, %v1183_v34  ;;  %v3426_v34 = vld [vmem:[#allocation7 + $0x4] sm:$0xf]  ;;  %v3060_v35 = vor.u32 %v3427_v33, %v3059_v32  ;;  %v1787_v32 = vld [vmem:[%s4615_s9 + $0xa8] sm:$0xff] }
 0x17f   : > { %1728 = vmatpush.bf16.msrb.mxu3 %v3160_v59  ;;  %v1819_v45 = vld [vmem:[%s4615_s9 + $0x1a8] sm:$0xff]  ;;  %v1818_v49 = vld [vmem:[%s4615_s9 + $0x1a0] sm:$0xff] }
 0x180   : > { %1420 = vmatmul.bf16.gmra.mxu1 %v1189_v36  ;;  %1458 = vmatmul.bf16.gmra.mxu3 %v1189_v36  ;;  %v3061_v36 = vld [vmem:[#allocation7 + $0x8] sm:$0xf0] }
 0x181   : > { %1691 = vmatpush.bf16.msrb.mxu1 %v3148_v12  ;;  %v3064_v13 = vor.u32 %v3426_v34, %v3061_v36  ;;  %1675 = vmatpush.bf16.msrb.mxu0 %v3060_v35  ;;  %v1826_v12 = vld [vmem:[%s4615_s9 + $0x1e0] sm:$0xff]  ;;  %v1823_v34 = vld [vmem:[%s4615_s9 + $0x1c8] sm:$0xff] }
 0x182   : > { %v1822_v35 = vld [vmem:[%s4615_s9 + $0x1c0] sm:$0xff] }
 0x183   : > { %1729 = vmatpush.bf16.msrb.mxu3 %v3152_v7  ;;  %1713 = vmatpush.bf16.msrb.mxu2 %v3064_v13  ;;  %v1784_v13 = vld [vmem:[%s4615_s9 + $0x90] sm:$0xff] }
 0x185   : > { %1692 = vmatpush.bf16.msrb.mxu1 %v3140_v31  ;;  %1836 = vmatpush.msra.mxu0 %v1796_v56  ;;  %v1786_v31 = vld [vmem:[%s4615_s9 + $0xa0] sm:$0xff] }
 0x187   : > { %1730 = vmatpush.bf16.msrb.mxu3 %v3144_v29  ;;  %1894 = vmatpush.msra.mxu2 %v1797_v57 }
 0x188   : > { %1837 = vmatpush.msra.mxu0 %v1794_v58 }
 0x189   : > { %1693 = vmatpush.bf16.msrb.mxu1 %v3132_v8  ;;  %1895 = vmatpush.msra.mxu2 %v1795_v60 }
 0x18a   : > { %1838 = vmatpush.msra.mxu0 %v1792_v61 }
 0x18b   : > { %1731 = vmatpush.bf16.msrb.mxu3 %v3136_v40  ;;  %1896 = vmatpush.msra.mxu2 %v1793_v1  ;;  %v1821_v40 = vld [vmem:[%s4615_s9 + $0x1b8] sm:$0xff] }
 0x18c   : > { %1839 = vmatpush.msra.mxu0 %v1790_v10  ;;  %v1778_v10 = vld [vmem:[%s4615_s9 + $0x60] sm:$0xff] }
 0x18d   : > { %1694 = vmatpush.bf16.msrb.mxu1 %v3124_v46  ;;  %1897 = vmatpush.msra.mxu2 %v1791_v14  ;;  %v1780_v46 = vld [vmem:[%s4615_s9 + $0x70] sm:$0xff] }
 0x18e   : > { %1840 = vmatpush.msra.mxu0 %v1788_v27  ;;  %v1816_v14 = vld [vmem:[%s4615_s9 + $0x190] sm:$0xff]  ;;  %v1775_v27 = vld [vmem:[%s4615_s9 + $0x48] sm:$0xff] }
 0x18f   : > { %1732 = vmatpush.bf16.msrb.mxu3 %v3128_v44  ;;  %1898 = vmatpush.msra.mxu2 %v1789_v9  ;;  %v1811_v9 = vld [vmem:[%s4615_s9 + $0x168] sm:$0xff] }
 0x190   : > { %1841 = vmatpush.msra.mxu0 %v1786_v31  ;;  %v1809_v31 = vld [vmem:[%s4615_s9 + $0x158] sm:$0xff] }
 0x191   : > { %1865 = vmatpush.msra.mxu1 %v1828_v3  ;;  %1899 = vmatpush.msra.mxu2 %v1787_v32  ;;  %v1770_v32 = vld [vmem:[%s4615_s9 + $0x20] sm:$0xff] }
 0x192   : > { %1842 = vmatpush.msra.mxu0 %v1784_v13  ;;  %v1806_v13 = vld [vmem:[%s4615_s9 + $0x140] sm:$0xff] }
 0x193   : > { %1923 = vmatpush.msra.mxu3 %v1829_v2  ;;  %1866 = vmatpush.msra.mxu1 %v1826_v12  ;;  %v1815_v12 = vld [vmem:[%s4615_s9 + $0x188] sm:$0xff] }
 0x194   : > { %1900 = vmatpush.msra.mxu2 %v1785_v37  ;;  %1843 = vmatpush.msra.mxu0 %v1782_v23  ;;  %v1769_v37 = vld [vmem:[%s4615_s9 + $0x18] sm:$0xff] }
 0x195   : > { %1924 = vmatpush.msra.mxu3 %v1827_v6  ;;  %1867 = vmatpush.msra.mxu1 %v1824_v21  ;;  %v1777_v21 = vld [vmem:[%s4615_s9 + $0x58] sm:$0xff] }
 0x196   : > { %1901 = vmatpush.msra.mxu2 %v1783_v43  ;;  %1844 = vmatpush.msra.mxu0 %v1780_v46  ;;  %v1801_v23 = vld [vmem:[%s4615_s9 + $0x118] sm:$0xff]  ;;  %v1800_v43 = vld [vmem:[%s4615_s9 + $0x110] sm:$0xff] }
 0x197   : > { %1925 = vmatpush.msra.mxu3 %v1825_v20  ;;  %1868 = vmatpush.msra.mxu1 %v1822_v35  ;;  %v1814_v20 = vld [vmem:[%s4615_s9 + $0x180] sm:$0xff]  ;;  %v1807_v35 = vld [vmem:[%s4615_s9 + $0x148] sm:$0xff] }
 0x198   : > { %1845 = vmatpush.msra.mxu0 %v1778_v10  ;;  %v3237_v10 = vld [vmem:[#allocation9 + $0x68] sm:$0xf0] }
 0x199   : > { %1926 = vmatpush.msra.mxu3 %v1823_v34  ;;  %1869 = vmatpush.msra.mxu1 %v1820_v41  ;;  %v1771_v34 = vld [vmem:[%s4615_s9 + $0x28] sm:$0xff] }
 0x19a   : > { %v1767_v41 = vld [vmem:[%s4615_s9 + $0x8] sm:$0xff] }
 0x19b   : > { %1927 = vmatpush.msra.mxu3 %v1821_v40  ;;  %1870 = vmatpush.msra.mxu1 %v1818_v49  ;;  %v1804_v40 = vld [vmem:[%s4615_s9 + $0x130] sm:$0xff] }
 0x19d   : > { %1928 = vmatpush.msra.mxu3 %v1819_v45  ;;  %1871 = vmatpush.msra.mxu1 %v1816_v14  ;;  %v1798_v45 = vld [vmem:[%s4615_s9 + $0x100] sm:$0xff] }
 0x19f   : > { %1872 = vmatpush.msra.mxu1 %v1814_v20  ;;  %v3307_v20 = vld [vmem:[#allocation9 + $0xf0] sm:$0xf] }
 0x1e7   : > { %v1397_v48 = vpop.f32.mrf.mxu0 }
 0x1e8   : > { %v1398_v55 = vadd.f32 %v1397_v48, %v4189_v53 }
 0x1ed   : > { %v1416_v50 = vpop.f32.mrf.mxu1  ;;  %v1435_v51 = vpop.f32.mrf.mxu2 }
 0x1ee   : > { %v1417_v62 = vadd.f32 %v1416_v50, %v1398_v55  ;;  %v1436_v25 = vadd.f32 %v1435_v51, %v4207_v63  ;;  %v1781_v50 = vld [vmem:[%s4615_s9 + $0x78] sm:$0xff] }
 0x1ef   : > { %v1399_v54 = vpop.f32.mrf.mxu0  ;;  %1902 = vmatpush.msra.mxu2 %v1781_v50 }
 0x1f0   : > { %v1400_v0 = vadd.f32 %v1399_v54, %v4189_v53  ;;  %v1464_v24 = vmax.f32 %v1417_v62, 0.0  ;;  %v1817_v54 = vld [vmem:[%s4615_s9 + $0x198] sm:$0xff] }
 0x1f1   : > { %1929 = vmatpush.msra.mxu3 %v1817_v54 }
 0x1f3   : > { %v1454_v59 = vpop.f32.mrf.mxu3  ;;  %1930 = vmatpush.msra.mxu3 %v1815_v12  ;;  %v3488_v12 = vld [vmem:[#allocation9 + $0xf4] sm:$0xf] }
 0x1f4   : > { %v1455_v28 = vadd.f32 %v1454_v59, %v1436_v25  ;;  %v1774_v25 = vld [vmem:[%s4615_s9 + $0x40] sm:$0xff] }
 0x1f5   : > { %v1418_v4 = vpop.f32.mrf.mxu1  ;;  %v1437_v5 = vpop.f32.mrf.mxu2 }
 0x1f6   : > { %v1419_v7 = vadd.f32 %v1418_v4, %v1400_v0  ;;  %v1438_v30 = vadd.f32 %v1437_v5, %v4207_v63  ;;  %v1465_v8 = vmax.f32 %v1455_v28, 0.0  ;;  %v1772_v28 = vld [vmem:[%s4615_s9 + $0x30] sm:$0xff] }
 0x1f7   : > { %v1402_v18 = vpop.f32.mrf.mxu0 }
 0x1f8   : > { %v1466_v26 = vmax.f32 %v1419_v7, 0.0  ;;  %v1403_v51 = vadd.f32 %v1402_v18, %v4189_v53  ;;  %v1776_v18 = vld [vmem:[%s4615_s9 + $0x50] sm:$0xff] }
 0x1f9   : > { %1846 = vmatpush.msra.mxu0 %v1776_v18  ;;  %v3309_v18 = vld [vmem:[#allocation9 + $0xf8] sm:$0xf0] }
 0x1fa   : > { %v1472_v29 = vpack.c.bf16 %v1466_v26, %v1464_v24  ;;  %v1813_v24 = vld [vmem:[%s4615_s9 + $0x178] sm:$0xff]  ;;  %v1812_v26 = vld [vmem:[%s4615_s9 + $0x170] sm:$0xff] }
 0x1fb   : > { %v1456_v33 = vpop.f32.mrf.mxu3  ;;  %1931 = vmatpush.msra.mxu3 %v1813_v24  ;;  %1847 = vmatpush.msra.mxu0 %v1774_v25  ;;  %v3312_v25 = vor.u32 %v3488_v12, %v3309_v18  ;;  %v3485_v12 = vld [vmem:[#allocation9 + $0xd4] sm:$0xf0]  ;;  %v3211_v18 = vld [vmem:[#allocation9 + $0x30] sm:$0xf] }
 0x1fc   : > { %v1457_v36 = vadd.f32 %v1456_v33, %v1438_v30  ;;  %1676 = vmatmul.bf16.vlgmr.msrb.gmra.mxu0 %v1472_v29  ;;  %1714 = vmatmul.bf16.vlgmr.msrb.gmra.mxu2 %v1472_v29  ;;  %v1810_v29 = vld [vmem:[%s4615_s9 + $0x160] sm:$0xff]  ;;  %v1773_v30 = vld [vmem:[%s4615_s9 + $0x38] sm:$0xff]  ;;  %v1808_v33 = vld [vmem:[%s4615_s9 + $0x150] sm:$0xff] }
 0x1fd   : > { %v1421_v38 = vpop.f32.mrf.mxu1  ;;  %v1440_v39 = vpop.f32.mrf.mxu2  ;;  %1873 = vmatpush.msra.mxu1 %v1812_v26  ;;  %1932 = vmatpush.msra.mxu3 %v1811_v9  ;;  %v3227_v26 = vld [vmem:[#allocation9 + $0x50] sm:$0xf] }
 0x1fe   : > { %v1467_v42 = vmax.f32 %v1457_v36, 0.0  ;;  %v1422_v56 = vadd.f32 %v1421_v38, %v1403_v51  ;;  %v1441_v62 = vadd.f32 %v1440_v39, %v4207_v63  ;;  %1848 = vmatpush.msra.mxu0 %v1772_v28  ;;  %v1768_v36 = vld [vmem:[%s4615_s9 + $0x10] sm:$0xff]  ;;  %v1805_v38 = vld [vmem:[%s4615_s9 + $0x138] sm:$0xff]  ;;  %v1766_v39 = vld [vmem:[%s4615_s9] sm:$0xff] }
 0x1ff   : > { %v1404_v48 = vpop.f32.mrf.mxu0  ;;  %1874 = vmatpush.msra.mxu1 %v1810_v29  ;;  %1933 = vmatpush.msra.mxu3 %v1809_v31  ;;  %v3229_v31 = vld [vmem:[#allocation9 + $0x58] sm:$0xf0] }
 0x200   : > { %v1473_v44 = vpack.c.bf16 %v1467_v42, %v1465_v8  ;;  %v1405_v57 = vadd.f32 %v1404_v48, %v4189_v53  ;;  %v1468_v61 = vmax.f32 %v1422_v56, 0.0  ;;  %1849 = vmatpush.msra.mxu0 %v1770_v32  ;;  %v1803_v8 = vld [vmem:[%s4615_s9 + $0x128] sm:$0xff]  ;;  %v1802_v42 = vld [vmem:[%s4615_s9 + $0x120] sm:$0xff] }
 0x201   : > { %1875 = vmatpush.msra.mxu1 %v1808_v33  ;;  %1934 = vmatpush.msra.mxu3 %v1807_v35  ;;  %v1744_v48 = vld [vmem:[%s4614_s8] sm:$0x3]  ;;  %v3486_v32 = vld [vmem:[#allocation9 + $0xe4] sm:$0xf]  ;;  %v3301_v35 = vld [vmem:[#allocation9 + $0xe8] sm:$0xf0] }
 0x202   : > { %1695 = vmatmul.bf16.vlgmr.msrb.gmra.mxu1 %v1473_v44  ;;  %1733 = vmatmul.bf16.vlgmr.msrb.gmra.mxu3 %v1473_v44  ;;  %v1799_v44 = vld [vmem:[%s4615_s9 + $0x108] sm:$0xff]  ;;  %v4397_v50 = vperm.slane %v1744_v48, 0 }
 0x203   : > { %v1459_v55 = vpop.f32.mrf.mxu3  ;;  %1850 = vmatpush.msra.mxu0 %v1768_v36  ;;  %1876 = vmatpush.msra.mxu1 %v1806_v13  ;;  %v3299_v36 = vld [vmem:[#allocation9 + $0xe0] sm:$0xf] }
 0x204   : > { %v1460_v1 = vadd.f32 %v1459_v55, %v1441_v62  ;;  %1935 = vmatpush.msra.mxu3 %v1805_v38  ;;  %v3473_v62 = vld [vmem:[#allocation9 + $0x74] sm:$0xf0]  ;;  %v3487_v38 = vld [vmem:[#allocation9 + $0xe4] sm:$0xf0] }
 0x205   : > { %v1423_v58 = vpop.f32.mrf.mxu1  ;;  %v1442_v60 = vpop.f32.mrf.mxu2  ;;  %1851 = vmatpush.msra.mxu0 %v1766_v39  ;;  %1877 = vmatpush.msra.mxu1 %v1804_v40 }
 0x206   : > { %v1424_v59 = vadd.f32 %v1423_v58, %v1405_v57  ;;  %v1443_v2 = vadd.f32 %v1442_v60, %v4207_v63  ;;  %v1469_v6 = vmax.f32 %v1460_v1, 0.0  ;;  %v1779_v63 = vld [vmem:[%s4615_s9 + $0x68] sm:$0xff]  ;;  %1936 = vmatpush.msra.mxu3 %v1803_v8  ;;  %v4401_v60 = vperm.slane %v1744_v48, 1 }
 0x207   : > { %1903 = vmatpush.msra.mxu2 %v1779_v63  ;;  %1878 = vmatpush.msra.mxu1 %v1802_v42 }
 0x208   : > { %v1470_v0 = vmax.f32 %v1424_v59, 0.0  ;;  %1937 = vmatpush.msra.mxu3 %v1801_v23 }
 0x209   : > { %1904 = vmatpush.msra.mxu2 %v1777_v21  ;;  %1879 = vmatpush.msra.mxu1 %v1800_v43 }
 0x20a   : > { %v1474_v3 = vpack.c.bf16 %v1470_v0, %v1468_v61  ;;  %1938 = vmatpush.msra.mxu3 %v1799_v44  ;;  %v3243_v61 = vld [vmem:[#allocation9 + $0x70] sm:$0xf] }
 0x20b   : > { %v1461_v4 = vpop.f32.mrf.mxu3  ;;  %1905 = vmatpush.msra.mxu2 %v1775_v27  ;;  %1880 = vmatpush.msra.mxu1 %v1798_v45  ;;  %v3244_v1 = vor.u32 %v3473_v62, %v3243_v61  ;;  %v3469_v27 = vld [vmem:[#allocation9 + $0x54] sm:$0xf0] }
 0x20c   : > { %v1462_v5 = vadd.f32 %v1461_v4, %v1443_v2  ;;  %1681 = vmatmul.bf16.gmra.mxu0 %v1474_v3  ;;  %1719 = vmatmul.bf16.gmra.mxu2 %v1474_v3  ;;  %v3472_v2 = vld [vmem:[#allocation9 + $0x74] sm:$0xf]  ;;  %v3245_v3 = vld [vmem:[#allocation9 + $0x78] sm:$0xf0]  ;;  %v3228_v13 = vor.u32 %v3469_v27, %v3227_v26  ;;  %v3285_v27 = vld [vmem:[#allocation9 + $0xc8] sm:$0xf0] }
 0x20d   : > { %1906 = vmatpush.msra.mxu2 %v1773_v30  ;;  %2154 = vmatpush.bf16.msrb.mxu0 %v3244_v1  ;;  %v3468_v30 = vld [vmem:[#allocation9 + $0x54] sm:$0xf] }
 0x20e   : > { %v1471_v53 = vmax.f32 %v1462_v5, 0.0  ;;  %2211 = vmatpush.bf16.msrb.mxu3 %v3312_v25  ;;  %v3232_v42 = vor.u32 %v3468_v30, %v3229_v31  ;;  %v3213_v25 = vld [vmem:[#allocation9 + $0x38] sm:$0xf0]  ;;  %v3203_v31 = vld [vmem:[#allocation9 + $0x20] sm:$0xf] }
 0x20f   : > { %1907 = vmatpush.msra.mxu2 %v1771_v34 }
 0x210   : > { %v1475_v7 = vpack.c.bf16 %v1471_v53, %v1469_v6  ;;  %v3248_v6 = vor.u32 %v3472_v2, %v3245_v3  ;;  %v3471_v53 = vld [vmem:[#allocation9 + $0x64] sm:$0xf0] }
 0x211   : > { %1908 = vmatpush.msra.mxu2 %v1769_v37  ;;  %v3304_v37 = vor.u32 %v3486_v32, %v3301_v35  ;;  %v3463_v32 = vld [vmem:[#allocation9 + $0x24] sm:$0xf0]  ;;  %v3205_v35 = vld [vmem:[#allocation9 + $0x28] sm:$0xf0] }
 0x212   : > { %1700 = vmatmul.bf16.gmra.mxu1 %v1475_v7  ;;  %1738 = vmatmul.bf16.gmra.mxu3 %v1475_v7  ;;  %v3470_v7 = vld [vmem:[#allocation9 + $0x64] sm:$0xf] }
 0x213   : > { %1909 = vmatpush.msra.mxu2 %v1767_v41  ;;  %v3240_v28 = vor.u32 %v3470_v7, %v3237_v10  ;;  %v3300_v41 = vor.u32 %v3487_v38, %v3299_v36  ;;  %2212 = vmatpush.bf16.msrb.mxu3 %v3304_v37  ;;  %v3221_v10 = vld [vmem:[#allocation9 + $0x48] sm:$0xf0]  ;;  %v3277_v37 = vld [vmem:[#allocation9 + $0xb8] sm:$0xf0]  ;;  %v3275_v38 = vld [vmem:[#allocation9 + $0xb0] sm:$0xf] }
 0x215   : > { %2192 = vmatpush.bf16.msrb.mxu2 %v3248_v6  ;;  %v3467_v6 = vld [vmem:[#allocation9 + $0x44] sm:$0xf0] }
 0x219   : > { %2193 = vmatpush.bf16.msrb.mxu2 %v3240_v28  ;;  %v3283_v28 = vld [vmem:[#allocation9 + $0xc0] sm:$0xf] }
 0x21d   : > { %2194 = vmatpush.bf16.msrb.mxu2 %v3232_v42  ;;  %v3461_v42 = vld [vmem:[#allocation9 + $0x14] sm:$0xf0] }
 0x279   : > { %v1677_v46 = vpop.f32.mrf.mxu0 }
 0x27a   : > { %v1678_v49 = vadd.f32 %v1677_v46, %v4155_v19  ;;  %v3235_v19 = vld [vmem:[#allocation9 + $0x60] sm:$0xf] }
 0x27b   : > { %v3236_v63 = vor.u32 %v3471_v53, %v3235_v19  ;;  %v3466_v53 = vld [vmem:[#allocation9 + $0x44] sm:$0xf] }
 0x27d   : > { %2155 = vmatpush.bf16.msrb.mxu0 %v3236_v63 }
 0x27f   : > { %v1696_v51 = vpop.f32.mrf.mxu1  ;;  %v1715_v54 = vpop.f32.mrf.mxu2 }
 0x280   : > { %v1697_v55 = vadd.f32 %v1696_v51, %v1678_v49  ;;  %v1716_v59 = vadd.f32 %v1715_v54, %v4157_v22 }
 0x281   : > { %v1679_v56 = vpop.f32.mrf.mxu0  ;;  %2156 = vmatpush.bf16.msrb.mxu0 %v3228_v13  ;;  %v3480_v13 = vld [vmem:[#allocation9 + $0xb4] sm:$0xf] }
 0x282   : > { %v1750_v57 = vadd.f32 %v4397_v50, %v1697_v55  ;;  %v1680_v4 = vadd.f32 %v1679_v56, %v4159_v47  ;;  %v3489_v47 = vld [vmem:[#allocation9 + $0xf4] sm:$0xf0] }
 0x283   : > { %v3308_v29 = vor.u32 %v3489_v47, %v3307_v20  ;;  %v3465_v20 = vld [vmem:[#allocation9 + $0x34] sm:$0xf0]  ;;  %v3482_v47 = vld [vmem:[#allocation9 + $0xc4] sm:$0xf] }
 0x284   : > { %v1758_v58 = vmax.f32 %v1750_v57, 0.0 }
 0x285   : > { %v1734_v0 = vpop.f32.mrf.mxu3  ;;  %2173 = vmatpush.bf16.msrb.mxu1 %v3308_v29  ;;  %v3483_v29 = vld [vmem:[#allocation9 + $0xc4] sm:$0xf0] }
 0x286   : > { %v1735_v5 = vadd.f32 %v1734_v0, %v1716_v59  ;;  %1852 = vmatmul.f32.vlgmr.msra.gmra.mxu0 %v1758_v58  ;;  %1910 = vmatmul.f32.vlgmr.msra.gmra.mxu2 %v1758_v58  ;;  %v3284_v30 = vor.u32 %v3483_v29, %v3283_v28 }
 0x287   : > { %v1698_v14 = vpop.f32.mrf.mxu1  ;;  %v1717_v22 = vpop.f32.mrf.mxu2 }
 0x288   : > { %v1751_v21 = vadd.f32 %v4401_v60, %v1735_v5  ;;  %v1699_v24 = vadd.f32 %v1698_v14, %v1680_v4  ;;  %v1718_v39 = vadd.f32 %v1717_v22, %v4161_v52  ;;  %v3219_v5 = vld [vmem:[#allocation9 + $0x40] sm:$0xf]  ;;  %v3484_v14 = vld [vmem:[#allocation9 + $0xd4] sm:$0xf]  ;;  %v3291_v22 = vld [vmem:[#allocation9 + $0xd0] sm:$0xf] }
 0x289   : > { %v1682_v9 = vpop.f32.mrf.mxu0  ;;  %2174 = vmatpush.bf16.msrb.mxu1 %v3300_v41  ;;  %v3220_v7 = vor.u32 %v3467_v6, %v3219_v5  ;;  %v3475_v5 = vld [vmem:[#allocation9 + $0x84] sm:$0xf0] }
 0x28a   : > { %v1759_v33 = vmax.f32 %v1751_v21, 0.0  ;;  %v1752_v34 = vadd.f32 %v4397_v50, %v1699_v24  ;;  %v1683_v23 = vadd.f32 %v1682_v9, %v4163_v11  ;;  %v3292_v21 = vor.u32 %v3485_v12, %v3291_v22  ;;  %v3464_v24 = vld [vmem:[#allocation9 + $0x34] sm:$0xf]  ;;  %v2253_v22 = vld [vmem:[%s4619_s13 + $0x78] sm:$0xff] }
 0x28b   : > { %2157 = vmatpush.bf16.msrb.mxu0 %v3220_v7  ;;  %v3216_v26 = vor.u32 %v3464_v24, %v3213_v25  ;;  %v3288_v9 = vor.u32 %v3482_v47, %v3285_v27  ;;  %v1830_v7 = vld [vmem:[%s4616_s10] sm:$0x3]  ;;  %v2269_v12 = vld [vmem:[%s4619_s13 + $0xf8] sm:$0xff] }
 0x28c   : > { %1881 = vmatmul.f32.vlgmr.msra.gmra.mxu1 %v1759_v33  ;;  %1939 = vmatmul.f32.vlgmr.msra.gmra.mxu3 %v1759_v33  ;;  %v1760_v40 = vmax.f32 %v1752_v34, 0.0  ;;  %v3204_v33 = vor.u32 %v3463_v32, %v3203_v31  ;;  %v3462_v34 = vld [vmem:[#allocation9 + $0x24] sm:$0xf]  ;;  %v1833_v29 = vperm.slane %v1830_v7, 1  ;;  %v2249_v31 = vld [vmem:[%s4619_s13 + $0x58] sm:$0xff] }
 0x28d   : > { %v1736_v8 = vpop.f32.mrf.mxu3  ;;  %2175 = vmatpush.bf16.msrb.mxu1 %v3292_v21  ;;  %v3208_v36 = vor.u32 %v3462_v34, %v3205_v35  ;;  %v2250_v47 = vld [vmem:[%s4619_s13 + $0x60] sm:$0xff]  ;;  %v2248_v34 = vld [vmem:[%s4619_s13 + $0x50] sm:$0xff]  ;;  %v2265_v35 = vld [vmem:[%s4619_s13 + $0xd8] sm:$0xff] }
 0x28e   : > { %v1737_v43 = vadd.f32 %v1736_v8, %v1718_v39  ;;  %1855 = vmatmul.f32.gmra.mxu0 %v1760_v40  ;;  %1913 = vmatmul.f32.gmra.mxu2 %v1760_v40  ;;  %v3280_v39 = vor.u32 %v3480_v13, %v3277_v37  ;;  %v3481_v40 = vld [vmem:[#allocation9 + $0xb4] sm:$0xf0]  ;;  %v3195_v8 = vld [vmem:[#allocation9 + $0x10] sm:$0xf]  ;;  %v2247_v37 = vld [vmem:[%s4619_s13 + $0x48] sm:$0xff] }
 0x28f   : > { %v1701_v44 = vpop.f32.mrf.mxu1  ;;  %v1720_v45 = vpop.f32.mrf.mxu2  ;;  %v3276_v41 = vor.u32 %v3481_v40, %v3275_v38  ;;  %v2264_v38 = vld [vmem:[%s4619_s13 + $0xd0] sm:$0xff] }
 0x290   : > { %v1702_v46 = vadd.f32 %v1701_v44, %v1683_v23  ;;  %v1753_v48 = vadd.f32 %v4401_v60, %v1737_v43  ;;  %v1721_v54 = vadd.f32 %v1720_v45, %v4165_v15  ;;  %v3460_v23 = vld [vmem:[#allocation9 + $0x14] sm:$0xf]  ;;  %v3196_v43 = vor.u32 %v3461_v42, %v3195_v8  ;;  %v3197_v44 = vld [vmem:[#allocation9 + $0x18] sm:$0xf0]  ;;  %v2246_v8 = vld [vmem:[%s4619_s13 + $0x40] sm:$0xff] }
 0x291   : > { %v1684_v51 = vpop.f32.mrf.mxu0  ;;  %2176 = vmatpush.bf16.msrb.mxu1 %v3284_v30  ;;  %v3200_v45 = vor.u32 %v3460_v23, %v3197_v44  ;;  %v2263_v42 = vld [vmem:[%s4619_s13 + $0xc8] sm:$0xff] }
 0x292   : > { %v1761_v52 = vmax.f32 %v1753_v48, 0.0  ;;  %v1754_v49 = vadd.f32 %v4397_v50, %v1702_v46  ;;  %v1685_v56 = vadd.f32 %v1684_v51, %v4167_v16  ;;  %v3478_v46 = vld [vmem:[#allocation9 + $0xa4] sm:$0xf]  ;;  %v3269_v48 = vld [vmem:[#allocation9 + $0xa8] sm:$0xf0] }
 0x293   : > { %v3479_v51 = vld [vmem:[#allocation9 + $0xa4] sm:$0xf0] }
 0x294   : > { %1884 = vmatmul.f32.gmra.mxu1 %v1761_v52  ;;  %1942 = vmatmul.f32.gmra.mxu3 %v1761_v52  ;;  %v1762_v11 = vmax.f32 %v1754_v49, 0.0  ;;  %v3267_v52 = vld [vmem:[#allocation9 + $0xa0] sm:$0xf]  ;;  %v3272_v49 = vor.u32 %v3478_v46, %v3269_v48  ;;  %v2244_v46 = vld [vmem:[%s4619_s13 + $0x30] sm:$0xff] }
 0x295   : > { %v1739_v55 = vpop.f32.mrf.mxu3  ;;  %2177 = vmatpush.bf16.msrb.mxu1 %v3276_v41 }
 0x296   : > { %v1740_v57 = vadd.f32 %v1739_v55, %v1721_v54  ;;  %1858 = vmatmul.f32.gmra.mxu0 %v1762_v11  ;;  %1916 = vmatmul.f32.gmra.mxu2 %v1762_v11  ;;  %v3268_v54 = vor.u32 %v3479_v51, %v3267_v52  ;;  %v3187_v11 = vld [vmem:[#allocation9] sm:$0xf]  ;;  %v3459_v55 = vld [vmem:[#allocation9 + $0x4] sm:$0xf0] }
 0x297   : > { %v1703_v58 = vpop.f32.mrf.mxu1  ;;  %v1722_v62 = vpop.f32.mrf.mxu2 }
 0x298   : > { %v1704_v59 = vadd.f32 %v1703_v58, %v1685_v56  ;;  %v1755_v61 = vadd.f32 %v4401_v60, %v1740_v57  ;;  %v1723_v2 = vadd.f32 %v1722_v62, %v4172_v17  ;;  %v3293_v17 = vld [vmem:[#allocation9 + $0xd8] sm:$0xf0]  ;;  %v3458_v56 = vld [vmem:[#allocation9 + $0x4] sm:$0xf]  ;;  %v3188_v57 = vor.u32 %v3459_v55, %v3187_v11  ;;  %v3189_v58 = vld [vmem:[#allocation9 + $0x8] sm:$0xf0] }
 0x299   : > { %v3296_v63 = vor.u32 %v3484_v14, %v3293_v17  ;;  %2178 = vmatpush.bf16.msrb.mxu1 %v3268_v54  ;;  %v3261_v62 = vld [vmem:[#allocation9 + $0x98] sm:$0xf0]  ;;  %v4419_v17 = vperm.slane %v1830_v7, 0  ;;  %v2258_v7 = vld [vmem:[%s4619_s13 + $0xa0] sm:$0xff] }
 0x29a   : > { %v1763_v0 = vmax.f32 %v1755_v61, 0.0  ;;  %v1756_v1 = vadd.f32 %v4397_v50, %v1704_v59  ;;  %v3224_v50 = vor.u32 %v3466_v53, %v3221_v10  ;;  %v3192_v59 = vor.u32 %v3458_v56, %v3189_v58  ;;  %v3476_v61 = vld [vmem:[#allocation9 + $0x94] sm:$0xf] }
 0x29b   : > { %2213 = vmatpush.bf16.msrb.mxu3 %v3296_v63  ;;  %v2252_v63 = vld [vmem:[%s4619_s13 + $0x70] sm:$0xff] }
 0x29c   : > { %1887 = vmatmul.f32.gmra.mxu1 %v1763_v0  ;;  %1945 = vmatmul.f32.gmra.mxu3 %v1763_v0  ;;  %v1764_v15 = vmax.f32 %v1756_v1, 0.0  ;;  %v3259_v0 = vld [vmem:[#allocation9 + $0x90] sm:$0xf]  ;;  %v3264_v1 = vor.u32 %v3476_v61, %v3261_v62 }
 0x29d   : > { %v1741_v3 = vpop.f32.mrf.mxu3  ;;  %2195 = vmatpush.bf16.msrb.mxu2 %v3224_v50 }
 0x29e   : > { %v1742_v19 = vadd.f32 %v1741_v3, %v1723_v2  ;;  %1861 = vmatmul.f32.gmra.mxu0 %v1764_v15  ;;  %1919 = vmatmul.f32.gmra.mxu2 %v1764_v15  ;;  %v3477_v2 = vld [vmem:[#allocation9 + $0x94] sm:$0xf0]  ;;  %v3474_v3 = vld [vmem:[#allocation9 + $0x84] sm:$0xf] }
 0x29f   : > { %2214 = vmatpush.bf16.msrb.mxu3 %v3288_v9  ;;  %v3260_v15 = vor.u32 %v3477_v2, %v3259_v0  ;;  %v2266_v9 = vld [vmem:[%s4619_s13 + $0xe0] sm:$0xff]  ;;  %v2243_v2 = vld [vmem:[%s4619_s13 + $0x28] sm:$0xff] }
 0x2a0   : > { %v1757_v16 = vadd.f32 %v4401_v60, %v1742_v19  ;;  %v3212_v60 = vor.u32 %v3465_v20, %v3211_v18  ;;  %v3253_v19 = vld [vmem:[#allocation9 + $0x88] sm:$0xf0]  ;;  %v2268_v20 = vld [vmem:[%s4619_s13 + $0xf0] sm:$0xff] }
 0x2a1   : > { %2196 = vmatpush.bf16.msrb.mxu2 %v3216_v26  ;;  %2179 = vmatpush.bf16.msrb.mxu1 %v3260_v15  ;;  %v2251_v18 = vld [vmem:[%s4619_s13 + $0x68] sm:$0xff]  ;;  %v2262_v15 = vld [vmem:[%s4619_s13 + $0xc0] sm:$0xff] }
 0x2a2   : > { %v1765_v4 = vmax.f32 %v1757_v16, 0.0  ;;  %2158 = vmatpush.bf16.msrb.mxu0 %v3212_v60  ;;  %v3251_v16 = vld [vmem:[#allocation9 + $0x80] sm:$0xf]  ;;  %v2267_v60 = vld [vmem:[%s4619_s13 + $0xe8] sm:$0xff] }
 0x2a3   : > { %2215 = vmatpush.bf16.msrb.mxu3 %v3280_v39  ;;  %v3252_v6 = vor.u32 %v3475_v5, %v3251_v16  ;;  %v2241_v16 = vld [vmem:[%s4619_s13 + $0x18] sm:$0xff]  ;;  %v2240_v5 = vld [vmem:[%s4619_s13 + $0x10] sm:$0xff] }
 0x2a4   : > { %1890 = vmatmul.f32.gmra.mxu1 %v1765_v4  ;;  %1948 = vmatmul.f32.gmra.mxu3 %v1765_v4  ;;  %v3256_v4 = vor.u32 %v3474_v3, %v3253_v19  ;;  %v2242_v3 = vld [vmem:[%s4619_s13 + $0x20] sm:$0xff]  ;;  %v2261_v19 = vld [vmem:[%s4619_s13 + $0xb8] sm:$0xff] }
 0x2a5   : > { %2197 = vmatpush.bf16.msrb.mxu2 %v3208_v36  ;;  %2180 = vmatpush.bf16.msrb.mxu1 %v3252_v6  ;;  %v2259_v6 = vld [vmem:[%s4619_s13 + $0xa8] sm:$0xff] }
 0x2a6   : > { %2159 = vmatpush.bf16.msrb.mxu0 %v3204_v33 }
 0x2a7   : > { %2216 = vmatpush.bf16.msrb.mxu3 %v3272_v49 }
 0x2a9   : > { %2198 = vmatpush.bf16.msrb.mxu2 %v3200_v45  ;;  %2303 = vmatpush.msra.mxu1 %v2269_v12  ;;  %v2245_v45 = vld [vmem:[%s4619_s13 + $0x38] sm:$0xff] }
 0x2aa   : > { %2160 = vmatpush.bf16.msrb.mxu0 %v3196_v43 }
 0x2ab   : > { %2217 = vmatpush.bf16.msrb.mxu3 %v3264_v1  ;;  %2304 = vmatpush.msra.mxu1 %v2268_v20 }
 0x2ad   : > { %2199 = vmatpush.bf16.msrb.mxu2 %v3192_v59  ;;  %2305 = vmatpush.msra.mxu1 %v2267_v60 }
 0x2ae   : > { %2161 = vmatpush.bf16.msrb.mxu0 %v3188_v57 }
 0x2af   : > { %2218 = vmatpush.bf16.msrb.mxu3 %v3256_v4  ;;  %2306 = vmatpush.msra.mxu1 %v2266_v9  ;;  %v2260_v4 = vld [vmem:[%s4619_s13 + $0xb0] sm:$0xff] }
 0x2b1   : > { %3493 = vmatpush.msra.mxu2 %v2253_v22  ;;  %2307 = vmatpush.msra.mxu1 %v2265_v35 }
 0x2b2   : > { %2274 = vmatpush.msra.mxu0 %v2253_v22  ;;  %v2254_v22 = vld [vmem:[%s4619_s13 + $0x80] sm:$0xff] }
 0x2b3   : > { %3509 = vmatpush.msra.mxu3 %v2269_v12  ;;  %3494 = vmatpush.msra.mxu2 %v2252_v63 }
 0x2b4   : > { %2275 = vmatpush.msra.mxu0 %v2252_v63  ;;  %2308 = vmatpush.msra.mxu1 %v2264_v38  ;;  %v1988_v63 = vld [vmem:[%s4618_s12] sm:$0x3] }
 0x2b5   : > { %3510 = vmatpush.msra.mxu3 %v2268_v20  ;;  %3495 = vmatpush.msra.mxu2 %v2251_v18 }
 0x2b6   : > { %2276 = vmatpush.msra.mxu0 %v2251_v18  ;;  %2309 = vmatpush.msra.mxu1 %v2263_v42  ;;  %v1990_v18 = vperm.slane %v1988_v63, 0 }
 0x2b7   : > { %3511 = vmatpush.msra.mxu3 %v2267_v60  ;;  %3496 = vmatpush.msra.mxu2 %v2250_v47 }
 0x2b8   : > { %2277 = vmatpush.msra.mxu0 %v2250_v47  ;;  %2310 = vmatpush.msra.mxu1 %v2262_v15 }
 0x2b9   : > { %3512 = vmatpush.msra.mxu3 %v2266_v9  ;;  %3497 = vmatpush.msra.mxu2 %v2249_v31 }
 0x2ba   : > { %2278 = vmatpush.msra.mxu0 %v2249_v31  ;;  %2311 = vmatpush.msra.mxu1 %v2261_v19 }
 0x2bb   : > { %3498 = vmatpush.msra.mxu2 %v2248_v34  ;;  %3513 = vmatpush.msra.mxu3 %v2265_v35 }
 0x2bc   : > { %2279 = vmatpush.msra.mxu0 %v2248_v34  ;;  %2312 = vmatpush.msra.mxu1 %v2260_v4 }
 0x2bd   : > { %3499 = vmatpush.msra.mxu2 %v2247_v37  ;;  %3514 = vmatpush.msra.mxu3 %v2264_v38 }
 0x2be   : > { %2280 = vmatpush.msra.mxu0 %v2247_v37  ;;  %2313 = vmatpush.msra.mxu1 %v2259_v6 }
 0x2bf   : > { %3500 = vmatpush.msra.mxu2 %v2246_v8  ;;  %3515 = vmatpush.msra.mxu3 %v2263_v42 }
 0x2c0   : > { %2281 = vmatpush.msra.mxu0 %v2246_v8  ;;  %2314 = vmatpush.msra.mxu1 %v2258_v7 }
 0x2c1   : > { %3501 = vmatpush.msra.mxu2 %v2245_v45  ;;  %3516 = vmatpush.msra.mxu3 %v2262_v15 }
 0x2c2   : > { %2282 = vmatpush.msra.mxu0 %v2245_v45 }
 0x2c3   : > { %3502 = vmatpush.msra.mxu2 %v2244_v46  ;;  %3517 = vmatpush.msra.mxu3 %v2261_v19 }
 0x2c4   : > { %2283 = vmatpush.msra.mxu0 %v2244_v46 }
 0x2c5   : > { %3503 = vmatpush.msra.mxu2 %v2243_v2  ;;  %3518 = vmatpush.msra.mxu3 %v2260_v4 }
 0x2c6   : > { %2284 = vmatpush.msra.mxu0 %v2243_v2 }
 0x2c7   : > { %3504 = vmatpush.msra.mxu2 %v2242_v3  ;;  %3519 = vmatpush.msra.mxu3 %v2259_v6 }
 0x2c8   : > { %2285 = vmatpush.msra.mxu0 %v2242_v3 }
 0x2c9   : > { %3505 = vmatpush.msra.mxu2 %v2241_v16  ;;  %3520 = vmatpush.msra.mxu3 %v2258_v7 }
 0x2ca   : > { %2286 = vmatpush.msra.mxu0 %v2241_v16 }
 0x2cb   : > { %3506 = vmatpush.msra.mxu2 %v2240_v5 }
 0x2cc   : > { %2287 = vmatpush.msra.mxu0 %v2240_v5 }
 0x303   : > { %v1853_v53 = vpop.f32.mrf.mxu0 }
 0x304   : > { %v1854_v24 = vadd.f32 %v1853_v53, %v4419_v17  ;;  %v2239_v53 = vld [vmem:[%s4619_s13 + $0x8] sm:$0xff] }
 0x305   : > { %2288 = vmatpush.msra.mxu0 %v2239_v53  ;;  %3507 = vmatpush.msra.mxu2 %v2239_v53 }
 0x309   : > { %v1882_v10 = vpop.f32.mrf.mxu1  ;;  %v1911_v50 = vpop.f32.mrf.mxu2 }
 0x30a   : > { %v1883_v28 = vadd.f32 %v1882_v10, %v1854_v24  ;;  %v1912_v36 = vadd.f32 %v1911_v50, %v1833_v29  ;;  %v2238_v10 = vld [vmem:[%s4619_s13] sm:$0xff]  ;;  %v2257_v50 = vld [vmem:[%s4619_s13 + $0x98] sm:$0xff] }
 0x30b   : > { %v1856_v14 = vpop.f32.mrf.mxu0  ;;  %2289 = vmatpush.msra.mxu0 %v2238_v10  ;;  %2315 = vmatpush.msra.mxu1 %v2257_v50 }
 0x30c   : > { %v1857_v25 = vadd.f32 %v1856_v14, %v4419_v17  ;;  %v2256_v14 = vld [vmem:[%s4619_s13 + $0x90] sm:$0xff]  ;;  %3521 = vmatpush.msra.mxu3 %v2257_v50  ;;  %3508 = vmatpush.msra.mxu2 %v2238_v10 }
 0x30d   : > { %2316 = vmatpush.msra.mxu1 %v2256_v14 }
 0x30e   : > { %3522 = vmatpush.msra.mxu3 %v2256_v14 }
 0x30f   : > { %v1940_v21 = vpop.f32.mrf.mxu3 }
 0x310   : > { %v1941_v40 = vadd.f32 %v1940_v21, %v1912_v36 }
 0x311   : > { %v1885_v26 = vpop.f32.mrf.mxu1  ;;  %v1914_v27 = vpop.f32.mrf.mxu2 }
 0x312   : > { %v1886_v30 = vadd.f32 %v1885_v26, %v1857_v25  ;;  %v1915_v13 = vadd.f32 %v1914_v27, %v1833_v29  ;;  %v1991_v25 = vperm.slane %v1988_v63, 1 }
 0x313   : > { %v1859_v32 = vpop.f32.mrf.mxu0 }
 0x314   : > { %v1952_v33 = vpack.c.bf16 %v1886_v30, %v1883_v28  ;;  %v1860_v49 = vadd.f32 %v1859_v32, %v4419_v17 }
 0x316   : > { %2162 = vmatmul.bf16.vlgmr.msrb.gmra.mxu0 %v1952_v33  ;;  %2200 = vmatmul.bf16.vlgmr.msrb.gmra.mxu2 %v1952_v33 }
 0x317   : > { %v1943_v39 = vpop.f32.mrf.mxu3 }
 0x318   : > { %v1944_v41 = vadd.f32 %v1943_v39, %v1915_v13 }
 0x319   : > { %v1888_v23 = vpop.f32.mrf.mxu1  ;;  %v1917_v43 = vpop.f32.mrf.mxu2 }
 0x31a   : > { %v1953_v44 = vpack.c.bf16 %v1944_v41, %v1941_v40  ;;  %v1889_v11 = vadd.f32 %v1888_v23, %v1860_v49  ;;  %v1918_v58 = vadd.f32 %v1917_v43, %v1833_v29 }
 0x31b   : > { %v1862_v48 = vpop.f32.mrf.mxu0 }
 0x31c   : > { %2181 = vmatmul.bf16.vlgmr.msrb.gmra.mxu1 %v1953_v44  ;;  %2219 = vmatmul.bf16.vlgmr.msrb.gmra.mxu3 %v1953_v44  ;;  %v1863_v51 = vadd.f32 %v1862_v48, %v4419_v17  ;;  %v2255_v17 = vld [vmem:[%s4619_s13 + $0x88] sm:$0xff] }
 0x31d   : > { %2317 = vmatpush.msra.mxu1 %v2255_v17  ;;  %3523 = vmatpush.msra.mxu3 %v2255_v17 }
 0x31f   : > { %v1946_v52 = vpop.f32.mrf.mxu3  ;;  %2318 = vmatpush.msra.mxu1 %v2254_v22  ;;  %3524 = vmatpush.msra.mxu3 %v2254_v22 }
 0x320   : > { %v1947_v62 = vadd.f32 %v1946_v52, %v1918_v58 }
 0x321   : > { %v1891_v54 = vpop.f32.mrf.mxu1  ;;  %v1920_v56 = vpop.f32.mrf.mxu2 }
 0x322   : > { %v1892_v55 = vadd.f32 %v1891_v54, %v1863_v51  ;;  %v1921_v59 = vadd.f32 %v1920_v56, %v1833_v29 }
 0x324   : > { %v1954_v57 = vpack.c.bf16 %v1892_v55, %v1889_v11 }
 0x326   : > { %2167 = vmatmul.bf16.gmra.mxu0 %v1954_v57  ;;  %2205 = vmatmul.bf16.gmra.mxu2 %v1954_v57 }
 0x327   : > { %v1949_v61 = vpop.f32.mrf.mxu3 }
 0x328   : > { %v1950_v0 = vadd.f32 %v1949_v61, %v1921_v59  ;;  %v3668_v59 = vld [vmem:[%s4646_s19] ss:$0 sm:$0xff]  ;;  %v2332_v61 = vlaneseq }
 0x32a   : > { %v1955_v1 = vpack.c.bf16 %v1950_v0, %v1947_v62  ;;  %v2333_v2 = vand.u32 127, %v2332_v61 }
 0x32c   : > { %2186 = vmatmul.bf16.gmra.mxu1 %v1955_v1  ;;  %2224 = vmatmul.bf16.gmra.mxu3 %v1955_v1  ;;  %vm2334_vm2 = vcmp.ge.s32.totalorder %v2333_v2, 7  ;;  %vm2335_vm3 = vcmp.lt.s32.totalorder %v2333_v2, 10 }
 0x32d   : > { %vm4528_vm4 = vmand %vm2334_vm2, %vm2335_vm3 }
 0x393   : > { %v2163_v12 = vpop.f32.mrf.mxu0 }
 0x394   : > { %v2164_v20 = vadd.f32 %v2163_v12, %v1990_v18 }
 0x399   : > { %v2182_v21 = vpop.f32.mrf.mxu1  ;;  %v2201_v60 = vpop.f32.mrf.mxu2 }
 0x39a   : > { %v2183_v24 = vadd.f32 %v2182_v21, %v2164_v20  ;;  %v2202_v27 = vadd.f32 %v2201_v60, %v1991_v25 }
 0x39b   : > { %v2165_v47 = vpop.f32.mrf.mxu0 }
 0x39c   : > { %v2230_v26 = vmax.f32 %v2183_v24, 0.0  ;;  %v2166_v28 = vadd.f32 %v2165_v47, %v1990_v18 }
 0x39e   : > { %2290 = vmatmul.f32.vlgmr.msra.gmra.mxu0 %v2230_v26 }
 0x39f   : > { %v2220_v9 = vpop.f32.mrf.mxu3 }
 0x3a0   : > { %v2221_v29 = vadd.f32 %v2220_v9, %v2202_v27 }
 0x3a1   : > { %v2184_v30 = vpop.f32.mrf.mxu1  ;;  %v2203_v31 = vpop.f32.mrf.mxu2 }
 0x3a2   : > { %v2231_v32 = vmax.f32 %v2221_v29, 0.0  ;;  %v2185_v33 = vadd.f32 %v2184_v30, %v2166_v28  ;;  %v2204_v36 = vadd.f32 %v2203_v31, %v1991_v25 }
 0x3a3   : > { %v2168_v34 = vpop.f32.mrf.mxu0 }
 0x3a4   : > { %v2232_v35 = vmax.f32 %v2185_v33, 0.0  ;;  %2319 = vmatmul.f32.vlgmr.msra.gmra.mxu1 %v2231_v32  ;;  %v2169_v37 = vadd.f32 %v2168_v34, %v1990_v18 }
 0x3a6   : > { %2293 = vmatmul.f32.gmra.mxu0 %v2232_v35 }
 0x3a7   : > { %v2222_v13 = vpop.f32.mrf.mxu3 }
 0x3a8   : > { %v2223_v38 = vadd.f32 %v2222_v13, %v2204_v36 }
 0x3a9   : > { %v2187_v39 = vpop.f32.mrf.mxu1  ;;  %v2206_v40 = vpop.f32.mrf.mxu2 }
 0x3aa   : > { %v2233_v41 = vmax.f32 %v2223_v38, 0.0  ;;  %v2188_v8 = vadd.f32 %v2187_v39, %v2169_v37  ;;  %v2207_v43 = vadd.f32 %v2206_v40, %v1991_v25 }
 0x3ab   : > { %v2170_v23 = vpop.f32.mrf.mxu0 }
 0x3ac   : > { %v2234_v42 = vmax.f32 %v2188_v8, 0.0  ;;  %2322 = vmatmul.f32.gmra.mxu1 %v2233_v41  ;;  %v2171_v45 = vadd.f32 %v2170_v23, %v1990_v18 }
 0x3ae   : > { %2296 = vmatmul.f32.vlgmr.msra.gmra.mxu2 %v2234_v42 }
 0x3af   : > { %v2225_v44 = vpop.f32.mrf.mxu3 }
 0x3b0   : > { %v2226_v46 = vadd.f32 %v2225_v44, %v2207_v43 }
 0x3b1   : > { %v2189_v48 = vpop.f32.mrf.mxu1  ;;  %v2208_v51 = vpop.f32.mrf.mxu2 }
 0x3b2   : > { %v2235_v52 = vmax.f32 %v2226_v46, 0.0  ;;  %v2190_v49 = vadd.f32 %v2189_v48, %v2171_v45  ;;  %v2209_v11 = vadd.f32 %v2208_v51, %v1991_v25 }
 0x3b4   : > { %v2236_v54 = vmax.f32 %v2190_v49, 0.0  ;;  %2325 = vmatmul.f32.vlgmr.msra.gmra.mxu3 %v2235_v52 }
 0x3b6   : > { %2299 = vmatmul.f32.gmra.mxu2 %v2236_v54 }
 0x3b7   : > { %v2227_v55 = vpop.f32.mrf.mxu3 }
 0x3b8   : > { %v2228_v56 = vadd.f32 %v2227_v55, %v2209_v11 }
 0x3ba   : > { %v2237_v57 = vmax.f32 %v2228_v56, 0.0 }
 0x3bc   : > { %2328 = vmatmul.f32.gmra.mxu3 %v2237_v57 }
 0x41b   : > { %v2291_v58 = vpop.f32.mrf.mxu0 }
 0x41c   : > { %v2292_v62 = vadd.f32 %v3668_v59, %v2291_v58 }
 0x421   : > { %v2320_v0 = vpop.f32.mrf.mxu1 }
 0x422   : > { %v2321_v1 = vadd.f32 %v2320_v0, %v2292_v62 }
 0x423   : > { %v2294_v15 = vpop.f32.mrf.mxu0 }
 0x424   : > { %3669 = vtanh.f32 %v2321_v1  ;;  %v2295_v3 = vadd.f32 %v3668_v59, %v2294_v15 }
 0x429   : > { %v2323_v19 = vpop.f32.mrf.mxu1 }
 0x42a   : > { %v3670_v16 = vpop.eup %3669  ;;  %v2324_v5 = vadd.f32 %v2323_v19, %v2295_v3 }
 0x42b   : > { %v2341_v6 = vmul.f32 0.6931472, %v3670_v16 }
 0x42c   : > { %3671 = vtanh.f32 %v2324_v5 }
 0x42d   : > { %v2345_v53 = vsel %vm4528_vm4, %v2341_v6, %v2321_v1 }
 0x42e   : > { %2350 = vst.msk [vmem:[%s4534_s16] sm:$0xff] %vm2349_vm5, %v2345_v53 }
 0x431   : > { %v2297_v7 = vpop.f32.mrf.mxu2 }
 0x432   : > { %v3672_v10 = vpop.eup %3671  ;;  %v2298_v17 = vadd.f32 %v3668_v59, %v2297_v7 }
 0x433   : > { %v2342_v50 = vmul.f32 0.6931472, %v3672_v10 }
 0x435   : > { %v2346_v14 = vsel %vm4528_vm4, %v2342_v50, %v2324_v5 }
 0x436   : > { %2351 = vst.msk [vmem:[%s4534_s16 + $0x8] sm:$0xff] %vm2349_vm5, %v2346_v14 }
 0x437   : > { %v2326_v22 = vpop.f32.mrf.mxu3 }
 0x438   : > { %v2327_v63 = vadd.f32 %v2326_v22, %v2298_v17 }
 0x439   : > { %v2300_v12 = vpop.f32.mrf.mxu2 }
 0x43a   : > { %3673 = vtanh.f32 %v2327_v63  ;;  %v2301_v18 = vadd.f32 %v3668_v59, %v2300_v12 }
 0x43f   : > { %v2329_v20 = vpop.f32.mrf.mxu3 }
 0x440   : > { %v3674_v21 = vpop.eup %3673  ;;  %v2330_v60 = vadd.f32 %v2329_v20, %v2301_v18 }
 0x441   : > { %v2343_v24 = vmul.f32 0.6931472, %v3674_v21 }
 0x442   : > { %3675 = vtanh.f32 %v2330_v60 }
 0x443   : > { %v2347_v25 = vsel %vm4528_vm4, %v2343_v24, %v2327_v63 }
 0x444   : > { %2352 = vst.msk [vmem:[%s4534_s16 + $0x10] sm:$0xff] %vm2349_vm5, %v2347_v25 }
 0x448   : > { %v3676_v47 = vpop.eup %3675  ;;  %2360 = sbr.rel (!%p4041_p4) target bundleno = 1140 (0x474), region = 104 }
 0x449   : > { %v2344_v26 = vmul.f32 0.6931472, %v3676_v47 }
 0x44b   : > { %v2348_v27 = vsel %vm4528_vm4, %v2344_v26, %v2330_v60 }
 0x44c   : > { %2353 = vst.msk [vmem:[%s4534_s16 + $0x18] sm:$0xff] %vm2349_vm5, %v2348_v27 }
 0x44d   : > { %s4658_s14 = smov (!%p2363_p11, %s2362_s14), 4 }
 0x44e   : > { %s3315_s28 = sshll.u32 %s4658_s14, 3 }
 0x44f   : > { %p3318_p12 = scmp.eq.s32.totalorder %s3315_s28, 0 }
 0x450   : > { %s4563_s29 = sshrl.u32 (!%p3318_p12), %s4658_s14, 2 }
 0x451   : > { %2371 = sbr.rel (%p3318_p12) target bundleno = 1140 (0x474), region = 108  ;;  %p3319_p13 = scmp.le.s32.totalorder (!%p3318_p12), %s4563_s29, 0 }
 0x456   : > { %2543 = sbr.rel (%p3319_p13) target bundleno = 1123 (0x463), region = 185  ;;  %s4651_s21 = smov (!%p3319_p13), %s4557_s23 }
 0x457   : > { %s4652_s1 = smov (!%p3319_p13), %s4534_s16  ;;  %s4572_s20 = smov (!%p3319_p13), 0  }
 0x458   : > { %s3907_s24 = smov (!%p3319_p13), 0  }
 0x45b LB: >> { %v2440_v9 = vld [vmem:[%s3901_s1] sm:$0xff]  ;;  %v2442_v28 = vld [vmem:[%s3901_s1 + $0x8] sm:$0xff]  ;;  %v2444_v29 = vld [vmem:[%s3901_s1 + $0x10] sm:$0xff]  ;;  %s2448_s30 = sadd.s32 1, %s3905_s20  ;;  %s2434_s24 = sadd.s32 1, %s3909_s24   ;;  %s3909_s24 = sphi %s3907_s24, %s2434_s24   ;;  %s3905_s20 = sphi %s4572_s20, %s4653_s20   ;;  %s3901_s1 = sphi %s4652_s1, %s2453_s1   ;;  %s3897_s21 = sphi %s4651_s21, %s2454_s21  }
 0x45c   : >> { %2441 = vst [vmem:[%s3897_s21] sm:$0xff] %v2440_v9  ;;  %v2446_v30 = vld [vmem:[%s3901_s1 + $0x18] sm:$0xff]  ;;  %p2449_p0 = scmp.ge.s32.totalorder %s2448_s30, %s4563_s29  ;;  %p2433_p1 = scmp.ge.s32.totalorder %s2434_s24, %s4563_s29 }
 0x45d   : >> { %2443 = vst [vmem:[%s3897_s21 + $0x8] sm:$0xff] %v2442_v28 }
 0x45e   : >> { %2445 = vst [vmem:[%s3897_s21 + $0x10] sm:$0xff] %v2444_v29  ;;  %s4660_s30 = smov (%p2449_p0, %s2448_s30), 0  ;;  %2436 = sbr.rel (!%p2433_p1) target bundleno = 1115 (0x45b), region = 191 }
 0x45f   : >> { %2447 = vst [vmem:[%s3897_s21 + $0x18] sm:$0xff] %v2446_v30  ;;  %s3320_s17 = sshll.u32 %s4660_s30, 5  ;;  %s4653_s20 = smov %s4660_s30 }
 0x460   : >> { %s2453_s1 = scalar_lea.vmem %s4534_s16, %s3320_s17 [#allocation10]   ;;  %s2454_s21 = scalar_lea.vmem %s4557_s23, %s3320_s17  }
 0x463 PF: > { %s4588_s3 = sand.u32 3, %s4658_s14   ;;  %s3491_s19 = sshll.u32 %s4563_s29, 5 }
 0x464   : > { %s2459_s22 = scalar_lea.vmem %s4534_s16, %s3491_s19 [#allocation10]   ;;  %s2461_s25 = scalar_lea.vmem %s4557_s23, %s3491_s19  }
 0x465   : > { %p3325_p2 = scmp.le.s32.totalorder %s4588_s3, 0 }
 0x466   : > { %s3911_s7 = smov (!%p3325_p2), %s2461_s25   ;;  %s3915_s15 = smov (!%p3325_p2), %s2459_s22  }
 0x467   : > { %2557 = sbr.rel (%p3325_p2) target bundleno = 1140 (0x474), region = 196  ;;  %s3919_s18 = smov (!%p3325_p2), 0  }
 0x468   : > { %s3923_s26 = smov (!%p3325_p2), 0  }
 0x46c LB: >> { %v2471_v31 = vld [vmem:[%s3917_s15] sm:$0xff]  ;;  %s2473_s14 = sadd.s32 1, %s3921_s18  ;;  %s2465_s26 = sadd.s32 1, %s3925_s26   ;;  %s3925_s26 = sphi %s3923_s26, %s2465_s26   ;;  %s3921_s18 = sphi %s3919_s18, %s3920_s18   ;;  %s3917_s15 = sphi %s3915_s15, %s2478_s15   ;;  %s3913_s7 = sphi %s3911_s7, %s2479_s7  }
 0x46d   : >> { %2472 = vst [vmem:[%s3913_s7] sm:$0xff] %v2471_v31  ;;  %p2474_p3 = scmp.ge.s32.totalorder %s2473_s14, %s4588_s3  ;;  %p2464_p4 = scmp.ge.s32.totalorder %s2465_s26, %s4588_s3 }
 0x46f   : >> { %s4662_s14 = smov (%p2474_p3, %s2473_s14), 0  ;;  %2467 = sbr.rel (!%p2464_p4) target bundleno = 1132 (0x46c), region = 202 }
 0x470   : >> { %s3326_s16 = sshll.u32 %s4662_s14, 3  ;;  %s3920_s18 = smov %s4662_s14  }
 0x471   : >> { %s2478_s15 = scalar_lea.vmem %s2459_s22, %s3326_s16 [#allocation10]   ;;  %s2479_s7 = scalar_lea.vmem %s2461_s25, %s3326_s16  }
 0x474 PF: > { %s4654_s20 = sld [smem:[#allocation16_spill]] }
 0x475   : > { %s4655_s18 = sld [smem:[#allocation15_spill]] }
 0x476   : > { %s4656_s19 = sld [smem:[#allocation17_spill]] }
 0x47a   : > { %p25_p5 = scmp.ge.s32.totalorder %s4654_s20, 9  }
 0x47c   :  { %27 = sbr.rel (!%p25_p5) target bundleno = 10 (0xa), region = 213 }
 0x481   :  { %2495 = vsyncpa [#allocation3], 1 }
 0x482   :  { %2497 = vsyncpa [#allocation3 + $0x1], 1 }
 0x483   :  { %2498 = vsyncpa [#allocation5], 1 }
 0x484   :  { %2499 = vsyncpa [#allocation8], 1 }

</bundles_post_ra>
